<compile_context>
chip_gen: v6e
topology: v6e:2x2x1
jax: 0.10.0
libtpu: 0.0.40
codegen_flags: <defaults>
</compile_context>

<pallas_src>
import functools

import jax
import jax.numpy as jnp
from jax import lax
from jax.experimental import pallas as pl
from jax.experimental.pallas import tpu as pltpu

K = 3                       # all convs / pools use kernel size 3
C1, C2, C3 = 10, 20, 40     # conv channel widths
H1, H2, NOUT = 120, 84, 4   # MLP head widths
NOUT_PAD = 128              # lane-dense output width used by the kernel store


def _seq_embed_kernel(xp_ref, w1_ref, b1_ref, w2_ref, b2_ref, w3_ref, b3_ref,
                      v1_ref, c1_ref, v2_ref, c2_ref, v3_ref, c3_ref,
                      o_ref, s2_ref, s3_ref, s4_ref):
    lc1, tb, _ = xp_ref.shape        # (126, tb, 3)
    lp1 = s2_ref.shape[0]            # 124  (pool1 out, stride 1)
    lc2 = s3_ref.shape[0]            # 61   (conv2 out, stride 2)
    lp2 = s4_ref.shape[0]            # 30   (pool2 out, stride 2)
    lc3 = (lp2 - K) // 2 + 1         # 14   (conv3 out, stride 2)

    def mm(x2d, w_ref, b_ref, relu=True):
        # bf16 MXU operands, f32 accumulation; bias add / ReLU stay f32.
        y = jnp.dot(x2d.astype(jnp.bfloat16), w_ref[...],
                    preferred_element_type=jnp.float32) + b_ref[...]
        return jnp.maximum(y, 0.0) if relu else y

    # conv1 (1->10, s=1) + ReLU: single im2col matmul.  Patch layout (t, b, k)
    # comes from the wrapper; rows of the 2-D matmul are t*tb + b.
    a1 = mm(xp_ref[...].reshape(lc1 * tb, K), w1_ref, b1_ref).reshape(lc1, tb, C1)

    # max_pool1 (k=3, s=1): contiguous leading-axis slices of the value.
    a2 = jnp.maximum(jnp.maximum(a1[0:lp1], a1[1:lp1 + 1]), a1[2:lp1 + 2])
    s2_ref[...] = a2

    # conv2 (10->20, s=2) + ReLU: stride-2 taps are strided leading-axis reads.
    p2 = jnp.concatenate([s2_ref[pl.ds(k, lc2, 2)] for k in range(K)], axis=-1)
    a3 = mm(p2.reshape(lc2 * tb, K * C1), w2_ref, b2_ref).reshape(lc2, tb, C2)
    s3_ref[...] = a3

    # max_pool2 (k=3, s=2)
    a4 = jnp.maximum(jnp.maximum(s3_ref[pl.ds(0, lp2, 2)],
                                 s3_ref[pl.ds(1, lp2, 2)]),
                     s3_ref[pl.ds(2, lp2, 2)])
    s4_ref[...] = a4

    # conv3 (20->40, s=2) + ReLU
    p3 = jnp.concatenate([s4_ref[pl.ds(k, lc3, 2)] for k in range(K)], axis=-1)
    a5 = mm(p3.reshape(lc3 * tb, K * C2), w3_ref, b3_ref).reshape(lc3, tb, C3)

    # linear1 folded over the 14 time steps (no flatten concat).  v1 is
    # pre-permuted to (t, c, h) so this matches torch's c*14+t flatten order.
    h = c1_ref[...]                                     # (1, H1) f32 bias
    for t in range(lc3):
        h = h + jnp.dot(a5[t].astype(jnp.bfloat16), v1_ref[t],
                        preferred_element_type=jnp.float32)
    h = jnp.maximum(h, 0.0)
    # linear2 + ReLU, linear3 (zero-padded to 128 lanes for a dense store)
    h = mm(h, v2_ref, c2_ref)
    out = mm(h, v3_ref, c3_ref, relu=False)
    o_ref[...] = out.astype(o_ref.dtype)


def _round_up(n, m):
    return ((n + m - 1) // m) * m


@functools.partial(jax.jit, static_argnames=("tb",))
def sequence_embed_pallas(x, params, *, tb=64):
    """x: (B, 1, L) float32 (PyTorch NCL layout; L=128 for the stock module)."""
    (w1, b1, w2, b2, w3, b3, l1w, l1b, l2w, l2b, l3w, l3b) = params
    B, cin, L = x.shape
    assert cin == 1
    dt = x.dtype

    # layer lengths (all "valid", kernel 3)
    lc1 = L - 2                    # conv1, stride 1
    lp1 = lc1 - 2                  # pool1, stride 1
    lc2 = (lp1 - K) // 2 + 1       # conv2, stride 2
    lp2 = (lc2 - K) // 2 + 1       # pool2, stride 2
    lc3 = (lp2 - K) // 2 + 1       # conv3, stride 2
    assert C3 * lc3 == l1w.shape[1], "input length inconsistent with linear1"

    # batch tile: multiple of 8, clamped to the padded batch; if that would
    # leave a single grid step, split it so v7x's 2 TensorCores share the work.
    tb = _round_up(max(8, min(tb, _round_up(B, 8))), 8)
    if (B + tb - 1) // tb == 1 and B > 8:
        tb = _round_up((B + 1) // 2, 8)
    b_pad = _round_up(B, tb)

    # ---- wrapper-side layout prep (pure data movement, no math) ----------------
    # conv1 im2col patches in (length, batch, tap) order, bf16: length leads so
    # in-kernel stride-2 stages are leading-axis strided reads.
    x2 = x[:, 0, :]
    xp = jnp.stack([x2[:, k:k + lc1] for k in range(K)], axis=-1)      # (B,126,3)
    xp = jnp.pad(xp, ((0, b_pad - B), (0, 0), (0, 0)))
    xp = jnp.transpose(xp, (1, 0, 2)).astype(jnp.bfloat16)             # (126,Bp,3)

    # conv weights -> (K*Cin, Cout) im2col matrices (bf16); biases -> (1, Cout) f32
    w1k = jnp.transpose(w1, (2, 1, 0)).reshape(K * 1, C1).astype(jnp.bfloat16)
    w2k = jnp.transpose(w2, (2, 1, 0)).reshape(K * C1, C2).astype(jnp.bfloat16)
    w3k = jnp.transpose(w3, (2, 1, 0)).reshape(K * C2, C3).astype(jnp.bfloat16)
    b1k = b1.reshape(1, C1).astype(jnp.float32)
    b2k = b2.reshape(1, C2).astype(jnp.float32)
    b3k = b3.reshape(1, C3).astype(jnp.float32)

    # linear weights: linear1 (H1, 560) [cols c*14+t] -> (14, 40, 120) so the
    # kernel can fold the flatten; linear3 zero-padded to 128 output lanes.
    v1 = jnp.transpose(l1w.reshape(H1, C3, lc3), (2, 1, 0)).astype(jnp.bfloat16)
    c1v = l1b.reshape(1, H1).astype(jnp.float32)
    v2 = l2w.T.astype(jnp.bfloat16)
    c2v = l2b.reshape(1, H2).astype(jnp.float32)
    v3 = jnp.pad(l3w.T, ((0, 0), (0, NOUT_PAD - NOUT))).astype(jnp.bfloat16)
    c3v = jnp.pad(l3b, (0, NOUT_PAD - NOUT)).reshape(1, NOUT_PAD).astype(jnp.float32)

    consts = (w1k, b1k, w2k, b2k, w3k, b3k, v1, c1v, v2, c2v, v3, c3v)

    def const_spec(arr):
        if arr.ndim == 2:
            return pl.BlockSpec(arr.shape, lambda i: (0, 0))
        return pl.BlockSpec(arr.shape, lambda i: (0, 0, 0))

    flops_row = 2 * (lc1 * K * C1 + lc2 * K * C1 * C2 + lc3 * K * C2 * C3
                     + C3 * lc3 * H1 + H1 * H2 + H2 * NOUT_PAD)
    cost = pl.CostEstimate(
        flops=b_pad * flops_row, transcendentals=0,
        bytes_accessed=int(xp.size) * 2
        + sum(int(a.size) * a.dtype.itemsize for a in consts)
        + b_pad * NOUT_PAD * 4)

    # ~0.37 MB of live VMEM per batch row (input dbl-buffer + scratches +
    # transients); leave headroom but stay under v7x's 64 MiB at tb<=64.
    vmem_limit = max(32 << 20, (8 + (tb * 9) // 16) << 20)

    out = pl.pallas_call(
        _seq_embed_kernel,
        out_shape=jax.ShapeDtypeStruct((b_pad, NOUT_PAD), jnp.float32),
        grid_spec=pltpu.PrefetchScalarGridSpec(
            num_scalar_prefetch=0,
            grid=(b_pad // tb,),
            in_specs=[pl.BlockSpec((lc1, tb, K), lambda i: (0, i, 0))]
                     + [const_spec(a) for a in consts],
            out_specs=pl.BlockSpec((tb, NOUT_PAD), lambda i: (i, 0)),
            scratch_shapes=[
                pltpu.VMEM((lp1, tb, C1), jnp.float32),   # pool1 out
                pltpu.VMEM((lc2, tb, C2), jnp.float32),   # conv2 out
                pltpu.VMEM((lp2, tb, C2), jnp.float32),   # pool2 out
            ],
        ),
        compiler_params=pltpu.CompilerParams(
            dimension_semantics=("parallel",),
            vmem_limit_bytes=int(vmem_limit)),
        cost_estimate=cost,
    )(xp, *consts)

    return out[:B, :NOUT].astype(dt)


def init_params(key, dtype=jnp.float32):
    """PyTorch-style default init (uniform +/- 1/sqrt(fan_in))."""
    ks = jax.random.split(key, 12)

    def u(k, shape, fan_in):
        b = 1.0 / (fan_in ** 0.5)
        return jax.random.uniform(k, shape, dtype, -b, b)

    w1, b1 = u(ks[0], (C1, 1, K), 1 * K), u(ks[1], (C1,), 1 * K)
    w2, b2 = u(ks[2], (C2, C1, K), C1 * K), u(ks[3], (C2,), C1 * K)
    w3, b3 = u(ks[4], (C3, C2, K), C2 * K), u(ks[5], (C3,), C2 * K)
    l1w, l1b = u(ks[6], (H1, C3 * 14), C3 * 14), u(ks[7], (H1,), C3 * 14)
    l2w, l2b = u(ks[8], (H2, H1), H1), u(ks[9], (H2,), H1)
    l3w, l3b = u(ks[10], (NOUT, H2), H2), u(ks[11], (NOUT,), H2)
    return (w1, b1, w2, b2, w3, b3, l1w, l1b, l2w, l2b, l3w, l3b)


def reference_forward(x, params):
    """Pure-JAX (XLA) reference mirroring the PyTorch module."""
    (w1, b1, w2, b2, w3, b3, l1w, l1b, l2w, l2b, l3w, l3b) = params
    dn = ('NCH', 'OIH', 'NCH')
    hp = jax.lax.Precision.HIGHEST

    def conv(a, w, b, s):
        y = lax.conv_general_dilated(a, w, window_strides=(s,), padding='VALID',
                                     dimension_numbers=dn, precision=hp)
        return y + b[None, :, None]

    def maxpool(a, s):
        return lax.reduce_window(a, -jnp.inf, lax.max,
                                 window_dimensions=(1, 1, K),
                                 window_strides=(1, 1, s), padding='VALID')

    a = jax.nn.relu(conv(x, w1, b1, 1))
    a = maxpool(a, 1)
    a = jax.nn.relu(conv(a, w2, b2, 2))
    a = maxpool(a, 2)
    a = jax.nn.relu(conv(a, w3, b3, 2))
    flat = a.reshape(a.shape[0], -1)                       # torch .view: c*14+t order
    h = jax.nn.relu(jnp.dot(flat, l1w.T, precision=hp) + l1b)
    h = jax.nn.relu(jnp.dot(h, l2w.T, precision=hp) + l2b)
    return jnp.dot(h, l3w.T, precision=hp) + l3b


if __name__ == "__main__":
    key = jax.random.PRNGKey(0)
    kx, kp = jax.random.split(key)
    params = init_params(kp)

    # small batch (single grid step); L=128 gives the 40*14 flatten the module expects
    B, L = 2, 128
    x = jax.random.normal(kx, (B, 1, L), jnp.float32)
    y = sequence_embed_pallas(x, params)
    jax.block_until_ready(y)
    ref = reference_forward(x, params)
    assert y.shape == (B, NOUT)
    assert jnp.allclose(y, ref, atol=2.5e-2, rtol=2.5e-2), \
        float(jnp.max(jnp.abs(y - ref)))

    # larger batch exercising the multi-step "parallel" grid and batch padding
    xb = jax.random.normal(jax.random.fold_in(kx, 1), (24, 1, L), jnp.float32)
    yb = sequence_embed_pallas(xb, params)
    jax.block_until_ready(yb)
    refb = reference_forward(xb, params)
    assert yb.shape == (24, NOUT)
    assert jnp.allclose(yb, refb, atol=2.5e-2, rtol=2.5e-2), \
        float(jnp.max(jnp.abs(yb - refb)))

    print("KERNEL_OK")
</pallas_src>

<mosaic_0001>
module attributes {stable_mosaic.version = 11 : i64} {
  func.func @_seq_embed_kernel(%arg0: i32, %arg1: memref<126x8x3xbf16, #tpu.memory_space<vmem>>, %arg2: memref<3x10xbf16, #tpu.memory_space<vmem>>, %arg3: memref<1x10xf32, #tpu.memory_space<vmem>>, %arg4: memref<30x20xbf16, #tpu.memory_space<vmem>>, %arg5: memref<1x20xf32, #tpu.memory_space<vmem>>, %arg6: memref<60x40xbf16, #tpu.memory_space<vmem>>, %arg7: memref<1x40xf32, #tpu.memory_space<vmem>>, %arg8: memref<14x40x120xbf16, #tpu.memory_space<vmem>>, %arg9: memref<1x120xf32, #tpu.memory_space<vmem>>, %arg10: memref<120x84xbf16, #tpu.memory_space<vmem>>, %arg11: memref<1x84xf32, #tpu.memory_space<vmem>>, %arg12: memref<84x128xbf16, #tpu.memory_space<vmem>>, %arg13: memref<1x128xf32, #tpu.memory_space<vmem>>, %arg14: memref<8x128xf32, #tpu.memory_space<vmem>>, %arg15: memref<124x8x10xf32, #tpu.memory_space<vmem>>, %arg16: memref<61x8x20xf32, #tpu.memory_space<vmem>>, %arg17: memref<30x8x20xf32, #tpu.memory_space<vmem>>) attributes {dimension_semantics = [#tpu.dimension_semantics<parallel>], iteration_bounds = array<i64: 1>, scalar_prefetch = 0 : i64, scratch_operands = 3 : i64, tpu.core_type = #tpu.core_type<tc>, window_params = [{transform_indices = @transform_0, window_bounds = array<i64: 126, 8, 3>}, {pipeline_mode = #tpu.pipeline_mode<synchronous>, transform_indices = @transform_1, window_bounds = array<i64: 3, 10>}, {pipeline_mode = #tpu.pipeline_mode<synchronous>, transform_indices = @transform_2, window_bounds = array<i64: 1, 10>}, {pipeline_mode = #tpu.pipeline_mode<synchronous>, transform_indices = @transform_3, window_bounds = array<i64: 30, 20>}, {pipeline_mode = #tpu.pipeline_mode<synchronous>, transform_indices = @transform_4, window_bounds = array<i64: 1, 20>}, {pipeline_mode = #tpu.pipeline_mode<synchronous>, transform_indices = @transform_5, window_bounds = array<i64: 60, 40>}, {pipeline_mode = #tpu.pipeline_mode<synchronous>, transform_indices = @transform_6, window_bounds = array<i64: 1, 40>}, {pipeline_mode = #tpu.pipeline_mode<synchronous>, transform_indices = @transform_7, window_bounds = array<i64: 14, 40, 120>}, {pipeline_mode = #tpu.pipeline_mode<synchronous>, transform_indices = @transform_8, window_bounds = array<i64: 1, 120>}, {pipeline_mode = #tpu.pipeline_mode<synchronous>, transform_indices = @transform_9, window_bounds = array<i64: 120, 84>}, {pipeline_mode = #tpu.pipeline_mode<synchronous>, transform_indices = @transform_10, window_bounds = array<i64: 1, 84>}, {pipeline_mode = #tpu.pipeline_mode<synchronous>, transform_indices = @transform_11, window_bounds = array<i64: 84, 128>}, {pipeline_mode = #tpu.pipeline_mode<synchronous>, transform_indices = @transform_12, window_bounds = array<i64: 1, 128>}, {transform_indices = @transform_13, window_bounds = array<i64: 8, 128>}]} {
    %c0 = arith.constant 0 : index
    %c0_0 = arith.constant 0 : index
    %c0_1 = arith.constant 0 : index
    %0 = vector.load %arg1[%c0, %c0_0, %c0_1] : memref<126x8x3xbf16, #tpu.memory_space<vmem>>, vector<126x8x3xbf16>
    %1 = vector.shape_cast %0 : vector<126x8x3xbf16> to vector<1008x3xbf16>
    %c0_2 = arith.constant 0 : index
    %c0_3 = arith.constant 0 : index
    %2 = vector.load %arg2[%c0_2, %c0_3] : memref<3x10xbf16, #tpu.memory_space<vmem>>, vector<3x10xbf16>
    %cst = arith.constant dense<0.000000e+00> : vector<1008x10xf32>
    %3 = tpu.matmul %1, %2, %cst {dimension_numbers = #tpu.dot_dimension_numbers<[1], [0], [0], [1], [0, 0, 1, 1], [], []>} : vector<1008x3xbf16>, vector<3x10xbf16>, vector<1008x10xf32> -> vector<1008x10xf32>
    %c0_4 = arith.constant 0 : index
    %c0_5 = arith.constant 0 : index
    %4 = vector.load %arg3[%c0_4, %c0_5] : memref<1x10xf32, #tpu.memory_space<vmem>>, vector<1x10xf32>
    %5 = vector.broadcast %4 : vector<1x10xf32> to vector<1008x10xf32>
    %6 = arith.addf %3, %5 : vector<1008x10xf32>
    %cst_6 = arith.constant 0.000000e+00 : f32
    %7 = vector.broadcast %cst_6 : f32 to vector<1008x10xf32>
    %8 = arith.maximumf %6, %7 : vector<1008x10xf32>
    %9 = vector.shape_cast %8 : vector<1008x10xf32> to vector<126x8x10xf32>
    %10 = vector.extract_strided_slice %9 {offsets = [0, 0, 0], sizes = [124, 8, 10], strides = [1, 1, 1]} : vector<126x8x10xf32> to vector<124x8x10xf32>
    %11 = vector.extract_strided_slice %9 {offsets = [1, 0, 0], sizes = [124, 8, 10], strides = [1, 1, 1]} : vector<126x8x10xf32> to vector<124x8x10xf32>
    %12 = arith.maximumf %10, %11 : vector<124x8x10xf32>
    %13 = vector.extract_strided_slice %9 {offsets = [2, 0, 0], sizes = [124, 8, 10], strides = [1, 1, 1]} : vector<126x8x10xf32> to vector<124x8x10xf32>
    %14 = arith.maximumf %12, %13 : vector<124x8x10xf32>
    %c0_7 = arith.constant 0 : index
    %c0_8 = arith.constant 0 : index
    %c0_9 = arith.constant 0 : index
    %15 = vector.load %arg15[%c0_7, %c0_8, %c0_9] : memref<124x8x10xf32, #tpu.memory_space<vmem>>, vector<124x8x10xf32>
    tpu.vector_store %arg15[%c0_7, %c0_8, %c0_9], %14 {strides = array<i32>} : memref<124x8x10xf32, #tpu.memory_space<vmem>>, vector<124x8x10xf32>,
    %c0_10 = arith.constant 0 : index
    %c0_11 = arith.constant 0 : index
    %c0_12 = arith.constant 0 : index
    %16 = tpu.strided_load %arg15[%c0_10, %c0_11, %c0_12] {strides = array<i32: 2, 1, 1>} : memref<124x8x10xf32, #tpu.memory_space<vmem>>, vector<61x8x10xf32>
    %c1 = arith.constant 1 : index
    %c0_13 = arith.constant 0 : index
    %c0_14 = arith.constant 0 : index
    %17 = tpu.strided_load %arg15[%c1, %c0_13, %c0_14] {strides = array<i32: 2, 1, 1>} : memref<124x8x10xf32, #tpu.memory_space<vmem>>, vector<61x8x10xf32>
    %c2 = arith.constant 2 : index
    %c0_15 = arith.constant 0 : index
    %c0_16 = arith.constant 0 : index
    %18 = tpu.strided_load %arg15[%c2, %c0_15, %c0_16] {strides = array<i32: 2, 1, 1>} : memref<124x8x10xf32, #tpu.memory_space<vmem>>, vector<61x8x10xf32>
    %19 = tpu.concatenate %16, %17, %18 in 2 : vector<61x8x10xf32>, vector<61x8x10xf32>, vector<61x8x10xf32> -> vector<61x8x30xf32>
    %20 = vector.shape_cast %19 : vector<61x8x30xf32> to vector<488x30xf32>
    %21 = arith.truncf %20 : vector<488x30xf32> to vector<488x30xbf16>
    %c0_17 = arith.constant 0 : index
    %c0_18 = arith.constant 0 : index
    %22 = vector.load %arg4[%c0_17, %c0_18] : memref<30x20xbf16, #tpu.memory_space<vmem>>, vector<30x20xbf16>
    %cst_19 = arith.constant dense<0.000000e+00> : vector<488x20xf32>
    %23 = tpu.matmul %21, %22, %cst_19 {dimension_numbers = #tpu.dot_dimension_numbers<[1], [0], [0], [1], [0, 0, 1, 1], [], []>} : vector<488x30xbf16>, vector<30x20xbf16>, vector<488x20xf32> -> vector<488x20xf32>
    %c0_20 = arith.constant 0 : index
    %c0_21 = arith.constant 0 : index
    %24 = vector.load %arg5[%c0_20, %c0_21] : memref<1x20xf32, #tpu.memory_space<vmem>>, vector<1x20xf32>
    %25 = vector.broadcast %24 : vector<1x20xf32> to vector<488x20xf32>
    %26 = arith.addf %23, %25 : vector<488x20xf32>
    %cst_22 = arith.constant 0.000000e+00 : f32
    %27 = vector.broadcast %cst_22 : f32 to vector<488x20xf32>
    %28 = arith.maximumf %26, %27 : vector<488x20xf32>
    %29 = vector.shape_cast %28 : vector<488x20xf32> to vector<61x8x20xf32>
    %c0_23 = arith.constant 0 : index
    %c0_24 = arith.constant 0 : index
    %c0_25 = arith.constant 0 : index
    %30 = vector.load %arg16[%c0_23, %c0_24, %c0_25] : memref<61x8x20xf32, #tpu.memory_space<vmem>>, vector<61x8x20xf32>
    tpu.vector_store %arg16[%c0_23, %c0_24, %c0_25], %29 {strides = array<i32>} : memref<61x8x20xf32, #tpu.memory_space<vmem>>, vector<61x8x20xf32>,
    %c0_26 = arith.constant 0 : index
    %c0_27 = arith.constant 0 : index
    %c0_28 = arith.constant 0 : index
    %31 = tpu.strided_load %arg16[%c0_26, %c0_27, %c0_28] {strides = array<i32: 2, 1, 1>} : memref<61x8x20xf32, #tpu.memory_space<vmem>>, vector<30x8x20xf32>
    %c1_29 = arith.constant 1 : index
    %c0_30 = arith.constant 0 : index
    %c0_31 = arith.constant 0 : index
    %32 = tpu.strided_load %arg16[%c1_29, %c0_30, %c0_31] {strides = array<i32: 2, 1, 1>} : memref<61x8x20xf32, #tpu.memory_space<vmem>>, vector<30x8x20xf32>
    %33 = arith.maximumf %31, %32 : vector<30x8x20xf32>
    %c2_32 = arith.constant 2 : index
    %c0_33 = arith.constant 0 : index
    %c0_34 = arith.constant 0 : index
    %34 = tpu.strided_load %arg16[%c2_32, %c0_33, %c0_34] {strides = array<i32: 2, 1, 1>} : memref<61x8x20xf32, #tpu.memory_space<vmem>>, vector<30x8x20xf32>
    %35 = arith.maximumf %33, %34 : vector<30x8x20xf32>
    %c0_35 = arith.constant 0 : index
    %c0_36 = arith.constant 0 : index
    %c0_37 = arith.constant 0 : index
    %36 = vector.load %arg17[%c0_35, %c0_36, %c0_37] : memref<30x8x20xf32, #tpu.memory_space<vmem>>, vector<30x8x20xf32>
    tpu.vector_store %arg17[%c0_35, %c0_36, %c0_37], %35 {strides = array<i32>} : memref<30x8x20xf32, #tpu.memory_space<vmem>>, vector<30x8x20xf32>,
    %c0_38 = arith.constant 0 : index
    %c0_39 = arith.constant 0 : index
    %c0_40 = arith.constant 0 : index
    %37 = tpu.strided_load %arg17[%c0_38, %c0_39, %c0_40] {strides = array<i32: 2, 1, 1>} : memref<30x8x20xf32, #tpu.memory_space<vmem>>, vector<14x8x20xf32>
    %c1_41 = arith.constant 1 : index
    %c0_42 = arith.constant 0 : index
    %c0_43 = arith.constant 0 : index
    %38 = tpu.strided_load %arg17[%c1_41, %c0_42, %c0_43] {strides = array<i32: 2, 1, 1>} : memref<30x8x20xf32, #tpu.memory_space<vmem>>, vector<14x8x20xf32>
    %c2_44 = arith.constant 2 : index
    %c0_45 = arith.constant 0 : index
    %c0_46 = arith.constant 0 : index
    %39 = tpu.strided_load %arg17[%c2_44, %c0_45, %c0_46] {strides = array<i32: 2, 1, 1>} : memref<30x8x20xf32, #tpu.memory_space<vmem>>, vector<14x8x20xf32>
    %40 = tpu.concatenate %37, %38, %39 in 2 : vector<14x8x20xf32>, vector<14x8x20xf32>, vector<14x8x20xf32> -> vector<14x8x60xf32>
    %41 = vector.shape_cast %40 : vector<14x8x60xf32> to vector<112x60xf32>
    %42 = arith.truncf %41 : vector<112x60xf32> to vector<112x60xbf16>
    %c0_47 = arith.constant 0 : index
    %c0_48 = arith.constant 0 : index
    %43 = vector.load %arg6[%c0_47, %c0_48] : memref<60x40xbf16, #tpu.memory_space<vmem>>, vector<60x40xbf16>
    %cst_49 = arith.constant dense<0.000000e+00> : vector<112x40xf32>
    %44 = tpu.matmul %42, %43, %cst_49 {dimension_numbers = #tpu.dot_dimension_numbers<[1], [0], [0], [1], [0, 0, 1, 1], [], []>} : vector<112x60xbf16>, vector<60x40xbf16>, vector<112x40xf32> -> vector<112x40xf32>
    %c0_50 = arith.constant 0 : index
    %c0_51 = arith.constant 0 : index
    %45 = vector.load %arg7[%c0_50, %c0_51] : memref<1x40xf32, #tpu.memory_space<vmem>>, vector<1x40xf32>
    %46 = vector.broadcast %45 : vector<1x40xf32> to vector<112x40xf32>
    %47 = arith.addf %44, %46 : vector<112x40xf32>
    %cst_52 = arith.constant 0.000000e+00 : f32
    %48 = vector.broadcast %cst_52 : f32 to vector<112x40xf32>
    %49 = arith.maximumf %47, %48 : vector<112x40xf32>
    %50 = vector.shape_cast %49 : vector<112x40xf32> to vector<14x8x40xf32>
    %c0_53 = arith.constant 0 : index
    %c0_54 = arith.constant 0 : index
    %51 = vector.load %arg9[%c0_53, %c0_54] : memref<1x120xf32, #tpu.memory_space<vmem>>, vector<1x120xf32>
    %52 = vector.extract_strided_slice %50 {offsets = [0, 0, 0], sizes = [1, 8, 40], strides = [1, 1, 1]} : vector<14x8x40xf32> to vector<1x8x40xf32>
    %53 = vector.shape_cast %52 : vector<1x8x40xf32> to vector<8x40xf32>
    %54 = arith.truncf %53 : vector<8x40xf32> to vector<8x40xbf16>
    %c0_55 = arith.constant 0 : index
    %c0_56 = arith.constant 0 : index
    %c0_57 = arith.constant 0 : index
    %55 = vector.load %arg8[%c0_55, %c0_56, %c0_57] : memref<14x40x120xbf16, #tpu.memory_space<vmem>>, vector<1x40x120xbf16>
    %56 = vector.shape_cast %55 : vector<1x40x120xbf16> to vector<40x120xbf16>
    %cst_58 = arith.constant dense<0.000000e+00> : vector<8x120xf32>
    %57 = tpu.matmul %54, %56, %cst_58 {dimension_numbers = #tpu.dot_dimension_numbers<[1], [0], [0], [1], [0, 0, 1, 1], [], []>} : vector<8x40xbf16>, vector<40x120xbf16>, vector<8x120xf32> -> vector<8x120xf32>
    %58 = vector.broadcast %51 : vector<1x120xf32> to vector<8x120xf32>
    %59 = arith.addf %58, %57 : vector<8x120xf32>
    %60 = vector.extract_strided_slice %50 {offsets = [1, 0, 0], sizes = [1, 8, 40], strides = [1, 1, 1]} : vector<14x8x40xf32> to vector<1x8x40xf32>
    %61 = vector.shape_cast %60 : vector<1x8x40xf32> to vector<8x40xf32>
    %62 = arith.truncf %61 : vector<8x40xf32> to vector<8x40xbf16>
    %c1_59 = arith.constant 1 : index
    %c0_60 = arith.constant 0 : index
    %c0_61 = arith.constant 0 : index
    %63 = vector.load %arg8[%c1_59, %c0_60, %c0_61] : memref<14x40x120xbf16, #tpu.memory_space<vmem>>, vector<1x40x120xbf16>
    %64 = vector.shape_cast %63 : vector<1x40x120xbf16> to vector<40x120xbf16>
    %cst_62 = arith.constant dense<0.000000e+00> : vector<8x120xf32>
    %65 = tpu.matmul %62, %64, %cst_62 {dimension_numbers = #tpu.dot_dimension_numbers<[1], [0], [0], [1], [0, 0, 1, 1], [], []>} : vector<8x40xbf16>, vector<40x120xbf16>, vector<8x120xf32> -> vector<8x120xf32>
    %66 = arith.addf %59, %65 : vector<8x120xf32>
    %67 = vector.extract_strided_slice %50 {offsets = [2, 0, 0], sizes = [1, 8, 40], strides = [1, 1, 1]} : vector<14x8x40xf32> to vector<1x8x40xf32>
    %68 = vector.shape_cast %67 : vector<1x8x40xf32> to vector<8x40xf32>
    %69 = arith.truncf %68 : vector<8x40xf32> to vector<8x40xbf16>
    %c2_63 = arith.constant 2 : index
    %c0_64 = arith.constant 0 : index
    %c0_65 = arith.constant 0 : index
    %70 = vector.load %arg8[%c2_63, %c0_64, %c0_65] : memref<14x40x120xbf16, #tpu.memory_space<vmem>>, vector<1x40x120xbf16>
    %71 = vector.shape_cast %70 : vector<1x40x120xbf16> to vector<40x120xbf16>
    %cst_66 = arith.constant dense<0.000000e+00> : vector<8x120xf32>
    %72 = tpu.matmul %69, %71, %cst_66 {dimension_numbers = #tpu.dot_dimension_numbers<[1], [0], [0], [1], [0, 0, 1, 1], [], []>} : vector<8x40xbf16>, vector<40x120xbf16>, vector<8x120xf32> -> vector<8x120xf32>
    %73 = arith.addf %66, %72 : vector<8x120xf32>
    %74 = vector.extract_strided_slice %50 {offsets = [3, 0, 0], sizes = [1, 8, 40], strides = [1, 1, 1]} : vector<14x8x40xf32> to vector<1x8x40xf32>
    %75 = vector.shape_cast %74 : vector<1x8x40xf32> to vector<8x40xf32>
    %76 = arith.truncf %75 : vector<8x40xf32> to vector<8x40xbf16>
    %c3 = arith.constant 3 : index
    %c0_67 = arith.constant 0 : index
    %c0_68 = arith.constant 0 : index
    %77 = vector.load %arg8[%c3, %c0_67, %c0_68] : memref<14x40x120xbf16, #tpu.memory_space<vmem>>, vector<1x40x120xbf16>
    %78 = vector.shape_cast %77 : vector<1x40x120xbf16> to vector<40x120xbf16>
    %cst_69 = arith.constant dense<0.000000e+00> : vector<8x120xf32>
    %79 = tpu.matmul %76, %78, %cst_69 {dimension_numbers = #tpu.dot_dimension_numbers<[1], [0], [0], [1], [0, 0, 1, 1], [], []>} : vector<8x40xbf16>, vector<40x120xbf16>, vector<8x120xf32> -> vector<8x120xf32>
    %80 = arith.addf %73, %79 : vector<8x120xf32>
    %81 = vector.extract_strided_slice %50 {offsets = [4, 0, 0], sizes = [1, 8, 40], strides = [1, 1, 1]} : vector<14x8x40xf32> to vector<1x8x40xf32>
    %82 = vector.shape_cast %81 : vector<1x8x40xf32> to vector<8x40xf32>
    %83 = arith.truncf %82 : vector<8x40xf32> to vector<8x40xbf16>
    %c4 = arith.constant 4 : index
    %c0_70 = arith.constant 0 : index
    %c0_71 = arith.constant 0 : index
    %84 = vector.load %arg8[%c4, %c0_70, %c0_71] : memref<14x40x120xbf16, #tpu.memory_space<vmem>>, vector<1x40x120xbf16>
    %85 = vector.shape_cast %84 : vector<1x40x120xbf16> to vector<40x120xbf16>
    %cst_72 = arith.constant dense<0.000000e+00> : vector<8x120xf32>
    %86 = tpu.matmul %83, %85, %cst_72 {dimension_numbers = #tpu.dot_dimension_numbers<[1], [0], [0], [1], [0, 0, 1, 1], [], []>} : vector<8x40xbf16>, vector<40x120xbf16>, vector<8x120xf32> -> vector<8x120xf32>
    %87 = arith.addf %80, %86 : vector<8x120xf32>
    %88 = vector.extract_strided_slice %50 {offsets = [5, 0, 0], sizes = [1, 8, 40], strides = [1, 1, 1]} : vector<14x8x40xf32> to vector<1x8x40xf32>
    %89 = vector.shape_cast %88 : vector<1x8x40xf32> to vector<8x40xf32>
    %90 = arith.truncf %89 : vector<8x40xf32> to vector<8x40xbf16>
    %c5 = arith.constant 5 : index
    %c0_73 = arith.constant 0 : index
    %c0_74 = arith.constant 0 : index
    %91 = vector.load %arg8[%c5, %c0_73, %c0_74] : memref<14x40x120xbf16, #tpu.memory_space<vmem>>, vector<1x40x120xbf16>
    %92 = vector.shape_cast %91 : vector<1x40x120xbf16> to vector<40x120xbf16>
    %cst_75 = arith.constant dense<0.000000e+00> : vector<8x120xf32>
    %93 = tpu.matmul %90, %92, %cst_75 {dimension_numbers = #tpu.dot_dimension_numbers<[1], [0], [0], [1], [0, 0, 1, 1], [], []>} : vector<8x40xbf16>, vector<40x120xbf16>, vector<8x120xf32> -> vector<8x120xf32>
    %94 = arith.addf %87, %93 : vector<8x120xf32>
    %95 = vector.extract_strided_slice %50 {offsets = [6, 0, 0], sizes = [1, 8, 40], strides = [1, 1, 1]} : vector<14x8x40xf32> to vector<1x8x40xf32>
    %96 = vector.shape_cast %95 : vector<1x8x40xf32> to vector<8x40xf32>
    %97 = arith.truncf %96 : vector<8x40xf32> to vector<8x40xbf16>
    %c6 = arith.constant 6 : index
    %c0_76 = arith.constant 0 : index
    %c0_77 = arith.constant 0 : index
    %98 = vector.load %arg8[%c6, %c0_76, %c0_77] : memref<14x40x120xbf16, #tpu.memory_space<vmem>>, vector<1x40x120xbf16>
    %99 = vector.shape_cast %98 : vector<1x40x120xbf16> to vector<40x120xbf16>
    %cst_78 = arith.constant dense<0.000000e+00> : vector<8x120xf32>
    %100 = tpu.matmul %97, %99, %cst_78 {dimension_numbers = #tpu.dot_dimension_numbers<[1], [0], [0], [1], [0, 0, 1, 1], [], []>} : vector<8x40xbf16>, vector<40x120xbf16>, vector<8x120xf32> -> vector<8x120xf32>
    %101 = arith.addf %94, %100 : vector<8x120xf32>
    %102 = vector.extract_strided_slice %50 {offsets = [7, 0, 0], sizes = [1, 8, 40], strides = [1, 1, 1]} : vector<14x8x40xf32> to vector<1x8x40xf32>
    %103 = vector.shape_cast %102 : vector<1x8x40xf32> to vector<8x40xf32>
    %104 = arith.truncf %103 : vector<8x40xf32> to vector<8x40xbf16>
    %c7 = arith.constant 7 : index
    %c0_79 = arith.constant 0 : index
    %c0_80 = arith.constant 0 : index
    %105 = vector.load %arg8[%c7, %c0_79, %c0_80] : memref<14x40x120xbf16, #tpu.memory_space<vmem>>, vector<1x40x120xbf16>
    %106 = vector.shape_cast %105 : vector<1x40x120xbf16> to vector<40x120xbf16>
    %cst_81 = arith.constant dense<0.000000e+00> : vector<8x120xf32>
    %107 = tpu.matmul %104, %106, %cst_81 {dimension_numbers = #tpu.dot_dimension_numbers<[1], [0], [0], [1], [0, 0, 1, 1], [], []>} : vector<8x40xbf16>, vector<40x120xbf16>, vector<8x120xf32> -> vector<8x120xf32>
    %108 = arith.addf %101, %107 : vector<8x120xf32>
    %109 = vector.extract_strided_slice %50 {offsets = [8, 0, 0], sizes = [1, 8, 40], strides = [1, 1, 1]} : vector<14x8x40xf32> to vector<1x8x40xf32>
    %110 = vector.shape_cast %109 : vector<1x8x40xf32> to vector<8x40xf32>
    %111 = arith.truncf %110 : vector<8x40xf32> to vector<8x40xbf16>
    %c8 = arith.constant 8 : index
    %c0_82 = arith.constant 0 : index
    %c0_83 = arith.constant 0 : index
    %112 = vector.load %arg8[%c8, %c0_82, %c0_83] : memref<14x40x120xbf16, #tpu.memory_space<vmem>>, vector<1x40x120xbf16>
    %113 = vector.shape_cast %112 : vector<1x40x120xbf16> to vector<40x120xbf16>
    %cst_84 = arith.constant dense<0.000000e+00> : vector<8x120xf32>
    %114 = tpu.matmul %111, %113, %cst_84 {dimension_numbers = #tpu.dot_dimension_numbers<[1], [0], [0], [1], [0, 0, 1, 1], [], []>} : vector<8x40xbf16>, vector<40x120xbf16>, vector<8x120xf32> -> vector<8x120xf32>
    %115 = arith.addf %108, %114 : vector<8x120xf32>
    %116 = vector.extract_strided_slice %50 {offsets = [9, 0, 0], sizes = [1, 8, 40], strides = [1, 1, 1]} : vector<14x8x40xf32> to vector<1x8x40xf32>
    %117 = vector.shape_cast %116 : vector<1x8x40xf32> to vector<8x40xf32>
    %118 = arith.truncf %117 : vector<8x40xf32> to vector<8x40xbf16>
    %c9 = arith.constant 9 : index
    %c0_85 = arith.constant 0 : index
    %c0_86 = arith.constant 0 : index
    %119 = vector.load %arg8[%c9, %c0_85, %c0_86] : memref<14x40x120xbf16, #tpu.memory_space<vmem>>, vector<1x40x120xbf16>
    %120 = vector.shape_cast %119 : vector<1x40x120xbf16> to vector<40x120xbf16>
    %cst_87 = arith.constant dense<0.000000e+00> : vector<8x120xf32>
    %121 = tpu.matmul %118, %120, %cst_87 {dimension_numbers = #tpu.dot_dimension_numbers<[1], [0], [0], [1], [0, 0, 1, 1], [], []>} : vector<8x40xbf16>, vector<40x120xbf16>, vector<8x120xf32> -> vector<8x120xf32>
    %122 = arith.addf %115, %121 : vector<8x120xf32>
    %123 = vector.extract_strided_slice %50 {offsets = [10, 0, 0], sizes = [1, 8, 40], strides = [1, 1, 1]} : vector<14x8x40xf32> to vector<1x8x40xf32>
    %124 = vector.shape_cast %123 : vector<1x8x40xf32> to vector<8x40xf32>
    %125 = arith.truncf %124 : vector<8x40xf32> to vector<8x40xbf16>
    %c10 = arith.constant 10 : index
    %c0_88 = arith.constant 0 : index
    %c0_89 = arith.constant 0 : index
    %126 = vector.load %arg8[%c10, %c0_88, %c0_89] : memref<14x40x120xbf16, #tpu.memory_space<vmem>>, vector<1x40x120xbf16>
    %127 = vector.shape_cast %126 : vector<1x40x120xbf16> to vector<40x120xbf16>
    %cst_90 = arith.constant dense<0.000000e+00> : vector<8x120xf32>
    %128 = tpu.matmul %125, %127, %cst_90 {dimension_numbers = #tpu.dot_dimension_numbers<[1], [0], [0], [1], [0, 0, 1, 1], [], []>} : vector<8x40xbf16>, vector<40x120xbf16>, vector<8x120xf32> -> vector<8x120xf32>
    %129 = arith.addf %122, %128 : vector<8x120xf32>
    %130 = vector.extract_strided_slice %50 {offsets = [11, 0, 0], sizes = [1, 8, 40], strides = [1, 1, 1]} : vector<14x8x40xf32> to vector<1x8x40xf32>
    %131 = vector.shape_cast %130 : vector<1x8x40xf32> to vector<8x40xf32>
    %132 = arith.truncf %131 : vector<8x40xf32> to vector<8x40xbf16>
    %c11 = arith.constant 11 : index
    %c0_91 = arith.constant 0 : index
    %c0_92 = arith.constant 0 : index
    %133 = vector.load %arg8[%c11, %c0_91, %c0_92] : memref<14x40x120xbf16, #tpu.memory_space<vmem>>, vector<1x40x120xbf16>
    %134 = vector.shape_cast %133 : vector<1x40x120xbf16> to vector<40x120xbf16>
    %cst_93 = arith.constant dense<0.000000e+00> : vector<8x120xf32>
    %135 = tpu.matmul %132, %134, %cst_93 {dimension_numbers = #tpu.dot_dimension_numbers<[1], [0], [0], [1], [0, 0, 1, 1], [], []>} : vector<8x40xbf16>, vector<40x120xbf16>, vector<8x120xf32> -> vector<8x120xf32>
    %136 = arith.addf %129, %135 : vector<8x120xf32>
    %137 = vector.extract_strided_slice %50 {offsets = [12, 0, 0], sizes = [1, 8, 40], strides = [1, 1, 1]} : vector<14x8x40xf32> to vector<1x8x40xf32>
    %138 = vector.shape_cast %137 : vector<1x8x40xf32> to vector<8x40xf32>
    %139 = arith.truncf %138 : vector<8x40xf32> to vector<8x40xbf16>
    %c12 = arith.constant 12 : index
    %c0_94 = arith.constant 0 : index
    %c0_95 = arith.constant 0 : index
    %140 = vector.load %arg8[%c12, %c0_94, %c0_95] : memref<14x40x120xbf16, #tpu.memory_space<vmem>>, vector<1x40x120xbf16>
    %141 = vector.shape_cast %140 : vector<1x40x120xbf16> to vector<40x120xbf16>
    %cst_96 = arith.constant dense<0.000000e+00> : vector<8x120xf32>
    %142 = tpu.matmul %139, %141, %cst_96 {dimension_numbers = #tpu.dot_dimension_numbers<[1], [0], [0], [1], [0, 0, 1, 1], [], []>} : vector<8x40xbf16>, vector<40x120xbf16>, vector<8x120xf32> -> vector<8x120xf32>
    %143 = arith.addf %136, %142 : vector<8x120xf32>
    %144 = vector.extract_strided_slice %50 {offsets = [13, 0, 0], sizes = [1, 8, 40], strides = [1, 1, 1]} : vector<14x8x40xf32> to vector<1x8x40xf32>
    %145 = vector.shape_cast %144 : vector<1x8x40xf32> to vector<8x40xf32>
    %146 = arith.truncf %145 : vector<8x40xf32> to vector<8x40xbf16>
    %c13 = arith.constant 13 : index
    %c0_97 = arith.constant 0 : index
    %c0_98 = arith.constant 0 : index
    %147 = vector.load %arg8[%c13, %c0_97, %c0_98] : memref<14x40x120xbf16, #tpu.memory_space<vmem>>, vector<1x40x120xbf16>
    %148 = vector.shape_cast %147 : vector<1x40x120xbf16> to vector<40x120xbf16>
    %cst_99 = arith.constant dense<0.000000e+00> : vector<8x120xf32>
    %149 = tpu.matmul %146, %148, %cst_99 {dimension_numbers = #tpu.dot_dimension_numbers<[1], [0], [0], [1], [0, 0, 1, 1], [], []>} : vector<8x40xbf16>, vector<40x120xbf16>, vector<8x120xf32> -> vector<8x120xf32>
    %150 = arith.addf %143, %149 : vector<8x120xf32>
    %cst_100 = arith.constant 0.000000e+00 : f32
    %151 = vector.broadcast %cst_100 : f32 to vector<8x120xf32>
    %152 = arith.maximumf %150, %151 : vector<8x120xf32>
    %153 = arith.truncf %152 : vector<8x120xf32> to vector<8x120xbf16>
    %c0_101 = arith.constant 0 : index
    %c0_102 = arith.constant 0 : index
    %154 = vector.load %arg10[%c0_101, %c0_102] : memref<120x84xbf16, #tpu.memory_space<vmem>>, vector<120x84xbf16>
    %cst_103 = arith.constant dense<0.000000e+00> : vector<8x84xf32>
    %155 = tpu.matmul %153, %154, %cst_103 {dimension_numbers = #tpu.dot_dimension_numbers<[1], [0], [0], [1], [0, 0, 1, 1], [], []>} : vector<8x120xbf16>, vector<120x84xbf16>, vector<8x84xf32> -> vector<8x84xf32>
    %c0_104 = arith.constant 0 : index
    %c0_105 = arith.constant 0 : index
    %156 = vector.load %arg11[%c0_104, %c0_105] : memref<1x84xf32, #tpu.memory_space<vmem>>, vector<1x84xf32>
    %157 = vector.broadcast %156 : vector<1x84xf32> to vector<8x84xf32>
    %158 = arith.addf %155, %157 : vector<8x84xf32>
    %cst_106 = arith.constant 0.000000e+00 : f32
    %159 = vector.broadcast %cst_106 : f32 to vector<8x84xf32>
    %160 = arith.maximumf %158, %159 : vector<8x84xf32>
    %161 = arith.truncf %160 : vector<8x84xf32> to vector<8x84xbf16>
    %c0_107 = arith.constant 0 : index
    %c0_108 = arith.constant 0 : index
    %162 = vector.load %arg12[%c0_107, %c0_108] : memref<84x128xbf16, #tpu.memory_space<vmem>>, vector<84x128xbf16>
    %cst_109 = arith.constant dense<0.000000e+00> : vector<8x128xf32>
    %163 = tpu.matmul %161, %162, %cst_109 {dimension_numbers = #tpu.dot_dimension_numbers<[1], [0], [0], [1], [0, 0, 1, 1], [], []>} : vector<8x84xbf16>, vector<84x128xbf16>, vector<8x128xf32> -> vector<8x128xf32>
    %c0_110 = arith.constant 0 : index
    %c0_111 = arith.constant 0 : index
    %164 = vector.load %arg13[%c0_110, %c0_111] : memref<1x128xf32, #tpu.memory_space<vmem>>, vector<1x128xf32>
    %165 = vector.broadcast %164 : vector<1x128xf32> to vector<8x128xf32>
    %166 = arith.addf %163, %165 : vector<8x128xf32>
    %c0_112 = arith.constant 0 : index
    %c0_113 = arith.constant 0 : index
    %167 = vector.load %arg14[%c0_112, %c0_113] : memref<8x128xf32, #tpu.memory_space<vmem>>, vector<8x128xf32>
    tpu.vector_store %arg14[%c0_112, %c0_113], %166 {strides = array<i32>} : memref<8x128xf32, #tpu.memory_space<vmem>>, vector<8x128xf32>,
    return
  }
  func.func @transform_0(%arg0: i32) -> (i32, i32, i32) {
    %c0_i32 = arith.constant 0 : i32
    %c0_i32_0 = arith.constant 0 : i32
    %c0_i32_1 = arith.constant 0 : i32
    return %c0_i32, %arg0, %c0_i32_0 : i32, i32, i32
  }
  func.func @transform_1(%arg0: i32) -> (i32, i32) {
    %c0_i32 = arith.constant 0 : i32
    %c0_i32_0 = arith.constant 0 : i32
    %c0_i32_1 = arith.constant 0 : i32
    return %c0_i32, %c0_i32_0 : i32, i32
  }
  func.func @transform_2(%arg0: i32) -> (i32, i32) {
    %c0_i32 = arith.constant 0 : i32
    %c0_i32_0 = arith.constant 0 : i32
    %c0_i32_1 = arith.constant 0 : i32
    return %c0_i32, %c0_i32_0 : i32, i32
  }
  func.func @transform_3(%arg0: i32) -> (i32, i32) {
    %c0_i32 = arith.constant 0 : i32
    %c0_i32_0 = arith.constant 0 : i32
    %c0_i32_1 = arith.constant 0 : i32
    return %c0_i32, %c0_i32_0 : i32, i32
  }
  func.func @transform_4(%arg0: i32) -> (i32, i32) {
    %c0_i32 = arith.constant 0 : i32
    %c0_i32_0 = arith.constant 0 : i32
    %c0_i32_1 = arith.constant 0 : i32
    return %c0_i32, %c0_i32_0 : i32, i32
  }
  func.func @transform_5(%arg0: i32) -> (i32, i32) {
    %c0_i32 = arith.constant 0 : i32
    %c0_i32_0 = arith.constant 0 : i32
    %c0_i32_1 = arith.constant 0 : i32
    return %c0_i32, %c0_i32_0 : i32, i32
  }
  func.func @transform_6(%arg0: i32) -> (i32, i32) {
    %c0_i32 = arith.constant 0 : i32
    %c0_i32_0 = arith.constant 0 : i32
    %c0_i32_1 = arith.constant 0 : i32
    return %c0_i32, %c0_i32_0 : i32, i32
  }
  func.func @transform_7(%arg0: i32) -> (i32, i32, i32) {
    %c0_i32 = arith.constant 0 : i32
    %c0_i32_0 = arith.constant 0 : i32
    %c0_i32_1 = arith.constant 0 : i32
    %c0_i32_2 = arith.constant 0 : i32
    return %c0_i32, %c0_i32_0, %c0_i32_1 : i32, i32, i32
  }
  func.func @transform_8(%arg0: i32) -> (i32, i32) {
    %c0_i32 = arith.constant 0 : i32
    %c0_i32_0 = arith.constant 0 : i32
    %c0_i32_1 = arith.constant 0 : i32
    return %c0_i32, %c0_i32_0 : i32, i32
  }
  func.func @transform_9(%arg0: i32) -> (i32, i32) {
    %c0_i32 = arith.constant 0 : i32
    %c0_i32_0 = arith.constant 0 : i32
    %c0_i32_1 = arith.constant 0 : i32
    return %c0_i32, %c0_i32_0 : i32, i32
  }
  func.func @transform_10(%arg0: i32) -> (i32, i32) {
    %c0_i32 = arith.constant 0 : i32
    %c0_i32_0 = arith.constant 0 : i32
    %c0_i32_1 = arith.constant 0 : i32
    return %c0_i32, %c0_i32_0 : i32, i32
  }
  func.func @transform_11(%arg0: i32) -> (i32, i32) {
    %c0_i32 = arith.constant 0 : i32
    %c0_i32_0 = arith.constant 0 : i32
    %c0_i32_1 = arith.constant 0 : i32
    return %c0_i32, %c0_i32_0 : i32, i32
  }
  func.func @transform_12(%arg0: i32) -> (i32, i32) {
    %c0_i32 = arith.constant 0 : i32
    %c0_i32_0 = arith.constant 0 : i32
    %c0_i32_1 = arith.constant 0 : i32
    return %c0_i32, %c0_i32_0 : i32, i32
  }
  func.func @transform_13(%arg0: i32) -> (i32, i32) {
    %c0_i32 = arith.constant 0 : i32
    %c0_i32_0 = arith.constant 0 : i32
    return %arg0, %c0_i32 : i32, i32
  }
}

</mosaic_0001>

<bundles_post_ra>
// kernel: sequence_embed_pallas.1
= control target key start
LH: loop header
LB: loop body
LE: loop exit
PB: predicated region body
PF: predicated region fallthrough
CT: control target
= control target key end

     0   :  { %vm684_vm0 = vcmask 1040384   ;;  %vm685_vm1 = vcmask 1041408   ;;  %v6406_v0 = vmov 0.0   ;;  %v6407_v2 = vmov 65535   ;;  %s6409_s20 = smov 10   ;;  %s6410_s21 = smov 20   ;;  %s8301_s1 = inlined_call_operand.vmem [shape: bf16[3,10], index: 1, kind: input, shape index: {}]   ;;  %s8302_s0 = inlined_call_operand.vmem [shape: bf16[126,8,3], index: 0, kind: input, shape index: {}]   ;;  %s8303_s2 = inlined_call_operand.vmem [shape: f32[1,10], index: 2, kind: input, shape index: {}]   ;;  %s8304_s3 = inlined_call_operand.vmem [shape: bf16[30,20], index: 3, kind: input, shape index: {}]   ;;  %s8305_s4 = inlined_call_operand.vmem [shape: f32[1,20], index: 4, kind: input, shape index: {}]   ;;  %s8306_s5 = inlined_call_operand.vmem [shape: bf16[60,40], index: 5, kind: input, shape index: {}]   ;;  %s8307_s7 = inlined_call_operand.vmem [shape: bf16[14,40,120], index: 7, kind: input, shape index: {}]   ;;  %s8308_s11 = inlined_call_operand.vmem [shape: bf16[84,128], index: 11, kind: input, shape index: {}]   ;;  %s8309_s6 = inlined_call_operand.vmem [shape: f32[1,40], index: 6, kind: input, shape index: {}]   ;;  %s8310_s8 = inlined_call_operand.vmem [shape: f32[1,120], index: 8, kind: input, shape index: {}]   ;;  %s8311_s9 = inlined_call_operand.vmem [shape: bf16[120,84], index: 9, kind: input, shape index: {}]   ;;  %s8312_s10 = inlined_call_operand.vmem [shape: f32[1,84], index: 10, kind: input, shape index: {}]   ;;  %s8313_s12 = inlined_call_operand.vmem [shape: f32[1,128], index: 12, kind: input, shape index: {}]   ;;  %s8314_s13 = inlined_call_operand.vmem [shape: f32[8,128], index: 13, kind: output, shape index: {}]  }
   0x1   :  { %5304 = vmatprep.subr.bf16.mxu0 %v6406_v0  ;;  %v171_v1 = vld [vmem:[%s8301_s1] sm:$0x3]  ;;  %v686_v3 = vsel %vm684_vm0, 4294967295, %v6407_v2  ;;  %5558 = vmatprep.subr.bf16.mxu1 %v6406_v0  ;;  %vm6408_vm2 = vmmov 0   ;;  %vm494_vm3 = vcmask 23552   ;;  %v6275_v7 = vld [vmem:[%s8302_s0 + $0x8] sm:$0xff]  }
   0x2   :  { %v687_v4 = vsel %vm685_vm1, %v686_v3, 0  ;;  %5306 = vmatprep.mubr.msk.bf16.mxu0 %vm6408_vm2, %v6406_v0  ;;  %5562 = vmatprep.mubr.msk.bf16.mxu1 %vm6408_vm2, %v6406_v0  ;;  %v6274_v6 = vld [vmem:[%s8302_s0] sm:$0xff]   ;;  %v6276_v8 = vld [vmem:[%s8302_s0 + $0x10] sm:$0xff]   ;;  %v6277_v9 = vld [vmem:[%s8302_s0 + $0x18] sm:$0xff]   ;;  %vm1602_vm4 = vcmask 80896   ;;  %vm2670_vm5 = vcmask 1046528  }
   0x3   :  { %v689_v5 = vand.u32 %v687_v4, %v171_v1  ;;  %v6278_v10 = vld [vmem:[%s8302_s0 + $0x20] sm:$0xff]   ;;  %v6279_v11 = vld [vmem:[%s8302_s0 + $0x28] sm:$0xff]   ;;  %v6280_v12 = vld [vmem:[%s8302_s0 + $0x30] sm:$0xff]   ;;  %vm2461_vm6 = vcmask 162816   ;;  %vm2576_vm7 = vcmask 244736   ;;  %vm3510_vm8 = vcmask 1045504  }
   0x4   :  { %v6281_v13 = vld [vmem:[%s8302_s0 + $0x38] sm:$0xff]   ;;  %v6282_v14 = vld [vmem:[%s8302_s0 + $0x40] sm:$0xff]   ;;  %v6283_v15 = vld [vmem:[%s8302_s0 + $0x48] sm:$0xff]   ;;  %vm3428_vm9 = vcmask 326656   ;;  %vm3488_vm10 = vcmask 490496   ;;  %vm3642_vm11 = vcmask 1043456  }
   0x5   :  { %5305 = vmatpush3.bf16.msra.mxu0 %v689_v5  ;;  %v6284_v16 = vld [vmem:[%s8302_s0 + $0x50] sm:$0xff]   ;;  %v6285_v17 = vld [vmem:[%s8302_s0 + $0x58] sm:$0xff]   ;;  %v6286_v18 = vld [vmem:[%s8302_s0 + $0x60] sm:$0xff]   ;;  %vm4659_vm12 = vcmask 982016   ;;  %vm4759_vm13 = vcmask 687104  }
   0x6   :  { %5882 = vmatprep.subr.bf16.mxu0 %v6406_v0  ;;  %v6287_v19 = vld [vmem:[%s8302_s0 + $0x68] sm:$0xff]   ;;  %v6288_v20 = vld [vmem:[%s8302_s0 + $0x70] sm:$0xff]   ;;  %v6289_v21 = vld [vmem:[%s8302_s0 + $0x78] sm:$0xff]  }
   0x7   :  { %v6290_v22 = vld [vmem:[%s8302_s0 + $0x80] sm:$0xff]   ;;  %v6291_v23 = vld [vmem:[%s8302_s0 + $0x88] sm:$0xff]   ;;  %v6292_v24 = vld [vmem:[%s8302_s0 + $0x90] sm:$0xff]  }
   0x8   :  { %5307 = vmatmul.mubr.msk.bf16.vlgmr.msra.gmra.mxu0 %vm494_vm3, %v6274_v6  ;;  %v6293_v25 = vld [vmem:[%s8302_s0 + $0x98] sm:$0xff]   ;;  %v6294_v26 = vld [vmem:[%s8302_s0 + $0xa0] sm:$0xff]   ;;  %v6295_v27 = vld [vmem:[%s8302_s0 + $0xa8] sm:$0xff]  }
   0x9   :  { %5310 = vmatprep.mubr.msk.bf16.mxu0 %vm6408_vm2, %v6406_v0  ;;  %v6296_v28 = vld [vmem:[%s8302_s0 + $0xb0] sm:$0xff]   ;;  %v6297_v29 = vld [vmem:[%s8302_s0 + $0xb8] sm:$0xff]   ;;  %v6298_v30 = vld [vmem:[%s8302_s0 + $0xc0] sm:$0xff]  }
   0xa   :  { %v6646_v32 = vld [vmem:[%s8303_s2] ss:$0 sm:$0xff]  ;;  %v6299_v35 = vld [vmem:[%s8302_s0 + $0xc8] sm:$0xff]   ;;  %v6300_v47 = vld [vmem:[%s8302_s0 + $0xd0] sm:$0xff]  }
   0xb   :  { %v6301_v60 = vld [vmem:[%s8302_s0 + $0xd8] sm:$0xff]   ;;  %v6318_v4 = vld [vmem:[%s8304_s3 + $0x8] sm:$0x7f]  }
  0x10   :  { %5311 = vmatmul.mubr.msk.bf16.gmra.mxu0 %vm494_vm3, %v6275_v7 }
  0x11   :  { %5314 = vmatprep.mubr.msk.bf16.mxu0 %vm6408_vm2, %v6406_v0 }
  0x18   :  { %5315 = vmatmul.mubr.msk.bf16.gmra.mxu0 %vm494_vm3, %v6276_v8  ;;  %v2672_v8 = vsel %vm2670_vm5, %v6318_v4, 0 }
  0x19   :  { %5318 = vmatprep.mubr.msk.bf16.mxu0 %vm6408_vm2, %v6406_v0  ;;  %5559 = vmatpush3.bf16.msra.mxu1 %v2672_v8 }
  0x1a   :  { %5560 = vmatprep.subr.bf16.mxu1 %v6406_v0 }
  0x20   :  { %5319 = vmatmul.mubr.msk.bf16.gmra.mxu0 %vm494_vm3, %v6277_v9 }
  0x21   :  { %5322 = vmatprep.mubr.msk.bf16.mxu0 %vm6408_vm2, %v6406_v0 }
  0x28   :  { %5323 = vmatmul.mubr.msk.bf16.gmra.mxu0 %vm494_vm3, %v6278_v10 }
  0x29   :  { %5326 = vmatprep.mubr.msk.bf16.mxu0 %vm6408_vm2, %v6406_v0 }
  0x30   :  { %5327 = vmatmul.mubr.msk.bf16.gmra.mxu0 %vm494_vm3, %v6279_v11 }
  0x31   :  { %5330 = vmatprep.mubr.msk.bf16.mxu0 %vm6408_vm2, %v6406_v0 }
  0x38   :  { %5331 = vmatmul.mubr.msk.bf16.gmra.mxu0 %vm494_vm3, %v6280_v12  ;;  %v6302_v12 = vld [vmem:[%s8302_s0 + $0xe0] sm:$0xff]  }
  0x39   :  { %5334 = vmatprep.mubr.msk.bf16.mxu0 %vm6408_vm2, %v6406_v0 }
  0x40   :  { %5335 = vmatmul.mubr.msk.bf16.gmra.mxu0 %vm494_vm3, %v6281_v13  ;;  %v6319_v13 = vld [vmem:[%s8304_s3] sm:$0xff]  }
  0x41   :  { %5338 = vmatprep.mubr.msk.bf16.mxu0 %vm6408_vm2, %v6406_v0  ;;  %5561 = vmatpush3.bf16.msra.mxu1 %v6319_v13 }
  0x42   :  { %5686 = vmatprep.subr.bf16.mxu1 %v6406_v0 }
  0x48   :  { %5339 = vmatmul.mubr.msk.bf16.gmra.mxu0 %vm494_vm3, %v6282_v14 }
  0x49   :  { %5342 = vmatprep.mubr.msk.bf16.mxu0 %vm6408_vm2, %v6406_v0 }
  0x50   :  { %5343 = vmatmul.mubr.msk.bf16.gmra.mxu0 %vm494_vm3, %v6283_v15 }
  0x51   :  { %5346 = vmatprep.mubr.msk.bf16.mxu0 %vm6408_vm2, %v6406_v0 }
  0x58   :  { %5347 = vmatmul.mubr.msk.bf16.gmra.mxu0 %vm494_vm3, %v6284_v16 }
  0x59   :  { %5350 = vmatprep.mubr.msk.bf16.mxu0 %vm6408_vm2, %v6406_v0 }
  0x60   :  { %5351 = vmatmul.mubr.msk.bf16.gmra.mxu0 %vm494_vm3, %v6285_v17 }
  0x61   :  { %5354 = vmatprep.mubr.msk.bf16.mxu0 %vm6408_vm2, %v6406_v0 }
  0x68   :  { %5355 = vmatmul.mubr.msk.bf16.gmra.mxu0 %vm494_vm3, %v6286_v18 }
  0x69   :  { %5358 = vmatprep.mubr.msk.bf16.mxu0 %vm6408_vm2, %v6406_v0 }
  0x70   :  { %5359 = vmatmul.mubr.msk.bf16.gmra.mxu0 %vm494_vm3, %v6287_v19 }
  0x71   :  { %5362 = vmatprep.mubr.msk.bf16.mxu0 %vm6408_vm2, %v6406_v0 }
  0x78   :  { %5363 = vmatmul.mubr.msk.bf16.gmra.mxu0 %vm494_vm3, %v6288_v20 }
  0x79   :  { %5366 = vmatprep.mubr.msk.bf16.mxu0 %vm6408_vm2, %v6406_v0 }
  0x80   :  { %5367 = vmatmul.mubr.msk.bf16.gmra.mxu0 %vm494_vm3, %v6289_v21 }
  0x81   :  { %5370 = vmatprep.mubr.msk.bf16.mxu0 %vm6408_vm2, %v6406_v0 }
  0x88   :  { %5371 = vmatmul.mubr.msk.bf16.gmra.mxu0 %vm494_vm3, %v6290_v22 }
  0x89   :  { %5374 = vmatprep.mubr.msk.bf16.mxu0 %vm6408_vm2, %v6406_v0 }
  0x90   :  { %5375 = vmatmul.mubr.msk.bf16.gmra.mxu0 %vm494_vm3, %v6291_v23 }
  0x91   :  { %5378 = vmatprep.mubr.msk.bf16.mxu0 %vm6408_vm2, %v6406_v0 }
  0x98   :  { %5379 = vmatmul.mubr.msk.bf16.gmra.mxu0 %vm494_vm3, %v6292_v24 }
  0x99   :  { %5382 = vmatprep.mubr.msk.bf16.mxu0 %vm6408_vm2, %v6406_v0 }
  0xa0   :  { %5383 = vmatmul.mubr.msk.bf16.gmra.mxu0 %vm494_vm3, %v6293_v25 }
  0xa1   :  { %5386 = vmatprep.mubr.msk.bf16.mxu0 %vm6408_vm2, %v6406_v0 }
  0xa8   :  { %5387 = vmatmul.mubr.msk.bf16.gmra.mxu0 %vm494_vm3, %v6294_v26 }
  0xa9   :  { %5390 = vmatprep.mubr.msk.bf16.mxu0 %vm6408_vm2, %v6406_v0 }
  0xb0   :  { %5391 = vmatmul.mubr.msk.bf16.gmra.mxu0 %vm494_vm3, %v6295_v27 }
  0xb1   :  { %5394 = vmatprep.mubr.msk.bf16.mxu0 %vm6408_vm2, %v6406_v0 }
  0xb8   :  { %5395 = vmatmul.mubr.msk.bf16.gmra.mxu0 %vm494_vm3, %v6296_v28 }
  0xb9   :  { %5398 = vmatprep.mubr.msk.bf16.mxu0 %vm6408_vm2, %v6406_v0 }
  0xc0   :  { %5399 = vmatmul.mubr.msk.bf16.gmra.mxu0 %vm494_vm3, %v6297_v29  ;;  %v6303_v29 = vld [vmem:[%s8302_s0 + $0xe8] sm:$0xff]  }
  0xc1   :  { %5402 = vmatprep.mubr.msk.bf16.mxu0 %vm6408_vm2, %v6406_v0 }
  0xc8   :  { %v725_v31 = vpop.f32.mrf.mxu0  ;;  %5403 = vmatmul.mubr.msk.bf16.gmra.mxu0 %vm494_vm3, %v6298_v30 }
  0xc9   :  { %5406 = vmatprep.mubr.msk.bf16.mxu0 %vm6408_vm2, %v6406_v0  ;;  %v726_v36 = vadd.f32 %v6646_v32, %v725_v31 }
  0xca   :  { %v5308_v33 = vpop.f32.mrf.mxu0 }
  0xcb   :  { %v1228_v41 = vmax.f32 %v726_v36, 0.0 }
  0xcc   :  { %v728_v34 = vpop.f32.mrf.mxu0 }
  0xcd   :  { %v729_v37 = vadd.f32 %v6646_v32, %v728_v34 }
  0xce   :  { %v5309_v38 = vpop.f32.mrf.mxu0 }
  0xcf   :  { %v1229_v39 = vmax.f32 %v729_v37, 0.0 }
  0xd0   :  { %v733_v40 = vpop.f32.mrf.mxu0  ;;  %5407 = vmatmul.mubr.msk.bf16.gmra.mxu0 %vm494_vm3, %v6299_v35 }
  0xd1   :  { %v734_v42 = vadd.f32 %v6646_v32, %v733_v40  ;;  %5410 = vmatprep.mubr.msk.bf16.mxu0 %vm6408_vm2, %v6406_v0  ;;  %v1354_v44 = vmax.f32 %v1228_v41, %v1229_v39 }
  0xd2   :  { %v5312_v43 = vpop.f32.mrf.mxu0 }
  0xd3   :  { %v1230_v45 = vmax.f32 %v734_v42, 0.0 }
  0xd4   :  { %v736_v46 = vpop.f32.mrf.mxu0 }
  0xd5   :  { %v1478_v48 = vmax.f32 %v1354_v44, %v1230_v45  ;;  %v737_v49 = vadd.f32 %v6646_v32, %v736_v46  ;;  %v1355_v51 = vmax.f32 %v1229_v39, %v1230_v45  ;;  %v6304_v46 = vld [vmem:[%s8302_s0 + $0xf0] sm:$0xff]  }
  0xd6   :  { %v5313_v50 = vpop.f32.mrf.mxu0 }
  0xd7   :  { %1603 = vst.msk [vmem:[#allocation2] sm:$0xff] %vm1602_vm4, %v1478_v48  ;;  %v1231_v52 = vmax.f32 %v737_v49, 0.0 }
  0xd8   :  { %v741_v53 = vpop.f32.mrf.mxu0  ;;  %5411 = vmatmul.mubr.msk.bf16.gmra.mxu0 %vm494_vm3, %v6300_v47 }
  0xd9   :  { %v1479_v54 = vmax.f32 %v1355_v51, %v1231_v52  ;;  %v742_v55 = vadd.f32 %v6646_v32, %v741_v53  ;;  %5414 = vmatprep.mubr.msk.bf16.mxu0 %vm6408_vm2, %v6406_v0  ;;  %v1356_v57 = vmax.f32 %v1230_v45, %v1231_v52 }
  0xda   :  { %v5316_v56 = vpop.f32.mrf.mxu0 }
  0xdb   :  { %1604 = vst.msk [vmem:[#allocation2 + $0x8] sm:$0xff] %vm1602_vm4, %v1479_v54  ;;  %v1232_v58 = vmax.f32 %v742_v55, 0.0 }
  0xdc   :  { %v744_v59 = vpop.f32.mrf.mxu0 }
  0xdd   :  { %v1480_v61 = vmax.f32 %v1356_v57, %v1232_v58  ;;  %v745_v62 = vadd.f32 %v6646_v32, %v744_v59  ;;  %v1357_v1 = vmax.f32 %v1231_v52, %v1232_v58 }
  0xde   :  { %v5317_v63 = vpop.f32.mrf.mxu0 }
  0xdf   :  { %1605 = vst.msk [vmem:[#allocation2 + $0x10] sm:$0xff] %vm1602_vm4, %v1480_v61  ;;  %v1233_v2 = vmax.f32 %v745_v62, 0.0  ;;  %v6305_v62 = vld [vmem:[%s8302_s0 + $0xf8] sm:$0xff]  }
  0xe0   :  { %v749_v3 = vpop.f32.mrf.mxu0  ;;  %5415 = vmatmul.mubr.msk.bf16.gmra.mxu0 %vm494_vm3, %v6301_v60 }
  0xe1   :  { %v1481_v5 = vmax.f32 %v1357_v1, %v1233_v2  ;;  %v750_v6 = vadd.f32 %v6646_v32, %v749_v3  ;;  %5418 = vmatprep.mubr.msk.bf16.mxu0 %vm6408_vm2, %v6406_v0  ;;  %v1358_v9 = vmax.f32 %v1232_v58, %v1233_v2 }
  0xe2   :  { %v5320_v7 = vpop.f32.mrf.mxu0  ;;  %v1789_v23 = vld [vmem:[#allocation2 + $0x8] sm:$0xff] }
  0xe3   :  { %1606 = vst.msk [vmem:[#allocation2 + $0x18] sm:$0xff] %vm1602_vm4, %v1481_v5  ;;  %v1234_v10 = vmax.f32 %v750_v6, 0.0 }
  0xe4   :  { %v752_v11 = vpop.f32.mrf.mxu0 }
  0xe5   :  { %v1482_v14 = vmax.f32 %v1358_v9, %v1234_v10  ;;  %v753_v15 = vadd.f32 %v6646_v32, %v752_v11  ;;  %v1359_v17 = vmax.f32 %v1233_v2, %v1234_v10 }
  0xe6   :  { %v5321_v16 = vpop.f32.mrf.mxu0  ;;  %v6700_v34 = vld [vmem:[#allocation2 + $0x10] sm:$0xff] }
  0xe7   :  { %1607 = vst.msk [vmem:[#allocation2 + $0x20] sm:$0xff] %vm1602_vm4, %v1482_v14  ;;  %v1235_v18 = vmax.f32 %v753_v15, 0.0  ;;  %v6306_v15 = vld [vmem:[%s8302_s0 + $0x100] sm:$0xff]  }
  0xe8   :  { %v757_v19 = vpop.f32.mrf.mxu0  ;;  %5419 = vmatmul.mubr.msk.bf16.gmra.mxu0 %vm494_vm3, %v6302_v12 }
  0xe9   :  { %v1483_v20 = vmax.f32 %v1359_v17, %v1235_v18  ;;  %v758_v21 = vadd.f32 %v6646_v32, %v757_v19  ;;  %5422 = vmatprep.mubr.msk.bf16.mxu0 %vm6408_vm2, %v6406_v0  ;;  %v1360_v25 = vmax.f32 %v1234_v10, %v1235_v18 }
  0xea   :  { %v5324_v22 = vpop.f32.mrf.mxu0  ;;  %v1790_v24 = vld [vmem:[#allocation2 + $0x18] sm:$0xff] }
  0xeb   :  { %1608 = vst.msk [vmem:[#allocation2 + $0x28] sm:$0xff] %vm1602_vm4, %v1483_v20  ;;  %v1236_v26 = vmax.f32 %v758_v21, 0.0  ;;  %v5904_v27 = vpack.i.bf16 %v1790_v24, %v1789_v23 }
  0xec   :  { %v760_v28 = vpop.f32.mrf.mxu0 }
  0xed   :  { %v1484_v30 = vmax.f32 %v1360_v25, %v1236_v26  ;;  %v761_v31 = vadd.f32 %v6646_v32, %v760_v28  ;;  %5905 = vrot.lane.b32.xlu0 %v5904_v27, %s6409_s20  ;;  %v1361_v36 = vmax.f32 %v1235_v18, %v1236_v26 }
  0xee   :  { %v5325_v33 = vpop.f32.mrf.mxu0  ;;  %v6702_v35 = vld [vmem:[#allocation2 + $0x20] sm:$0xff] }
  0xef   :  { %1609 = vst.msk [vmem:[#allocation2 + $0x30] sm:$0xff] %vm1602_vm4, %v1484_v30  ;;  %v1237_v37 = vmax.f32 %v761_v31, 0.0  ;;  %v5909_v38 = vpack.i.bf16 %v6702_v35, %v6700_v34  ;;  %v6307_v31 = vld [vmem:[%s8302_s0 + $0x108] sm:$0xff]  }
  0xf0   :  { %v765_v39 = vpop.f32.mrf.mxu0  ;;  %5423 = vmatmul.mubr.msk.bf16.gmra.mxu0 %vm494_vm3, %v6303_v29 }
  0xf1   :  { %v1485_v40 = vmax.f32 %v1361_v36, %v1237_v37  ;;  %v766_v41 = vadd.f32 %v6646_v32, %v765_v39  ;;  %5910 = vrot.lane.b32.xlu0 %v5909_v38, %s6410_s21  ;;  %5426 = vmatprep.mubr.msk.bf16.mxu0 %vm6408_vm2, %v6406_v0  ;;  %v1362_v43 = vmax.f32 %v1236_v26, %v1237_v37 }
  0xf2   :  { %v5328_v42 = vpop.f32.mrf.mxu0  ;;  %v1791_v56 = vld [vmem:[#allocation2 + $0x28] sm:$0xff] }
  0xf3   :  { %1610 = vst.msk [vmem:[#allocation2 + $0x38] sm:$0xff] %vm1602_vm4, %v1485_v40  ;;  %v1238_v44 = vmax.f32 %v766_v41, 0.0 }
  0xf4   :  { %v768_v45 = vpop.f32.mrf.mxu0 }
  0xf5   :  { %v1486_v47 = vmax.f32 %v1362_v43, %v1238_v44  ;;  %v769_v48 = vadd.f32 %v6646_v32, %v768_v45  ;;  %v1363_v50 = vmax.f32 %v1237_v37, %v1238_v44 }
  0xf6   :  { %v5329_v49 = vpop.f32.mrf.mxu0  ;;  %v6728_v3 = vld [vmem:[#allocation2 + $0x30] sm:$0xff] }
  0xf7   :  { %1611 = vst.msk [vmem:[#allocation2 + $0x40] sm:$0xff] %vm1602_vm4, %v1486_v47  ;;  %v1239_v51 = vmax.f32 %v769_v48, 0.0 }
  0xf8   :  { %v773_v52 = vpop.f32.mrf.mxu0  ;;  %5427 = vmatmul.mubr.msk.bf16.gmra.mxu0 %vm494_vm3, %v6304_v46 }
  0xf9   :  { %v1487_v53 = vmax.f32 %v1363_v50, %v1239_v51  ;;  %v774_v54 = vadd.f32 %v6646_v32, %v773_v52  ;;  %5430 = vmatprep.mubr.msk.bf16.mxu0 %vm6408_vm2, %v6406_v0  ;;  %v1364_v58 = vmax.f32 %v1238_v44, %v1239_v51  ;;  %v6308_v50 = vld [vmem:[%s8302_s0 + $0x110] sm:$0xff]  }
  0xfa   :  { %v5332_v55 = vpop.f32.mrf.mxu0  ;;  %v1792_v57 = vld [vmem:[#allocation2 + $0x38] sm:$0xff] }
  0xfb   :  { %1612 = vst.msk [vmem:[#allocation2 + $0x48] sm:$0xff] %vm1602_vm4, %v1487_v53  ;;  %v1240_v59 = vmax.f32 %v774_v54, 0.0  ;;  %v5914_v60 = vpack.i.bf16 %v1792_v57, %v1791_v56 }
  0xfc   :  { %v776_v61 = vpop.f32.mrf.mxu0 }
  0xfd   :  { %v1488_v63 = vmax.f32 %v1364_v58, %v1240_v59  ;;  %v777_v1 = vadd.f32 %v6646_v32, %v776_v61  ;;  %5915 = vrot.lane.b32.xlu1 %v5914_v60, %s6409_s20  ;;  %v1365_v5 = vmax.f32 %v1239_v51, %v1240_v59 }
  0xfe   :  { %v5333_v2 = vpop.f32.mrf.mxu0  ;;  %v6730_v4 = vld [vmem:[#allocation2 + $0x40] sm:$0xff] }
  0xff   :  { %1613 = vst.msk [vmem:[#allocation2 + $0x50] sm:$0xff] %vm1602_vm4, %v1488_v63  ;;  %v1241_v6 = vmax.f32 %v777_v1, 0.0  ;;  %v5919_v7 = vpack.i.bf16 %v6730_v4, %v6728_v3 }
 0x100   :  { %v781_v8 = vpop.f32.mrf.mxu0  ;;  %5431 = vmatmul.mubr.msk.bf16.gmra.mxu0 %vm494_vm3, %v6305_v62 }
 0x101   :  { %v1489_v9 = vmax.f32 %v1365_v5, %v1241_v6  ;;  %v782_v10 = vadd.f32 %v6646_v32, %v781_v8  ;;  %5920 = vrot.lane.b32.xlu1 %v5919_v7, %s6410_s21  ;;  %5434 = vmatprep.mubr.msk.bf16.mxu0 %vm6408_vm2, %v6406_v0  ;;  %v1366_v12 = vmax.f32 %v1240_v59, %v1241_v6  ;;  %v6309_v5 = vld [vmem:[%s8302_s0 + $0x118] sm:$0xff]  }
 0x102   :  { %v5336_v11 = vpop.f32.mrf.mxu0  ;;  %v1793_v25 = vld [vmem:[#allocation2 + $0x48] sm:$0xff] }
 0x103   :  { %1614 = vst.msk [vmem:[#allocation2 + $0x58] sm:$0xff] %vm1602_vm4, %v1489_v9  ;;  %v1242_v13 = vmax.f32 %v782_v10, 0.0 }
 0x104   :  { %v784_v14 = vpop.f32.mrf.mxu0 }
 0x105   :  { %v1490_v16 = vmax.f32 %v1366_v12, %v1242_v13  ;;  %v785_v17 = vadd.f32 %v6646_v32, %v784_v14  ;;  %v1367_v19 = vmax.f32 %v1241_v6, %v1242_v13 }
 0x106   :  { %v5337_v18 = vpop.f32.mrf.mxu0  ;;  %v6756_v38 = vld [vmem:[#allocation2 + $0x50] sm:$0xff] }
 0x107   :  { %1615 = vst.msk [vmem:[#allocation2 + $0x60] sm:$0xff] %vm1602_vm4, %v1490_v16  ;;  %v1243_v20 = vmax.f32 %v785_v17, 0.0 }
 0x108   :  { %v789_v21 = vpop.f32.mrf.mxu0  ;;  %5435 = vmatmul.mubr.msk.bf16.gmra.mxu0 %vm494_vm3, %v6306_v15 }
 0x109   :  { %v1491_v22 = vmax.f32 %v1367_v19, %v1243_v20  ;;  %v790_v23 = vadd.f32 %v6646_v32, %v789_v21  ;;  %5438 = vmatprep.mubr.msk.bf16.mxu0 %vm6408_vm2, %v6406_v0  ;;  %v1368_v27 = vmax.f32 %v1242_v13, %v1243_v20  ;;  %v6310_v21 = vld [vmem:[%s8302_s0 + $0x120] sm:$0xff]  }
 0x10a   :  { %v5340_v24 = vpop.f32.mrf.mxu0  ;;  %v1794_v26 = vld [vmem:[#allocation2 + $0x58] sm:$0xff] }
 0x10b   :  { %1616 = vst.msk [vmem:[#allocation2 + $0x68] sm:$0xff] %vm1602_vm4, %v1491_v22  ;;  %v1244_v28 = vmax.f32 %v790_v23, 0.0  ;;  %v5924_v29 = vpack.i.bf16 %v1794_v26, %v1793_v25 }
 0x10c   :  { %v792_v30 = vpop.f32.mrf.mxu0 }
 0x10d   :  { %v1492_v33 = vmax.f32 %v1368_v27, %v1244_v28  ;;  %v793_v36 = vadd.f32 %v6646_v32, %v792_v30  ;;  %5925 = vrot.lane.b32.xlu0 %v5924_v29, %s6409_s20  ;;  %v1369_v40 = vmax.f32 %v1243_v20, %v1244_v28 }
 0x10e   :  { %v5341_v37 = vpop.f32.mrf.mxu0  ;;  %v6758_v39 = vld [vmem:[#allocation2 + $0x60] sm:$0xff] }
 0x10f   :  { %1617 = vst.msk [vmem:[#allocation2 + $0x70] sm:$0xff] %vm1602_vm4, %v1492_v33  ;;  %v1245_v41 = vmax.f32 %v793_v36, 0.0  ;;  %v5929_v42 = vpack.i.bf16 %v6758_v39, %v6756_v38 }
 0x110   :  { %v797_v43 = vpop.f32.mrf.mxu0  ;;  %5439 = vmatmul.mubr.msk.bf16.gmra.mxu0 %vm494_vm3, %v6307_v31 }
 0x111   :  { %v1493_v44 = vmax.f32 %v1369_v40, %v1245_v41  ;;  %v798_v45 = vadd.f32 %v6646_v32, %v797_v43  ;;  %5930 = vrot.lane.b32.xlu1 %v5929_v42, %s6410_s21  ;;  %5442 = vmatprep.mubr.msk.bf16.mxu0 %vm6408_vm2, %v6406_v0  ;;  %v1370_v47 = vmax.f32 %v1244_v28, %v1245_v41  ;;  %v6311_v42 = vld [vmem:[%s8302_s0 + $0x128] sm:$0xff]  }
 0x112   :  { %v5344_v46 = vpop.f32.mrf.mxu0  ;;  %v1795_v60 = vld [vmem:[#allocation2 + $0x68] sm:$0xff] }
 0x113   :  { %1618 = vst.msk [vmem:[#allocation2 + $0x78] sm:$0xff] %vm1602_vm4, %v1493_v44  ;;  %v1246_v48 = vmax.f32 %v798_v45, 0.0 }
 0x114   :  { %v800_v49 = vpop.f32.mrf.mxu0 }
 0x115   :  { %v1494_v51 = vmax.f32 %v1370_v47, %v1246_v48  ;;  %v801_v52 = vadd.f32 %v6646_v32, %v800_v49  ;;  %v1371_v54 = vmax.f32 %v1245_v41, %v1246_v48 }
 0x116   :  { %v5345_v53 = vpop.f32.mrf.mxu0  ;;  %v6784_v9 = vld [vmem:[#allocation2 + $0x70] sm:$0xff] }
 0x117   :  { %1619 = vst.msk [vmem:[#allocation2 + $0x80] sm:$0xff] %vm1602_vm4, %v1494_v51  ;;  %v1247_v55 = vmax.f32 %v801_v52, 0.0 }
 0x118   :  { %v805_v56 = vpop.f32.mrf.mxu0  ;;  %5443 = vmatmul.mubr.msk.bf16.gmra.mxu0 %vm494_vm3, %v6308_v50 }
 0x119   :  { %v1495_v57 = vmax.f32 %v1371_v54, %v1247_v55  ;;  %v806_v58 = vadd.f32 %v6646_v32, %v805_v56  ;;  %5446 = vmatprep.mubr.msk.bf16.mxu0 %vm6408_vm2, %v6406_v0  ;;  %v1372_v62 = vmax.f32 %v1246_v48, %v1247_v55 }
 0x11a   :  { %v5348_v59 = vpop.f32.mrf.mxu0  ;;  %v1796_v61 = vld [vmem:[#allocation2 + $0x78] sm:$0xff] }
 0x11b   :  { %1620 = vst.msk [vmem:[#allocation2 + $0x88] sm:$0xff] %vm1602_vm4, %v1495_v57  ;;  %v1248_v63 = vmax.f32 %v806_v58, 0.0  ;;  %v5934_v1 = vpack.i.bf16 %v1796_v61, %v1795_v60  ;;  %v6312_v58 = vld [vmem:[%s8302_s0 + $0x130] sm:$0xff]  }
 0x11c   :  { %v808_v2 = vpop.f32.mrf.mxu0 }
 0x11d   :  { %v1496_v6 = vmax.f32 %v1372_v62, %v1248_v63  ;;  %v809_v7 = vadd.f32 %v6646_v32, %v808_v2  ;;  %5935 = vrot.lane.b32.xlu0 %v5934_v1, %s6409_s20  ;;  %v1373_v11 = vmax.f32 %v1247_v55, %v1248_v63 }
 0x11e   :  { %v5349_v8 = vpop.f32.mrf.mxu0  ;;  %v6786_v10 = vld [vmem:[#allocation2 + $0x80] sm:$0xff] }
 0x11f   :  { %1621 = vst.msk [vmem:[#allocation2 + $0x90] sm:$0xff] %vm1602_vm4, %v1496_v6  ;;  %v1249_v12 = vmax.f32 %v809_v7, 0.0  ;;  %v5939_v13 = vpack.i.bf16 %v6786_v10, %v6784_v9 }
 0x120   :  { %v813_v14 = vpop.f32.mrf.mxu0  ;;  %5447 = vmatmul.mubr.msk.bf16.gmra.mxu0 %vm494_vm3, %v6309_v5 }
 0x121   :  { %v1497_v15 = vmax.f32 %v1373_v11, %v1249_v12  ;;  %v814_v16 = vadd.f32 %v6646_v32, %v813_v14  ;;  %5940 = vrot.lane.b32.xlu1 %v5939_v13, %s6410_s21  ;;  %5450 = vmatprep.mubr.msk.bf16.mxu0 %vm6408_vm2, %v6406_v0  ;;  %v1374_v18 = vmax.f32 %v1248_v63, %v1249_v12 }
 0x122   :  { %v5352_v17 = vpop.f32.mrf.mxu0  ;;  %v1797_v31 = vld [vmem:[#allocation2 + $0x88] sm:$0xff] }
 0x123   :  { %1622 = vst.msk [vmem:[#allocation2 + $0x98] sm:$0xff] %vm1602_vm4, %v1497_v15  ;;  %v1250_v19 = vmax.f32 %v814_v16, 0.0  ;;  %v6313_v15 = vld [vmem:[%s8302_s0 + $0x138] sm:$0xff]  }
 0x124   :  { %v816_v20 = vpop.f32.mrf.mxu0 }
 0x125   :  { %v1498_v22 = vmax.f32 %v1374_v18, %v1250_v19  ;;  %v817_v23 = vadd.f32 %v6646_v32, %v816_v20  ;;  %v1375_v25 = vmax.f32 %v1249_v12, %v1250_v19 }
 0x126   :  { %v5353_v24 = vpop.f32.mrf.mxu0  ;;  %v6812_v46 = vld [vmem:[#allocation2 + $0x90] sm:$0xff] }
 0x127   :  { %1623 = vst.msk [vmem:[#allocation2 + $0xa0] sm:$0xff] %vm1602_vm4, %v1498_v22  ;;  %v1251_v26 = vmax.f32 %v817_v23, 0.0 }
 0x128   :  { %v821_v27 = vpop.f32.mrf.mxu0  ;;  %5451 = vmatmul.mubr.msk.bf16.gmra.mxu0 %vm494_vm3, %v6310_v21 }
 0x129   :  { %v1499_v28 = vmax.f32 %v1375_v25, %v1251_v26  ;;  %v822_v29 = vadd.f32 %v6646_v32, %v821_v27  ;;  %5454 = vmatprep.mubr.msk.bf16.mxu0 %vm6408_vm2, %v6406_v0  ;;  %v1376_v36 = vmax.f32 %v1250_v19, %v1251_v26 }
 0x12a   :  { %v5356_v30 = vpop.f32.mrf.mxu0  ;;  %v1798_v33 = vld [vmem:[#allocation2 + $0x98] sm:$0xff] }
 0x12b   :  { %1624 = vst.msk [vmem:[#allocation2 + $0xa8] sm:$0xff] %vm1602_vm4, %v1499_v28  ;;  %v1252_v37 = vmax.f32 %v822_v29, 0.0  ;;  %v5944_v40 = vpack.i.bf16 %v1798_v33, %v1797_v31  ;;  %v6314_v31 = vld [vmem:[%s8302_s0 + $0x140] sm:$0xff]  }
 0x12c   :  { %v824_v41 = vpop.f32.mrf.mxu0 }
 0x12d   :  { %v1500_v43 = vmax.f32 %v1376_v36, %v1252_v37  ;;  %v825_v44 = vadd.f32 %v6646_v32, %v824_v41  ;;  %5945 = vrot.lane.b32.xlu0 %v5944_v40, %s6409_s20  ;;  %v1377_v48 = vmax.f32 %v1251_v26, %v1252_v37 }
 0x12e   :  { %v5357_v45 = vpop.f32.mrf.mxu0  ;;  %v6814_v47 = vld [vmem:[#allocation2 + $0xa0] sm:$0xff] }
 0x12f   :  { %1625 = vst.msk [vmem:[#allocation2 + $0xb0] sm:$0xff] %vm1602_vm4, %v1500_v43  ;;  %v1253_v49 = vmax.f32 %v825_v44, 0.0  ;;  %v5949_v50 = vpack.i.bf16 %v6814_v47, %v6812_v46 }
 0x130   :  { %v829_v51 = vpop.f32.mrf.mxu0  ;;  %5455 = vmatmul.mubr.msk.bf16.gmra.mxu0 %vm494_vm3, %v6311_v42 }
 0x131   :  { %v1501_v52 = vmax.f32 %v1377_v48, %v1253_v49  ;;  %v830_v53 = vadd.f32 %v6646_v32, %v829_v51  ;;  %5950 = vrot.lane.b32.xlu1 %v5949_v50, %s6410_s21  ;;  %5458 = vmatprep.mubr.msk.bf16.mxu0 %vm6408_vm2, %v6406_v0  ;;  %v1378_v55 = vmax.f32 %v1252_v37, %v1253_v49 }
 0x132   :  { %v5360_v54 = vpop.f32.mrf.mxu0  ;;  %v1799_v7 = vld [vmem:[#allocation2 + $0xa8] sm:$0xff] }
 0x133   :  { %1626 = vst.msk [vmem:[#allocation2 + $0xb8] sm:$0xff] %vm1602_vm4, %v1501_v52  ;;  %v1254_v56 = vmax.f32 %v830_v53, 0.0  ;;  %v6315_v54 = vld [vmem:[%s8302_s0 + $0x148] sm:$0xff]  }
 0x134   :  { %v832_v57 = vpop.f32.mrf.mxu0 }
 0x135   :  { %v1502_v59 = vmax.f32 %v1378_v55, %v1254_v56  ;;  %v833_v60 = vadd.f32 %v6646_v32, %v832_v57  ;;  %v1379_v62 = vmax.f32 %v1253_v49, %v1254_v56 }
 0x136   :  { %v5361_v61 = vpop.f32.mrf.mxu0  ;;  %v6840_v19 = vld [vmem:[#allocation2 + $0xb0] sm:$0xff] }
 0x137   :  { %1627 = vst.msk [vmem:[#allocation2 + $0xc0] sm:$0xff] %vm1602_vm4, %v1502_v59  ;;  %v1255_v63 = vmax.f32 %v833_v60, 0.0 }
 0x138   :  { %v837_v1 = vpop.f32.mrf.mxu0  ;;  %5459 = vmatmul.mubr.msk.bf16.gmra.mxu0 %vm494_vm3, %v6312_v58 }
 0x139   :  { %v1503_v2 = vmax.f32 %v1379_v62, %v1255_v63  ;;  %v838_v5 = vadd.f32 %v6646_v32, %v837_v1  ;;  %5462 = vmatprep.mubr.msk.bf16.mxu0 %vm6408_vm2, %v6406_v0  ;;  %v1380_v11 = vmax.f32 %v1254_v56, %v1255_v63 }
 0x13a   :  { %v5364_v6 = vpop.f32.mrf.mxu0  ;;  %v1800_v8 = vld [vmem:[#allocation2 + $0xb8] sm:$0xff] }
 0x13b   :  { %1628 = vst.msk [vmem:[#allocation2 + $0xc8] sm:$0xff] %vm1602_vm4, %v1503_v2  ;;  %v1256_v12 = vmax.f32 %v838_v5, 0.0  ;;  %v5954_v13 = vpack.i.bf16 %v1800_v8, %v1799_v7 }
 0x13c   :  { %v840_v14 = vpop.f32.mrf.mxu0 }
 0x13d   :  { %v1504_v16 = vmax.f32 %v1380_v11, %v1256_v12  ;;  %v841_v17 = vadd.f32 %v6646_v32, %v840_v14  ;;  %5955 = vrot.lane.b32.xlu0 %v5954_v13, %s6409_s20  ;;  %v1381_v21 = vmax.f32 %v1255_v63, %v1256_v12  ;;  %v6316_v11 = vld [vmem:[%s8302_s0 + $0x150] sm:$0xff]  }
 0x13e   :  { %v5365_v18 = vpop.f32.mrf.mxu0  ;;  %v6842_v20 = vld [vmem:[#allocation2 + $0xc0] sm:$0xff] }
 0x13f   :  { %1629 = vst.msk [vmem:[#allocation2 + $0xd0] sm:$0xff] %vm1602_vm4, %v1504_v16  ;;  %v1257_v22 = vmax.f32 %v841_v17, 0.0  ;;  %v5959_v23 = vpack.i.bf16 %v6842_v20, %v6840_v19 }
 0x140   :  { %v845_v24 = vpop.f32.mrf.mxu0  ;;  %5463 = vmatmul.mubr.msk.bf16.gmra.mxu0 %vm494_vm3, %v6313_v15 }
 0x141   :  { %v1505_v25 = vmax.f32 %v1381_v21, %v1257_v22  ;;  %v846_v26 = vadd.f32 %v6646_v32, %v845_v24  ;;  %5960 = vrot.lane.b32.xlu1 %v5959_v23, %s6410_s21  ;;  %5466 = vmatprep.mubr.msk.bf16.mxu0 %vm6408_vm2, %v6406_v0  ;;  %v1382_v28 = vmax.f32 %v1256_v12, %v1257_v22 }
 0x142   :  { %v5368_v27 = vpop.f32.mrf.mxu0  ;;  %v1801_v48 = vld [vmem:[#allocation2 + $0xc8] sm:$0xff] }
 0x143   :  { %1630 = vst.msk [vmem:[#allocation2 + $0xd8] sm:$0xff] %vm1602_vm4, %v1505_v25  ;;  %v1258_v29 = vmax.f32 %v846_v26, 0.0 }
 0x144   :  { %v848_v30 = vpop.f32.mrf.mxu0 }
 0x145   :  { %v1506_v33 = vmax.f32 %v1382_v28, %v1258_v29  ;;  %v849_v36 = vadd.f32 %v6646_v32, %v848_v30  ;;  %v1383_v40 = vmax.f32 %v1257_v22, %v1258_v29 }
 0x146   :  { %v5369_v37 = vpop.f32.mrf.mxu0  ;;  %v6868_v58 = vld [vmem:[#allocation2 + $0xd0] sm:$0xff] }
 0x147   :  { %1631 = vst.msk [vmem:[#allocation2 + $0xe0] sm:$0xff] %vm1602_vm4, %v1506_v33  ;;  %v1259_v41 = vmax.f32 %v849_v36, 0.0 }
 0x148   :  { %v853_v42 = vpop.f32.mrf.mxu0  ;;  %5467 = vmatmul.mubr.msk.bf16.gmra.mxu0 %vm494_vm3, %v6314_v31 }
 0x149   :  { %v1507_v43 = vmax.f32 %v1383_v40, %v1259_v41  ;;  %v854_v44 = vadd.f32 %v6646_v32, %v853_v42  ;;  %5470 = vmatprep.mubr.msk.bf16.mxu0 %vm6408_vm2, %v6406_v0  ;;  %v1384_v50 = vmax.f32 %v1258_v29, %v1259_v41  ;;  %v6317_v29 = vld [vmem:[%s8302_s0 + $0x158] sm:$0xff]  }
 0x14a   :  { %v5372_v45 = vpop.f32.mrf.mxu0  ;;  %v1802_v49 = vld [vmem:[#allocation2 + $0xd8] sm:$0xff] }
 0x14b   :  { %1632 = vst.msk [vmem:[#allocation2 + $0xe8] sm:$0xff] %vm1602_vm4, %v1507_v43  ;;  %v1260_v51 = vmax.f32 %v854_v44, 0.0  ;;  %v5964_v52 = vpack.i.bf16 %v1802_v49, %v1801_v48 }
 0x14c   :  { %v856_v53 = vpop.f32.mrf.mxu0 }
 0x14d   :  { %v1508_v55 = vmax.f32 %v1384_v50, %v1260_v51  ;;  %v857_v56 = vadd.f32 %v6646_v32, %v856_v53  ;;  %5965 = vrot.lane.b32.xlu0 %v5964_v52, %s6409_s20  ;;  %v1385_v60 = vmax.f32 %v1259_v41, %v1260_v51 }
 0x14e   :  { %v5373_v57 = vpop.f32.mrf.mxu0  ;;  %v6870_v59 = vld [vmem:[#allocation2 + $0xe0] sm:$0xff] }
 0x14f   :  { %1633 = vst.msk [vmem:[#allocation2 + $0xf0] sm:$0xff] %vm1602_vm4, %v1508_v55  ;;  %v1261_v61 = vmax.f32 %v857_v56, 0.0  ;;  %v5969_v62 = vpack.i.bf16 %v6870_v59, %v6868_v58  ;;  %v1727_v55 = vld [vmem:[#allocation2] sm:$0xff] }
 0x150   :  { %v861_v63 = vpop.f32.mrf.mxu0  ;;  %5471 = vmatmul.mubr.msk.bf16.gmra.mxu0 %vm494_vm3, %v6315_v54 }
 0x151   :  { %v1509_v1 = vmax.f32 %v1385_v60, %v1261_v61  ;;  %v862_v2 = vadd.f32 %v6646_v32, %v861_v63  ;;  %5970 = vrot.lane.b32.xlu1 %v5969_v62, %s6410_s21  ;;  %5474 = vmatprep.mubr.msk.bf16.mxu0 %vm6408_vm2, %v6406_v0  ;;  %v1386_v6 = vmax.f32 %v1260_v51, %v1261_v61 }
 0x152   :  { %v5376_v5 = vpop.f32.mrf.mxu0  ;;  %v1803_v23 = vld [vmem:[#allocation2 + $0xe8] sm:$0xff] }
 0x153   :  { %1634 = vst.msk [vmem:[#allocation2 + $0xf8] sm:$0xff] %vm1602_vm4, %v1509_v1  ;;  %v1262_v7 = vmax.f32 %v862_v2, 0.0 }
 0x154   :  { %v864_v8 = vpop.f32.mrf.mxu0 }
 0x155   :  { %v1510_v12 = vmax.f32 %v1386_v6, %v1262_v7  ;;  %v865_v13 = vadd.f32 %v6646_v32, %v864_v8  ;;  %v1387_v15 = vmax.f32 %v1261_v61, %v1262_v7  ;;  %v6320_v61 = vld [vmem:[%s8302_s0 + $0x160] sm:$0xff]  }
 0x156   :  { %v5377_v14 = vpop.f32.mrf.mxu0  ;;  %v6896_v36 = vld [vmem:[#allocation2 + $0xf0] sm:$0xff] }
 0x157   :  { %1635 = vst.msk [vmem:[#allocation2 + $0x100] sm:$0xff] %vm1602_vm4, %v1510_v12  ;;  %v1263_v16 = vmax.f32 %v865_v13, 0.0 }
 0x158   :  { %v869_v17 = vpop.f32.mrf.mxu0  ;;  %5475 = vmatmul.mubr.msk.bf16.gmra.mxu0 %vm494_vm3, %v6316_v11 }
 0x159   :  { %v1511_v18 = vmax.f32 %v1387_v15, %v1263_v16  ;;  %v870_v21 = vadd.f32 %v6646_v32, %v869_v17  ;;  %5478 = vmatprep.mubr.msk.bf16.mxu0 %vm6408_vm2, %v6406_v0  ;;  %v1388_v25 = vmax.f32 %v1262_v7, %v1263_v16 }
 0x15a   :  { %v5380_v22 = vpop.f32.mrf.mxu0  ;;  %v1804_v24 = vld [vmem:[#allocation2 + $0xf8] sm:$0xff] }
 0x15b   :  { %1636 = vst.msk [vmem:[#allocation2 + $0x108] sm:$0xff] %vm1602_vm4, %v1511_v18  ;;  %v1264_v26 = vmax.f32 %v870_v21, 0.0  ;;  %v5974_v27 = vpack.i.bf16 %v1804_v24, %v1803_v23  ;;  %v6321_v24 = vld [vmem:[%s8302_s0 + $0x168] sm:$0xff]  }
 0x15c   :  { %v872_v28 = vpop.f32.mrf.mxu0 }
 0x15d   :  { %v1512_v30 = vmax.f32 %v1388_v25, %v1264_v26  ;;  %v873_v31 = vadd.f32 %v6646_v32, %v872_v28  ;;  %5975 = vrot.lane.b32.xlu0 %v5974_v27, %s6409_s20  ;;  %v1389_v40 = vmax.f32 %v1263_v16, %v1264_v26 }
 0x15e   :  { %v5381_v33 = vpop.f32.mrf.mxu0  ;;  %v6898_v37 = vld [vmem:[#allocation2 + $0x100] sm:$0xff] }
 0x15f   :  { %1637 = vst.msk [vmem:[#allocation2 + $0x110] sm:$0xff] %vm1602_vm4, %v1512_v30  ;;  %v1265_v41 = vmax.f32 %v873_v31, 0.0  ;;  %v5906_v42 = vpop.permute.xlu0 %5905  ;;  %v5979_v43 = vpack.i.bf16 %v6898_v37, %v6896_v36 }
 0x160   :  { %v877_v44 = vpop.f32.mrf.mxu0  ;;  %5479 = vmatmul.mubr.msk.bf16.gmra.mxu0 %vm494_vm3, %v6317_v29  ;;  %v5908_v48 = vunpack.i.h.bf16 %v5906_v42  ;;  %v5907_v49 = vunpack.i.l.bf16 %v5906_v42 }
 0x161   :  { %v1513_v45 = vmax.f32 %v1389_v40, %v1265_v41  ;;  %v878_v50 = vadd.f32 %v6646_v32, %v877_v44  ;;  %5980 = vrot.lane.b32.xlu1 %v5979_v43, %s6410_s21  ;;  %5482 = vmatprep.mubr.msk.bf16.mxu0 %vm6408_vm2, %v6406_v0  ;;  %v1390_v52 = vmax.f32 %v1264_v26, %v1265_v41 }
 0x162   :  { %v5384_v51 = vpop.f32.mrf.mxu0  ;;  %v2401_v62 = vsel %vm1602_vm4, %v6700_v34, %v5908_v48  ;;  %v2400_v63 = vsel %vm1602_vm4, %v1727_v55, %v5907_v49  ;;  %v1805_v16 = vld [vmem:[#allocation2 + $0x108] sm:$0xff]  ;;  %v6322_v55 = vld [vmem:[%s8302_s0 + $0x170] sm:$0xff]  }
 0x163   :  { %1638 = vst.msk [vmem:[#allocation2 + $0x118] sm:$0xff] %vm1602_vm4, %v1513_v45  ;;  %v1266_v53 = vmax.f32 %v878_v50, 0.0  ;;  %v5911_v54 = vpop.permute.xlu0 %5910 }
 0x164   :  { %v5913_v56 = vunpack.i.h.bf16 %v5911_v54  ;;  %v5912_v57 = vunpack.i.l.bf16 %v5911_v54  ;;  %v880_v60 = vpop.f32.mrf.mxu0 }
 0x165   :  { %v1514_v1 = vmax.f32 %v1390_v52, %v1266_v53  ;;  %v881_v2 = vadd.f32 %v6646_v32, %v880_v60  ;;  %v1391_v8 = vmax.f32 %v1265_v41, %v1266_v53 }
 0x166   :  { %v2463_v5 = vsel %vm2461_vm6, %v2401_v62, %v5913_v56  ;;  %v2462_v6 = vsel %vm2461_vm6, %v2400_v63, %v5912_v57  ;;  %v5385_v7 = vpop.f32.mrf.mxu0  ;;  %v6932_v28 = vld [vmem:[#allocation2 + $0x110] sm:$0xff] }
 0x167   :  { %1639 = vst.msk [vmem:[#allocation2 + $0x120] sm:$0xff] %vm1602_vm4, %v1514_v1  ;;  %v2523_v11 = vpack.c.bf16 %v2463_v5, %v2462_v6  ;;  %v1267_v12 = vmax.f32 %v881_v2, 0.0 }
 0x168   :  { %v885_v13 = vpop.f32.mrf.mxu0  ;;  %5483 = vmatmul.mubr.msk.bf16.gmra.mxu0 %vm494_vm3, %v6320_v61 }
 0x169   :  { %v1515_v34 = vmax.f32 %v1391_v8, %v1267_v12  ;;  %v886_v14 = vadd.f32 %v6646_v32, %v885_v13  ;;  %5563 = vmatmul.mubr.msk.bf16.vlgmr.msra.gmra.mxu1 %vm2576_vm7, %v2523_v11  ;;  %5486 = vmatprep.mubr.msk.bf16.mxu0 %vm6408_vm2, %v6406_v0  ;;  %v1392_v18 = vmax.f32 %v1266_v53, %v1267_v12 }
 0x16a   :  { %v5388_v15 = vpop.f32.mrf.mxu0  ;;  %v1806_v17 = vld [vmem:[#allocation2 + $0x118] sm:$0xff]  ;;  %5566 = vmatprep.mubr.msk.bf16.mxu1 %vm6408_vm2, %v6406_v0 }
 0x16b   :  { %1640 = vst.msk [vmem:[#allocation2 + $0x128] sm:$0xff] %vm1602_vm4, %v1515_v34  ;;  %v1268_v21 = vmax.f32 %v886_v14, 0.0  ;;  %v5984_v22 = vpack.i.bf16 %v1806_v17, %v1805_v16  ;;  %v6323_v16 = vld [vmem:[%s8302_s0 + $0x178] sm:$0xff]  }
 0x16c   :  { %v888_v23 = vpop.f32.mrf.mxu0 }
 0x16d   :  { %v1516_v25 = vmax.f32 %v1392_v18, %v1268_v21  ;;  %v889_v26 = vadd.f32 %v6646_v32, %v888_v23  ;;  %5985 = vrot.lane.b32.xlu0 %v5984_v22, %s6409_s20  ;;  %v1393_v30 = vmax.f32 %v1267_v12, %v1268_v21 }
 0x16e   :  { %v5389_v27 = vpop.f32.mrf.mxu0  ;;  %v6934_v29 = vld [vmem:[#allocation2 + $0x120] sm:$0xff] }
 0x16f   :  { %1641 = vst.msk [vmem:[#allocation2 + $0x130] sm:$0xff] %vm1602_vm4, %v1516_v25  ;;  %v1269_v31 = vmax.f32 %v889_v26, 0.0  ;;  %v5916_v33 = vpop.permute.xlu1 %5915  ;;  %v5989_v40 = vpack.i.bf16 %v6934_v29, %v6932_v28 }
 0x170   :  { %v893_v41 = vpop.f32.mrf.mxu0  ;;  %5487 = vmatmul.mubr.msk.bf16.gmra.mxu0 %vm494_vm3, %v6321_v24  ;;  %v5918_v43 = vunpack.i.h.bf16 %v5916_v33  ;;  %v5917_v44 = vunpack.i.l.bf16 %v5916_v33 }
 0x171   :  { %v1517_v42 = vmax.f32 %v1393_v30, %v1269_v31  ;;  %v894_v45 = vadd.f32 %v6646_v32, %v893_v41  ;;  %5990 = vrot.lane.b32.xlu1 %v5989_v40, %s6410_s21  ;;  %5490 = vmatprep.mubr.msk.bf16.mxu0 %vm6408_vm2, %v6406_v0  ;;  %v1394_v49 = vmax.f32 %v1268_v21, %v1269_v31 }
 0x172   :  { %v5392_v48 = vpop.f32.mrf.mxu0  ;;  %v2403_v56 = vsel %vm1602_vm4, %v6728_v3, %v5918_v43  ;;  %v2402_v57 = vsel %vm1602_vm4, %v6702_v35, %v5917_v44  ;;  %v1807_v11 = vld [vmem:[#allocation2 + $0x128] sm:$0xff] }
 0x173   :  { %1642 = vst.msk [vmem:[#allocation2 + $0x138] sm:$0xff] %vm1602_vm4, %v1517_v42  ;;  %v1270_v50 = vmax.f32 %v894_v45, 0.0  ;;  %v5921_v51 = vpop.permute.xlu1 %5920 }
 0x174   :  { %v5923_v52 = vunpack.i.h.bf16 %v5921_v51  ;;  %v5922_v53 = vunpack.i.l.bf16 %v5921_v51  ;;  %v896_v54 = vpop.f32.mrf.mxu0  ;;  %v6324_v51 = vld [vmem:[%s8302_s0 + $0x180] sm:$0xff]  }
 0x175   :  { %v1518_v60 = vmax.f32 %v1394_v49, %v1270_v50  ;;  %v897_v61 = vadd.f32 %v6646_v32, %v896_v54  ;;  %v1395_v2 = vmax.f32 %v1269_v31, %v1270_v50  ;;  %v6992_v54 = vld [vmem:[%s8303_s2] ss:$0 sm:$0xff] }
 0x176   :  { %v2465_v62 = vsel %vm2461_vm6, %v2403_v56, %v5923_v52  ;;  %v2464_v63 = vsel %vm2461_vm6, %v2402_v57, %v5922_v53  ;;  %v5393_v1 = vpop.f32.mrf.mxu0  ;;  %v6969_v22 = vld [vmem:[#allocation2 + $0x130] sm:$0xff] }
 0x177   :  { %1643 = vst.msk [vmem:[#allocation2 + $0x140] sm:$0xff] %vm1602_vm4, %v1518_v60  ;;  %v2524_v5 = vpack.c.bf16 %v2465_v62, %v2464_v63  ;;  %v1271_v6 = vmax.f32 %v897_v61, 0.0 }
 0x178   :  { %v901_v7 = vpop.f32.mrf.mxu0  ;;  %5491 = vmatmul.mubr.msk.bf16.gmra.mxu0 %vm494_vm3, %v6322_v55 }
 0x179   :  { %v1519_v3 = vmax.f32 %v1395_v2, %v1271_v6  ;;  %v902_v8 = vadd.f32 %v6646_v32, %v901_v7  ;;  %5567 = vmatmul.mubr.msk.bf16.gmra.mxu1 %vm2576_vm7, %v2524_v5  ;;  %5494 = vmatprep.mubr.msk.bf16.mxu0 %vm6408_vm2, %v6406_v0  ;;  %v1396_v13 = vmax.f32 %v1270_v50, %v1271_v6 }
 0x17a   :  { %v5396_v35 = vpop.f32.mrf.mxu0  ;;  %v1808_v12 = vld [vmem:[#allocation2 + $0x138] sm:$0xff]  ;;  %5570 = vmatprep.mubr.msk.bf16.mxu1 %vm6408_vm2, %v6406_v0 }
 0x17b   :  { %1644 = vst.msk [vmem:[#allocation2 + $0x148] sm:$0xff] %vm1602_vm4, %v1519_v3  ;;  %v1272_v34 = vmax.f32 %v902_v8, 0.0  ;;  %v5994_v14 = vpack.i.bf16 %v1808_v12, %v1807_v11  ;;  %v6325_v11 = vld [vmem:[%s8302_s0 + $0x188] sm:$0xff]  }
 0x17c   :  { %v904_v15 = vpop.f32.mrf.mxu0 }
 0x17d   :  { %v1520_v17 = vmax.f32 %v1396_v13, %v1272_v34  ;;  %v905_v18 = vadd.f32 %v6646_v32, %v904_v15  ;;  %5995 = vrot.lane.b32.xlu0 %v5994_v14, %s6409_s20  ;;  %v1397_v24 = vmax.f32 %v1271_v6, %v1272_v34 }
 0x17e   :  { %v5397_v21 = vpop.f32.mrf.mxu0  ;;  %v6971_v23 = vld [vmem:[#allocation2 + $0x140] sm:$0xff] }
 0x17f   :  { %1645 = vst.msk [vmem:[#allocation2 + $0x150] sm:$0xff] %vm1602_vm4, %v1520_v17  ;;  %v1273_v25 = vmax.f32 %v905_v18, 0.0  ;;  %v5926_v26 = vpop.permute.xlu0 %5925  ;;  %v5999_v27 = vpack.i.bf16 %v6971_v23, %v6969_v22 }
 0x180   :  { %v909_v30 = vpop.f32.mrf.mxu0  ;;  %5495 = vmatmul.mubr.msk.bf16.gmra.mxu0 %vm494_vm3, %v6323_v16  ;;  %v5928_v33 = vunpack.i.h.bf16 %v5926_v26  ;;  %v5927_v40 = vunpack.i.l.bf16 %v5926_v26 }
 0x181   :  { %v1521_v31 = vmax.f32 %v1397_v24, %v1273_v25  ;;  %v910_v41 = vadd.f32 %v6646_v32, %v909_v30  ;;  %6000 = vrot.lane.b32.xlu1 %v5999_v27, %s6410_s21  ;;  %5498 = vmatprep.mubr.msk.bf16.mxu0 %vm6408_vm2, %v6406_v0  ;;  %v1398_v43 = vmax.f32 %v1272_v34, %v1273_v25 }
 0x182   :  { %v5400_v42 = vpop.f32.mrf.mxu0  ;;  %v2405_v32 = vsel %vm1602_vm4, %v6756_v38, %v5928_v33  ;;  %v2404_v52 = vsel %vm1602_vm4, %v6730_v4, %v5927_v40  ;;  %v1809_v5 = vld [vmem:[#allocation2 + $0x148] sm:$0xff] }
 0x183   :  { %1646 = vst.msk [vmem:[#allocation2 + $0x158] sm:$0xff] %vm1602_vm4, %v1521_v31  ;;  %v1274_v44 = vmax.f32 %v910_v41, 0.0  ;;  %v5931_v45 = vpop.permute.xlu1 %5930 }
 0x184   :  { %v5933_v48 = vunpack.i.h.bf16 %v5931_v45  ;;  %v5932_v49 = vunpack.i.l.bf16 %v5931_v45  ;;  %v912_v50 = vpop.f32.mrf.mxu0  ;;  %v6326_v45 = vld [vmem:[%s8302_s0 + $0x190] sm:$0xff]  }
 0x185   :  { %v1522_v53 = vmax.f32 %v1398_v43, %v1274_v44  ;;  %v913_v55 = vadd.f32 %v6992_v54, %v912_v50  ;;  %v1399_v61 = vmax.f32 %v1273_v25, %v1274_v44 }
 0x186   :  { %v2467_v56 = vsel %vm2461_vm6, %v2405_v32, %v5933_v48  ;;  %v2466_v57 = vsel %vm2461_vm6, %v2404_v52, %v5932_v49  ;;  %v5401_v60 = vpop.f32.mrf.mxu0  ;;  %v7011_v14 = vld [vmem:[#allocation2 + $0x150] sm:$0xff] }
 0x187   :  { %1647 = vst.msk [vmem:[#allocation2 + $0x160] sm:$0xff] %vm1602_vm4, %v1522_v53  ;;  %v2525_v38 = vpack.c.bf16 %v2467_v56, %v2466_v57  ;;  %v1275_v62 = vmax.f32 %v913_v55, 0.0 }
 0x188   :  { %v917_v63 = vpop.f32.mrf.mxu0  ;;  %5499 = vmatmul.mubr.msk.bf16.gmra.mxu0 %vm494_vm3, %v6324_v51 }
 0x189   :  { %v1523_v4 = vmax.f32 %v1399_v61, %v1275_v62  ;;  %v918_v1 = vadd.f32 %v6992_v54, %v917_v63  ;;  %5571 = vmatmul.mubr.msk.bf16.gmra.mxu1 %vm2576_vm7, %v2525_v38  ;;  %5502 = vmatprep.mubr.msk.bf16.mxu0 %vm6408_vm2, %v6406_v0  ;;  %v1400_v7 = vmax.f32 %v1274_v44, %v1275_v62 }
 0x18a   :  { %v5404_v2 = vpop.f32.mrf.mxu0  ;;  %v1810_v6 = vld [vmem:[#allocation2 + $0x158] sm:$0xff]  ;;  %5574 = vmatprep.mubr.msk.bf16.mxu1 %vm6408_vm2, %v6406_v0 }
 0x18b   :  { %1648 = vst.msk [vmem:[#allocation2 + $0x168] sm:$0xff] %vm1602_vm4, %v1523_v4  ;;  %v1276_v3 = vmax.f32 %v918_v1, 0.0  ;;  %v6004_v8 = vpack.i.bf16 %v1810_v6, %v1809_v5  ;;  %v6327_v5 = vld [vmem:[%s8302_s0 + $0x198] sm:$0xff]  }
 0x18c   :  { %v920_v35 = vpop.f32.mrf.mxu0 }
 0x18d   :  { %v1524_v12 = vmax.f32 %v1400_v7, %v1276_v3  ;;  %v921_v13 = vadd.f32 %v6992_v54, %v920_v35  ;;  %6005 = vrot.lane.b32.xlu0 %v6004_v8, %s6409_s20  ;;  %v1401_v16 = vmax.f32 %v1275_v62, %v1276_v3 }
 0x18e   :  { %v5405_v34 = vpop.f32.mrf.mxu0  ;;  %v7013_v15 = vld [vmem:[#allocation2 + $0x160] sm:$0xff] }
 0x18f   :  { %1649 = vst.msk [vmem:[#allocation2 + $0x170] sm:$0xff] %vm1602_vm4, %v1524_v12  ;;  %v1277_v17 = vmax.f32 %v921_v13, 0.0  ;;  %v5936_v18 = vpop.permute.xlu0 %5935  ;;  %v6009_v21 = vpack.i.bf16 %v7013_v15, %v7011_v14 }
 0x190   :  { %v925_v24 = vpop.f32.mrf.mxu0  ;;  %5503 = vmatmul.mubr.msk.bf16.gmra.mxu0 %vm494_vm3, %v6325_v11  ;;  %v5938_v26 = vunpack.i.h.bf16 %v5936_v18  ;;  %v5937_v27 = vunpack.i.l.bf16 %v5936_v18 }
 0x191   :  { %v1525_v25 = vmax.f32 %v1401_v16, %v1277_v17  ;;  %v926_v30 = vadd.f32 %v6992_v54, %v925_v24  ;;  %6010 = vrot.lane.b32.xlu1 %v6009_v21, %s6410_s21  ;;  %5506 = vmatprep.mubr.msk.bf16.mxu0 %vm6408_vm2, %v6406_v0  ;;  %v1402_v33 = vmax.f32 %v1276_v3, %v1277_v17 }
 0x192   :  { %v5408_v31 = vpop.f32.mrf.mxu0  ;;  %v2407_v48 = vsel %vm1602_vm4, %v6784_v9, %v5938_v26  ;;  %v2406_v49 = vsel %vm1602_vm4, %v6758_v39, %v5937_v27  ;;  %v1811_v38 = vld [vmem:[#allocation2 + $0x168] sm:$0xff] }
 0x193   :  { %1650 = vst.msk [vmem:[#allocation2 + $0x178] sm:$0xff] %vm1602_vm4, %v1525_v25  ;;  %v1278_v40 = vmax.f32 %v926_v30, 0.0  ;;  %v5941_v41 = vpop.permute.xlu1 %5940 }
 0x194   :  { %v5943_v42 = vunpack.i.h.bf16 %v5941_v41  ;;  %v5942_v43 = vunpack.i.l.bf16 %v5941_v41  ;;  %v928_v44 = vpop.f32.mrf.mxu0  ;;  %v6328_v41 = vld [vmem:[%s8302_s0 + $0x1a0] sm:$0xff]  }
 0x195   :  { %v1526_v50 = vmax.f32 %v1402_v33, %v1278_v40  ;;  %v929_v51 = vadd.f32 %v6992_v54, %v928_v44  ;;  %v1403_v55 = vmax.f32 %v1277_v17, %v1278_v40 }
 0x196   :  { %v2469_v32 = vsel %vm2461_vm6, %v2407_v48, %v5943_v42  ;;  %v2468_v52 = vsel %vm2461_vm6, %v2406_v49, %v5942_v43  ;;  %v5409_v53 = vpop.f32.mrf.mxu0  ;;  %v7048_v8 = vld [vmem:[#allocation2 + $0x170] sm:$0xff] }
 0x197   :  { %1651 = vst.msk [vmem:[#allocation2 + $0x180] sm:$0xff] %vm1602_vm4, %v1526_v50  ;;  %v2526_v56 = vpack.c.bf16 %v2469_v32, %v2468_v52  ;;  %v1279_v57 = vmax.f32 %v929_v51, 0.0 }
 0x198   :  { %v933_v60 = vpop.f32.mrf.mxu0  ;;  %5507 = vmatmul.mubr.msk.bf16.gmra.mxu0 %vm494_vm3, %v6326_v45 }
 0x199   :  { %v1527_v9 = vmax.f32 %v1403_v55, %v1279_v57  ;;  %v934_v61 = vadd.f32 %v6992_v54, %v933_v60  ;;  %5575 = vmatmul.mubr.msk.bf16.gmra.mxu1 %vm2576_vm7, %v2526_v56  ;;  %5510 = vmatprep.mubr.msk.bf16.mxu0 %vm6408_vm2, %v6406_v0  ;;  %v1404_v63 = vmax.f32 %v1278_v40, %v1279_v57 }
 0x19a   :  { %v5412_v39 = vpop.f32.mrf.mxu0  ;;  %v1812_v62 = vld [vmem:[#allocation2 + $0x178] sm:$0xff]  ;;  %5578 = vmatprep.mubr.msk.bf16.mxu1 %vm6408_vm2, %v6406_v0 }
 0x19b   :  { %1652 = vst.msk [vmem:[#allocation2 + $0x188] sm:$0xff] %vm1602_vm4, %v1527_v9  ;;  %v1280_v4 = vmax.f32 %v934_v61, 0.0  ;;  %v6014_v1 = vpack.i.bf16 %v1812_v62, %v1811_v38  ;;  %v6329_v38 = vld [vmem:[%s8302_s0 + $0x1a8] sm:$0xff]  }
 0x19c   :  { %v936_v2 = vpop.f32.mrf.mxu0 }
 0x19d   :  { %v1528_v6 = vmax.f32 %v1404_v63, %v1280_v4  ;;  %v937_v7 = vadd.f32 %v6992_v54, %v936_v2  ;;  %6015 = vrot.lane.b32.xlu0 %v6014_v1, %s6409_s20  ;;  %v1405_v11 = vmax.f32 %v1279_v57, %v1280_v4 }
 0x19e   :  { %v5413_v3 = vpop.f32.mrf.mxu0  ;;  %v7050_v35 = vld [vmem:[#allocation2 + $0x180] sm:$0xff] }
 0x19f   :  { %1653 = vst.msk [vmem:[#allocation2 + $0x190] sm:$0xff] %vm1602_vm4, %v1528_v6  ;;  %v1281_v12 = vmax.f32 %v937_v7, 0.0  ;;  %v5946_v13 = vpop.permute.xlu0 %5945  ;;  %v6019_v34 = vpack.i.bf16 %v7050_v35, %v7048_v8 }
 0x1a0   :  { %v941_v16 = vpop.f32.mrf.mxu0  ;;  %5511 = vmatmul.mubr.msk.bf16.gmra.mxu0 %vm494_vm3, %v6327_v5  ;;  %v5948_v18 = vunpack.i.h.bf16 %v5946_v13  ;;  %v5947_v21 = vunpack.i.l.bf16 %v5946_v13 }
 0x1a1   :  { %v1529_v17 = vmax.f32 %v1405_v11, %v1281_v12  ;;  %v942_v24 = vadd.f32 %v6992_v54, %v941_v16  ;;  %6020 = vrot.lane.b32.xlu1 %v6019_v34, %s6410_s21  ;;  %5514 = vmatprep.mubr.msk.bf16.mxu0 %vm6408_vm2, %v6406_v0  ;;  %v1406_v26 = vmax.f32 %v1280_v4, %v1281_v12 }
 0x1a2   :  { %v5416_v25 = vpop.f32.mrf.mxu0  ;;  %v2409_v42 = vsel %vm1602_vm4, %v6812_v46, %v5948_v18  ;;  %v2408_v43 = vsel %vm1602_vm4, %v6786_v10, %v5947_v21  ;;  %v1813_v56 = vld [vmem:[#allocation2 + $0x188] sm:$0xff] }
 0x1a3   :  { %1654 = vst.msk [vmem:[#allocation2 + $0x198] sm:$0xff] %vm1602_vm4, %v1529_v17  ;;  %v1282_v27 = vmax.f32 %v942_v24, 0.0  ;;  %v5951_v30 = vpop.permute.xlu1 %5950 }
 0x1a4   :  { %v5953_v31 = vunpack.i.h.bf16 %v5951_v30  ;;  %v5952_v33 = vunpack.i.l.bf16 %v5951_v30  ;;  %v944_v40 = vpop.f32.mrf.mxu0  ;;  %v6330_v30 = vld [vmem:[%s8302_s0 + $0x1b0] sm:$0xff]  }
 0x1a5   :  { %v1530_v44 = vmax.f32 %v1406_v26, %v1282_v27  ;;  %v945_v45 = vadd.f32 %v6992_v54, %v944_v40  ;;  %v1407_v51 = vmax.f32 %v1281_v12, %v1282_v27 }
 0x1a6   :  { %v2471_v48 = vsel %vm2461_vm6, %v2409_v42, %v5953_v31  ;;  %v2470_v49 = vsel %vm2461_vm6, %v2408_v43, %v5952_v33  ;;  %v5417_v50 = vpop.f32.mrf.mxu0  ;;  %v7085_v1 = vld [vmem:[#allocation2 + $0x190] sm:$0xff] }
 0x1a7   :  { %1655 = vst.msk [vmem:[#allocation2 + $0x1a0] sm:$0xff] %vm1602_vm4, %v1530_v44  ;;  %v2527_v32 = vpack.c.bf16 %v2471_v48, %v2470_v49  ;;  %v1283_v52 = vmax.f32 %v945_v45, 0.0 }
 0x1a8   :  { %v949_v53 = vpop.f32.mrf.mxu0  ;;  %5515 = vmatmul.mubr.msk.bf16.gmra.mxu0 %vm494_vm3, %v6328_v41 }
 0x1a9   :  { %v1531_v46 = vmax.f32 %v1407_v51, %v1283_v52  ;;  %v950_v55 = vadd.f32 %v6992_v54, %v949_v53  ;;  %5579 = vmatmul.mubr.msk.bf16.gmra.mxu1 %vm2576_vm7, %v2527_v32  ;;  %5518 = vmatprep.mubr.msk.bf16.mxu0 %vm6408_vm2, %v6406_v0  ;;  %v1408_v60 = vmax.f32 %v1282_v27, %v1283_v52 }
 0x1aa   :  { %v5420_v10 = vpop.f32.mrf.mxu0  ;;  %v1814_v57 = vld [vmem:[#allocation2 + $0x198] sm:$0xff]  ;;  %5582 = vmatprep.mubr.msk.bf16.mxu1 %vm6408_vm2, %v6406_v0 }
 0x1ab   :  { %1656 = vst.msk [vmem:[#allocation2 + $0x1a8] sm:$0xff] %vm1602_vm4, %v1531_v46  ;;  %v1284_v9 = vmax.f32 %v950_v55, 0.0  ;;  %v6024_v61 = vpack.i.bf16 %v1814_v57, %v1813_v56  ;;  %v6331_v56 = vld [vmem:[%s8302_s0 + $0x1b8] sm:$0xff]  }
 0x1ac   :  { %v952_v39 = vpop.f32.mrf.mxu0 }
 0x1ad   :  { %v1532_v62 = vmax.f32 %v1408_v60, %v1284_v9  ;;  %v953_v63 = vadd.f32 %v6992_v54, %v952_v39  ;;  %6025 = vrot.lane.b32.xlu0 %v6024_v61, %s6409_s20  ;;  %v1409_v5 = vmax.f32 %v1283_v52, %v1284_v9 }
 0x1ae   :  { %v5421_v4 = vpop.f32.mrf.mxu0  ;;  %v7087_v2 = vld [vmem:[#allocation2 + $0x1a0] sm:$0xff] }
 0x1af   :  { %1657 = vst.msk [vmem:[#allocation2 + $0x1b0] sm:$0xff] %vm1602_vm4, %v1532_v62  ;;  %v1285_v6 = vmax.f32 %v953_v63, 0.0  ;;  %v5956_v7 = vpop.permute.xlu0 %5955  ;;  %v6029_v3 = vpack.i.bf16 %v7087_v2, %v7085_v1 }
 0x1b0   :  { %v957_v11 = vpop.f32.mrf.mxu0  ;;  %5519 = vmatmul.mubr.msk.bf16.gmra.mxu0 %vm494_vm3, %v6329_v38  ;;  %v5958_v13 = vunpack.i.h.bf16 %v5956_v7  ;;  %v5957_v34 = vunpack.i.l.bf16 %v5956_v7 }
 0x1b1   :  { %v1533_v12 = vmax.f32 %v1409_v5, %v1285_v6  ;;  %v958_v16 = vadd.f32 %v6992_v54, %v957_v11  ;;  %6030 = vrot.lane.b32.xlu1 %v6029_v3, %s6410_s21  ;;  %5522 = vmatprep.mubr.msk.bf16.mxu0 %vm6408_vm2, %v6406_v0  ;;  %v1410_v18 = vmax.f32 %v1284_v9, %v1285_v6 }
 0x1b2   :  { %v5424_v17 = vpop.f32.mrf.mxu0  ;;  %v2411_v31 = vsel %vm1602_vm4, %v6840_v19, %v5958_v13  ;;  %v2410_v33 = vsel %vm1602_vm4, %v6814_v47, %v5957_v34  ;;  %v1815_v32 = vld [vmem:[#allocation2 + $0x1a8] sm:$0xff] }
 0x1b3   :  { %1658 = vst.msk [vmem:[#allocation2 + $0x1b8] sm:$0xff] %vm1602_vm4, %v1533_v12  ;;  %v1286_v21 = vmax.f32 %v958_v16, 0.0  ;;  %v5961_v24 = vpop.permute.xlu1 %5960 }
 0x1b4   :  { %v5963_v25 = vunpack.i.h.bf16 %v5961_v24  ;;  %v5962_v26 = vunpack.i.l.bf16 %v5961_v24  ;;  %v960_v27 = vpop.f32.mrf.mxu0  ;;  %v6332_v24 = vld [vmem:[%s8302_s0 + $0x1c0] sm:$0xff]  }
 0x1b5   :  { %v1534_v40 = vmax.f32 %v1410_v18, %v1286_v21  ;;  %v961_v41 = vadd.f32 %v6992_v54, %v960_v27  ;;  %v1411_v45 = vmax.f32 %v1285_v6, %v1286_v21 }
 0x1b6   :  { %v2473_v42 = vsel %vm2461_vm6, %v2411_v31, %v5963_v25  ;;  %v2472_v43 = vsel %vm2461_vm6, %v2410_v33, %v5962_v26  ;;  %v5425_v44 = vpop.f32.mrf.mxu0  ;;  %v7122_v61 = vld [vmem:[#allocation2 + $0x1b0] sm:$0xff] }
 0x1b7   :  { %1659 = vst.msk [vmem:[#allocation2 + $0x1c0] sm:$0xff] %vm1602_vm4, %v1534_v40  ;;  %v2528_v48 = vpack.c.bf16 %v2473_v42, %v2472_v43  ;;  %v1287_v49 = vmax.f32 %v961_v41, 0.0 }
 0x1b8   :  { %v965_v50 = vpop.f32.mrf.mxu0  ;;  %5523 = vmatmul.mubr.msk.bf16.gmra.mxu0 %vm494_vm3, %v6330_v30 }
 0x1b9   :  { %v1535_v19 = vmax.f32 %v1411_v45, %v1287_v49  ;;  %v966_v51 = vadd.f32 %v6992_v54, %v965_v50  ;;  %5583 = vmatmul.mubr.msk.bf16.gmra.mxu1 %vm2576_vm7, %v2528_v48  ;;  %5526 = vmatprep.mubr.msk.bf16.mxu0 %vm6408_vm2, %v6406_v0  ;;  %v1412_v53 = vmax.f32 %v1286_v21, %v1287_v49 }
 0x1ba   :  { %v5428_v47 = vpop.f32.mrf.mxu0  ;;  %v1816_v52 = vld [vmem:[#allocation2 + $0x1b8] sm:$0xff]  ;;  %5586 = vmatprep.mubr.msk.bf16.mxu1 %vm6408_vm2, %v6406_v0 }
 0x1bb   :  { %1660 = vst.msk [vmem:[#allocation2 + $0x1c8] sm:$0xff] %vm1602_vm4, %v1535_v19  ;;  %v1288_v46 = vmax.f32 %v966_v51, 0.0  ;;  %v6034_v55 = vpack.i.bf16 %v1816_v52, %v1815_v32  ;;  %v6333_v32 = vld [vmem:[%s8302_s0 + $0x1c8] sm:$0xff]  }
 0x1bc   :  { %v968_v10 = vpop.f32.mrf.mxu0 }
 0x1bd   :  { %v1536_v57 = vmax.f32 %v1412_v53, %v1288_v46  ;;  %v969_v60 = vadd.f32 %v6992_v54, %v968_v10  ;;  %6035 = vrot.lane.b32.xlu0 %v6034_v55, %s6409_s20  ;;  %v1413_v38 = vmax.f32 %v1287_v49, %v1288_v46 }
 0x1be   :  { %v5429_v9 = vpop.f32.mrf.mxu0  ;;  %v7124_v39 = vld [vmem:[#allocation2 + $0x1c0] sm:$0xff] }
 0x1bf   :  { %1661 = vst.msk [vmem:[#allocation2 + $0x1d0] sm:$0xff] %vm1602_vm4, %v1536_v57  ;;  %v1289_v62 = vmax.f32 %v969_v60, 0.0  ;;  %v5966_v63 = vpop.permute.xlu0 %5965  ;;  %v6039_v4 = vpack.i.bf16 %v7124_v39, %v7122_v61 }
 0x1c0   :  { %v973_v5 = vpop.f32.mrf.mxu0  ;;  %5527 = vmatmul.mubr.msk.bf16.gmra.mxu0 %vm494_vm3, %v6331_v56  ;;  %v5968_v7 = vunpack.i.h.bf16 %v5966_v63  ;;  %v5967_v3 = vunpack.i.l.bf16 %v5966_v63 }
 0x1c1   :  { %v1537_v6 = vmax.f32 %v1413_v38, %v1289_v62  ;;  %v974_v11 = vadd.f32 %v6992_v54, %v973_v5  ;;  %6040 = vrot.lane.b32.xlu1 %v6039_v4, %s6410_s21  ;;  %5530 = vmatprep.mubr.msk.bf16.mxu0 %vm6408_vm2, %v6406_v0  ;;  %v1414_v13 = vmax.f32 %v1288_v46, %v1289_v62 }
 0x1c2   :  { %v5432_v12 = vpop.f32.mrf.mxu0  ;;  %v2413_v25 = vsel %vm1602_vm4, %v6868_v58, %v5968_v7  ;;  %v2412_v26 = vsel %vm1602_vm4, %v6842_v20, %v5967_v3  ;;  %v1817_v48 = vld [vmem:[#allocation2 + $0x1c8] sm:$0xff] }
 0x1c3   :  { %1662 = vst.msk [vmem:[#allocation2 + $0x1d8] sm:$0xff] %vm1602_vm4, %v1537_v6  ;;  %v1290_v34 = vmax.f32 %v974_v11, 0.0  ;;  %v5971_v16 = vpop.permute.xlu1 %5970 }
 0x1c4   :  { %v5973_v17 = vunpack.i.h.bf16 %v5971_v16  ;;  %v5972_v18 = vunpack.i.l.bf16 %v5971_v16  ;;  %v976_v21 = vpop.f32.mrf.mxu0  ;;  %v6334_v16 = vld [vmem:[%s8302_s0 + $0x1d0] sm:$0xff]  }
 0x1c5   :  { %v1538_v27 = vmax.f32 %v1414_v13, %v1290_v34  ;;  %v977_v30 = vadd.f32 %v6992_v54, %v976_v21  ;;  %v1415_v41 = vmax.f32 %v1289_v62, %v1290_v34 }
 0x1c6   :  { %v2475_v31 = vsel %vm2461_vm6, %v2413_v25, %v5973_v17  ;;  %v2474_v33 = vsel %vm2461_vm6, %v2412_v26, %v5972_v18  ;;  %v5433_v40 = vpop.f32.mrf.mxu0  ;;  %v7159_v55 = vld [vmem:[#allocation2 + $0x1d0] sm:$0xff] }
 0x1c7   :  { %1663 = vst.msk [vmem:[#allocation2 + $0x1e0] sm:$0xff] %vm1602_vm4, %v1538_v27  ;;  %v2529_v42 = vpack.c.bf16 %v2475_v31, %v2474_v33  ;;  %v1291_v43 = vmax.f32 %v977_v30, 0.0 }
 0x1c8   :  { %v981_v44 = vpop.f32.mrf.mxu0  ;;  %5531 = vmatmul.mubr.msk.bf16.gmra.mxu0 %vm494_vm3, %v6332_v24 }
 0x1c9   :  { %v1539_v58 = vmax.f32 %v1415_v41, %v1291_v43  ;;  %v982_v45 = vadd.f32 %v6992_v54, %v981_v44  ;;  %5587 = vmatmul.mubr.msk.bf16.gmra.mxu1 %vm2576_vm7, %v2529_v42  ;;  %5534 = vmatprep.mubr.msk.bf16.mxu0 %vm6408_vm2, %v6406_v0  ;;  %v1416_v50 = vmax.f32 %v1290_v34, %v1291_v43 }
 0x1ca   :  { %v5436_v20 = vpop.f32.mrf.mxu0  ;;  %v1818_v49 = vld [vmem:[#allocation2 + $0x1d8] sm:$0xff]  ;;  %5590 = vmatprep.mubr.msk.bf16.mxu1 %vm6408_vm2, %v6406_v0 }
 0x1cb   :  { %1664 = vst.msk [vmem:[#allocation2 + $0x1e8] sm:$0xff] %vm1602_vm4, %v1539_v58  ;;  %v1292_v19 = vmax.f32 %v982_v45, 0.0  ;;  %v6044_v51 = vpack.i.bf16 %v1818_v49, %v1817_v48  ;;  %v6335_v48 = vld [vmem:[%s8302_s0 + $0x1d8] sm:$0xff]  }
 0x1cc   :  { %v984_v47 = vpop.f32.mrf.mxu0 }
 0x1cd   :  { %v1540_v52 = vmax.f32 %v1416_v50, %v1292_v19  ;;  %v985_v53 = vadd.f32 %v6992_v54, %v984_v47  ;;  %6045 = vrot.lane.b32.xlu0 %v6044_v51, %s6409_s20  ;;  %v1417_v56 = vmax.f32 %v1291_v43, %v1292_v19 }
 0x1ce   :  { %v5437_v46 = vpop.f32.mrf.mxu0  ;;  %v7161_v10 = vld [vmem:[#allocation2 + $0x1e0] sm:$0xff] }
 0x1cf   :  { %1665 = vst.msk [vmem:[#allocation2 + $0x1f0] sm:$0xff] %vm1602_vm4, %v1540_v52  ;;  %v1293_v57 = vmax.f32 %v985_v53, 0.0  ;;  %v5976_v60 = vpop.permute.xlu0 %5975  ;;  %v6049_v9 = vpack.i.bf16 %v7161_v10, %v7159_v55 }
 0x1d0   :  { %v989_v38 = vpop.f32.mrf.mxu0  ;;  %5535 = vmatmul.mubr.msk.bf16.gmra.mxu0 %vm494_vm3, %v6333_v32  ;;  %v5978_v63 = vunpack.i.h.bf16 %v5976_v60  ;;  %v5977_v4 = vunpack.i.l.bf16 %v5976_v60 }
 0x1d1   :  { %v1541_v62 = vmax.f32 %v1417_v56, %v1293_v57  ;;  %v990_v5 = vadd.f32 %v6992_v54, %v989_v38  ;;  %6050 = vrot.lane.b32.xlu1 %v6049_v9, %s6410_s21  ;;  %5538 = vmatprep.mubr.msk.bf16.mxu0 %vm6408_vm2, %v6406_v0  ;;  %v1418_v7 = vmax.f32 %v1292_v19, %v1293_v57 }
 0x1d2   :  { %v5440_v6 = vpop.f32.mrf.mxu0  ;;  %v2415_v17 = vsel %vm1602_vm4, %v6896_v36, %v5978_v63  ;;  %v2414_v18 = vsel %vm1602_vm4, %v6870_v59, %v5977_v4  ;;  %v1819_v42 = vld [vmem:[#allocation2 + $0x1e8] sm:$0xff] }
 0x1d3   :  { %1666 = vst.msk [vmem:[#allocation2 + $0x1f8] sm:$0xff] %vm1602_vm4, %v1541_v62  ;;  %v1294_v3 = vmax.f32 %v990_v5, 0.0  ;;  %v5981_v11 = vpop.permute.xlu1 %5980 }
 0x1d4   :  { %v5983_v12 = vunpack.i.h.bf16 %v5981_v11  ;;  %v5982_v13 = vunpack.i.l.bf16 %v5981_v11  ;;  %v992_v34 = vpop.f32.mrf.mxu0  ;;  %v6336_v11 = vld [vmem:[%s8302_s0 + $0x1e0] sm:$0xff]  }
 0x1d5   :  { %v1542_v21 = vmax.f32 %v1418_v7, %v1294_v3  ;;  %v993_v24 = vadd.f32 %v6992_v54, %v992_v34  ;;  %v1419_v30 = vmax.f32 %v1293_v57, %v1294_v3 }
 0x1d6   :  { %v2477_v25 = vsel %vm2461_vm6, %v2415_v17, %v5983_v12  ;;  %v2476_v26 = vsel %vm2461_vm6, %v2414_v18, %v5982_v13  ;;  %v5441_v27 = vpop.f32.mrf.mxu0  ;;  %v7196_v51 = vld [vmem:[#allocation2 + $0x1f0] sm:$0xff] }
 0x1d7   :  { %1667 = vst.msk [vmem:[#allocation2 + $0x200] sm:$0xff] %vm1602_vm4, %v1542_v21  ;;  %v2530_v31 = vpack.c.bf16 %v2477_v25, %v2476_v26  ;;  %v1295_v33 = vmax.f32 %v993_v24, 0.0 }
 0x1d8   :  { %v997_v40 = vpop.f32.mrf.mxu0  ;;  %5539 = vmatmul.mubr.msk.bf16.gmra.mxu0 %vm494_vm3, %v6334_v16 }
 0x1d9   :  { %v1543_v36 = vmax.f32 %v1419_v30, %v1295_v33  ;;  %v998_v41 = vadd.f32 %v6992_v54, %v997_v40  ;;  %5591 = vmatmul.mubr.msk.bf16.gmra.mxu1 %vm2576_vm7, %v2530_v31  ;;  %5542 = vmatprep.mubr.msk.bf16.mxu0 %vm6408_vm2, %v6406_v0  ;;  %v1420_v44 = vmax.f32 %v1294_v3, %v1295_v33 }
 0x1da   :  { %v5444_v59 = vpop.f32.mrf.mxu0  ;;  %v1820_v43 = vld [vmem:[#allocation2 + $0x1f8] sm:$0xff]  ;;  %5594 = vmatprep.mubr.msk.bf16.mxu1 %vm6408_vm2, %v6406_v0 }
 0x1db   :  { %1668 = vst.msk [vmem:[#allocation2 + $0x208] sm:$0xff] %vm1602_vm4, %v1543_v36  ;;  %v1296_v58 = vmax.f32 %v998_v41, 0.0  ;;  %v6054_v45 = vpack.i.bf16 %v1820_v43, %v1819_v42  ;;  %v6337_v42 = vld [vmem:[%s8302_s0 + $0x1e8] sm:$0xff]  }
 0x1dc   :  { %v1000_v20 = vpop.f32.mrf.mxu0 }
 0x1dd   :  { %v1544_v49 = vmax.f32 %v1420_v44, %v1296_v58  ;;  %v1001_v50 = vadd.f32 %v6992_v54, %v1000_v20  ;;  %6055 = vrot.lane.b32.xlu0 %v6054_v45, %s6409_s20  ;;  %v1421_v32 = vmax.f32 %v1295_v33, %v1296_v58 }
 0x1de   :  { %v5445_v19 = vpop.f32.mrf.mxu0  ;;  %v7198_v47 = vld [vmem:[#allocation2 + $0x200] sm:$0xff] }
 0x1df   :  { %1669 = vst.msk [vmem:[#allocation2 + $0x210] sm:$0xff] %vm1602_vm4, %v1544_v49  ;;  %v1297_v52 = vmax.f32 %v1001_v50, 0.0  ;;  %v5986_v53 = vpop.permute.xlu0 %5985  ;;  %v6059_v46 = vpack.i.bf16 %v7198_v47, %v7196_v51 }
 0x1e0   :  { %v1005_v56 = vpop.f32.mrf.mxu0  ;;  %5543 = vmatmul.mubr.msk.bf16.gmra.mxu0 %vm494_vm3, %v6335_v48  ;;  %v5988_v60 = vunpack.i.h.bf16 %v5986_v53  ;;  %v5987_v9 = vunpack.i.l.bf16 %v5986_v53 }
 0x1e1   :  { %v1545_v57 = vmax.f32 %v1421_v32, %v1297_v52  ;;  %v1006_v38 = vadd.f32 %v6992_v54, %v1005_v56  ;;  %6060 = vrot.lane.b32.xlu1 %v6059_v46, %s6410_s21  ;;  %5546 = vmatprep.mubr.msk.bf16.mxu0 %vm6408_vm2, %v6406_v0  ;;  %v1422_v63 = vmax.f32 %v1296_v58, %v1297_v52 }
 0x1e2   :  { %v5448_v62 = vpop.f32.mrf.mxu0  ;;  %v2417_v12 = vsel %vm1602_vm4, %v6932_v28, %v5988_v60  ;;  %v2416_v13 = vsel %vm1602_vm4, %v6898_v37, %v5987_v9  ;;  %v1821_v31 = vld [vmem:[#allocation2 + $0x208] sm:$0xff] }
 0x1e3   :  { %1670 = vst.msk [vmem:[#allocation2 + $0x218] sm:$0xff] %vm1602_vm4, %v1545_v57  ;;  %v1298_v4 = vmax.f32 %v1006_v38, 0.0  ;;  %v5991_v5 = vpop.permute.xlu1 %5990 }
 0x1e4   :  { %v5993_v6 = vunpack.i.h.bf16 %v5991_v5  ;;  %v5992_v7 = vunpack.i.l.bf16 %v5991_v5  ;;  %v1008_v3 = vpop.f32.mrf.mxu0  ;;  %v6338_v5 = vld [vmem:[%s8302_s0 + $0x1f0] sm:$0xff]  }
 0x1e5   :  { %v1546_v34 = vmax.f32 %v1422_v63, %v1298_v4  ;;  %v1009_v16 = vadd.f32 %v6992_v54, %v1008_v3  ;;  %v1423_v24 = vmax.f32 %v1297_v52, %v1298_v4 }
 0x1e6   :  { %v2479_v17 = vsel %vm2461_vm6, %v2417_v12, %v5993_v6  ;;  %v2478_v18 = vsel %vm2461_vm6, %v2416_v13, %v5992_v7  ;;  %v5449_v21 = vpop.f32.mrf.mxu0  ;;  %v7233_v45 = vld [vmem:[#allocation2 + $0x210] sm:$0xff] }
 0x1e7   :  { %1671 = vst.msk [vmem:[#allocation2 + $0x220] sm:$0xff] %vm1602_vm4, %v1546_v34  ;;  %v2531_v25 = vpack.c.bf16 %v2479_v17, %v2478_v18  ;;  %v1299_v26 = vmax.f32 %v1009_v16, 0.0 }
 0x1e8   :  { %v1013_v27 = vpop.f32.mrf.mxu0  ;;  %5547 = vmatmul.mubr.msk.bf16.gmra.mxu0 %vm494_vm3, %v6336_v11 }
 0x1e9   :  { %v1547_v28 = vmax.f32 %v1423_v24, %v1299_v26  ;;  %v1014_v30 = vadd.f32 %v6992_v54, %v1013_v27  ;;  %5595 = vmatmul.mubr.msk.bf16.gmra.mxu1 %vm2576_vm7, %v2531_v25  ;;  %5550 = vmatprep.mubr.msk.bf16.mxu0 %vm6408_vm2, %v6406_v0  ;;  %v1424_v40 = vmax.f32 %v1298_v4, %v1299_v26 }
 0x1ea   :  { %v5452_v37 = vpop.f32.mrf.mxu0  ;;  %v1822_v33 = vld [vmem:[#allocation2 + $0x218] sm:$0xff]  ;;  %5598 = vmatprep.mubr.msk.bf16.mxu1 %vm6408_vm2, %v6406_v0 }
 0x1eb   :  { %1672 = vst.msk [vmem:[#allocation2 + $0x228] sm:$0xff] %vm1602_vm4, %v1547_v28  ;;  %v1300_v36 = vmax.f32 %v1014_v30, 0.0  ;;  %v6064_v41 = vpack.i.bf16 %v1822_v33, %v1821_v31 }
 0x1ec   :  { %v1016_v59 = vpop.f32.mrf.mxu0 }
 0x1ed   :  { %v1548_v43 = vmax.f32 %v1424_v40, %v1300_v36  ;;  %v1017_v44 = vadd.f32 %v6992_v54, %v1016_v59  ;;  %6065 = vrot.lane.b32.xlu0 %v6064_v41, %s6409_s20  ;;  %v1425_v48 = vmax.f32 %v1299_v26, %v1300_v36 }
 0x1ee   :  { %v5453_v58 = vpop.f32.mrf.mxu0  ;;  %v7235_v20 = vld [vmem:[#allocation2 + $0x220] sm:$0xff] }
 0x1ef   :  { %1673 = vst.msk [vmem:[#allocation2 + $0x230] sm:$0xff] %vm1602_vm4, %v1548_v43  ;;  %v1301_v49 = vmax.f32 %v1017_v44, 0.0  ;;  %v5996_v50 = vpop.permute.xlu0 %5995  ;;  %v6069_v19 = vpack.i.bf16 %v7235_v20, %v7233_v45 }
 0x1f0   :  { %v1021_v32 = vpop.f32.mrf.mxu0  ;;  %5551 = vmatmul.mubr.msk.bf16.gmra.mxu0 %vm494_vm3, %v6337_v42  ;;  %v5998_v53 = vunpack.i.h.bf16 %v5996_v50  ;;  %v5997_v46 = vunpack.i.l.bf16 %v5996_v50 }
 0x1f1   :  { %v1549_v52 = vmax.f32 %v1425_v48, %v1301_v49  ;;  %v1022_v56 = vadd.f32 %v6992_v54, %v1021_v32  ;;  %6070 = vrot.lane.b32.xlu1 %v6069_v19, %s6410_s21  ;;  %5554 = vmatprep.mubr.msk.bf16.mxu0 %vm6408_vm2, %v6406_v0  ;;  %v1426_v60 = vmax.f32 %v1300_v36, %v1301_v49 }
 0x1f2   :  { %v5456_v57 = vpop.f32.mrf.mxu0  ;;  %v2419_v6 = vsel %vm1602_vm4, %v6969_v22, %v5998_v53  ;;  %v2418_v7 = vsel %vm1602_vm4, %v6934_v29, %v5997_v46  ;;  %v1823_v25 = vld [vmem:[#allocation2 + $0x228] sm:$0xff] }
 0x1f3   :  { %1674 = vst.msk [vmem:[#allocation2 + $0x238] sm:$0xff] %vm1602_vm4, %v1549_v52  ;;  %v1302_v9 = vmax.f32 %v1022_v56, 0.0  ;;  %v6001_v38 = vpop.permute.xlu1 %6000 }
 0x1f4   :  { %v6003_v62 = vunpack.i.h.bf16 %v6001_v38  ;;  %v6002_v63 = vunpack.i.l.bf16 %v6001_v38  ;;  %v1024_v4 = vpop.f32.mrf.mxu0 }
 0x1f5   :  { %v1550_v3 = vmax.f32 %v1426_v60, %v1302_v9  ;;  %v1025_v11 = vadd.f32 %v6992_v54, %v1024_v4  ;;  %v1427_v16 = vmax.f32 %v1301_v49, %v1302_v9 }
 0x1f6   :  { %v2481_v12 = vsel %vm2461_vm6, %v2419_v6, %v6003_v62  ;;  %v2480_v13 = vsel %vm2461_vm6, %v2418_v7, %v6002_v63  ;;  %v5457_v34 = vpop.f32.mrf.mxu0  ;;  %v7267_v36 = vld [vmem:[#allocation2 + $0x230] sm:$0xff] }
 0x1f7   :  { %1675 = vst.msk [vmem:[#allocation2 + $0x240] sm:$0xff] %vm1602_vm4, %v1550_v3  ;;  %v2532_v17 = vpack.c.bf16 %v2481_v12, %v2480_v13  ;;  %v1303_v18 = vmax.f32 %v1025_v11, 0.0 }
 0x1f8   :  { %v1029_v21 = vpop.f32.mrf.mxu0  ;;  %5555 = vmatmul.mubr.msk.bf16.gmra.mxu0 %vm494_vm3, %v6338_v5 }
 0x1f9   :  { %v1551_v22 = vmax.f32 %v1427_v16, %v1303_v18  ;;  %v1030_v24 = vadd.f32 %v6992_v54, %v1029_v21  ;;  %5599 = vmatmul.mubr.msk.bf16.gmra.mxu1 %vm2576_vm7, %v2532_v17  ;;  %5894 = vmatprep.mubr.msk.bf16.mxu0 %vm6408_vm2, %v6406_v0  ;;  %v1428_v27 = vmax.f32 %v1302_v9, %v1303_v18 }
 0x1fa   :  { %v5460_v29 = vpop.f32.mrf.mxu0  ;;  %v1824_v26 = vld [vmem:[#allocation2 + $0x238] sm:$0xff]  ;;  %5602 = vmatprep.mubr.msk.bf16.mxu1 %vm6408_vm2, %v6406_v0 }
 0x1fb   :  { %1676 = vst.msk [vmem:[#allocation2 + $0x248] sm:$0xff] %vm1602_vm4, %v1551_v22  ;;  %v1304_v28 = vmax.f32 %v1030_v24, 0.0  ;;  %v6074_v30 = vpack.i.bf16 %v1824_v26, %v1823_v25 }
 0x1fc   :  { %v1032_v37 = vpop.f32.mrf.mxu0 }
 0x1fd   :  { %v1552_v31 = vmax.f32 %v1428_v27, %v1304_v28  ;;  %v1033_v33 = vadd.f32 %v6992_v54, %v1032_v37  ;;  %6075 = vrot.lane.b32.xlu0 %v6074_v30, %s6409_s20  ;;  %v1429_v59 = vmax.f32 %v1303_v18, %v1304_v28 }
 0x1fe   :  { %v5461_v40 = vpop.f32.mrf.mxu0  ;;  %v7269_v41 = vld [vmem:[#allocation2 + $0x240] sm:$0xff] }
 0x1ff   :  { %1677 = vst.msk [vmem:[#allocation2 + $0x250] sm:$0xff] %vm1602_vm4, %v1552_v31  ;;  %v1305_v42 = vmax.f32 %v1033_v33, 0.0  ;;  %v6006_v43 = vpop.permute.xlu0 %6005  ;;  %v6079_v44 = vpack.i.bf16 %v7269_v41, %v7267_v36 }
 0x200   :  { %v1037_v58 = vpop.f32.mrf.mxu0  ;;  %v6008_v49 = vunpack.i.h.bf16 %v6006_v43  ;;  %v6007_v50 = vunpack.i.l.bf16 %v6006_v43 }
 0x201   :  { %v1553_v48 = vmax.f32 %v1429_v59, %v1305_v42  ;;  %v1038_v19 = vadd.f32 %v6992_v54, %v1037_v58  ;;  %6080 = vrot.lane.b32.xlu1 %v6079_v44, %s6410_s21  ;;  %v1430_v52 = vmax.f32 %v1304_v28, %v1305_v42 }
 0x202   :  { %v5464_v32 = vpop.f32.mrf.mxu0  ;;  %v2421_v9 = vsel %vm1602_vm4, %v7011_v14, %v6008_v49  ;;  %v2420_v38 = vsel %vm1602_vm4, %v6971_v23, %v6007_v50  ;;  %v1825_v34 = vld [vmem:[#allocation2 + $0x248] sm:$0xff] }
 0x203   :  { %1678 = vst.msk [vmem:[#allocation2 + $0x258] sm:$0xff] %vm1602_vm4, %v1553_v48  ;;  %v1306_v53 = vmax.f32 %v1038_v19, 0.0  ;;  %v6011_v46 = vpop.permute.xlu1 %6010 }
 0x204   :  { %v6013_v56 = vunpack.i.h.bf16 %v6011_v46  ;;  %v6012_v57 = vunpack.i.l.bf16 %v6011_v46  ;;  %v1040_v60 = vpop.f32.mrf.mxu0 }
 0x205   :  { %v1554_v62 = vmax.f32 %v1430_v52, %v1306_v53  ;;  %v1041_v63 = vadd.f32 %v6992_v54, %v1040_v60  ;;  %v1431_v7 = vmax.f32 %v1305_v42, %v1306_v53 }
 0x206   :  { %v2483_v4 = vsel %vm2461_vm6, %v2421_v9, %v6013_v56  ;;  %v2482_v5 = vsel %vm2461_vm6, %v2420_v38, %v6012_v57  ;;  %v5465_v6 = vpop.f32.mrf.mxu0  ;;  %v7292_v26 = vld [vmem:[#allocation2 + $0x250] sm:$0xff] }
 0x207   :  { %1679 = vst.msk [vmem:[#allocation2 + $0x260] sm:$0xff] %vm1602_vm4, %v1554_v62  ;;  %v2533_v3 = vpack.c.bf16 %v2483_v4, %v2482_v5  ;;  %v1307_v11 = vmax.f32 %v1041_v63, 0.0 }
 0x208   :  { %v1045_v12 = vpop.f32.mrf.mxu0 }
 0x209   :  { %v1555_v13 = vmax.f32 %v1431_v7, %v1307_v11  ;;  %v1046_v14 = vadd.f32 %v6992_v54, %v1045_v12  ;;  %5603 = vmatmul.mubr.msk.bf16.gmra.mxu1 %vm2576_vm7, %v2533_v3  ;;  %v1432_v17 = vmax.f32 %v1306_v53, %v1307_v11 }
 0x20a   :  { %v5468_v23 = vpop.f32.mrf.mxu0  ;;  %v1826_v16 = vld [vmem:[#allocation2 + $0x258] sm:$0xff]  ;;  %5606 = vmatprep.mubr.msk.bf16.mxu1 %vm6408_vm2, %v6406_v0 }
 0x20b   :  { %1680 = vst.msk [vmem:[#allocation2 + $0x268] sm:$0xff] %vm1602_vm4, %v1555_v13  ;;  %v1308_v18 = vmax.f32 %v1046_v14, 0.0  ;;  %v6084_v21 = vpack.i.bf16 %v1826_v16, %v1825_v34 }
 0x20c   :  { %v1048_v22 = vpop.f32.mrf.mxu0 }
 0x20d   :  { %v1556_v24 = vmax.f32 %v1432_v17, %v1308_v18  ;;  %v1049_v29 = vadd.f32 %v6992_v54, %v1048_v22  ;;  %6085 = vrot.lane.b32.xlu0 %v6084_v21, %s6409_s20  ;;  %v1433_v28 = vmax.f32 %v1307_v11, %v1308_v18 }
 0x20e   :  { %v5469_v25 = vpop.f32.mrf.mxu0  ;;  %v1888_v27 = vld [vmem:[#allocation2 + $0x260] sm:$0xff] }
 0x20f   :  { %1681 = vst.msk [vmem:[#allocation2 + $0x270] sm:$0xff] %vm1602_vm4, %v1556_v24  ;;  %v1309_v30 = vmax.f32 %v1049_v29, 0.0  ;;  %v6016_v37 = vpop.permute.xlu0 %6015  ;;  %v6089_v31 = vpack.i.bf16 %v1888_v27, %v7292_v26 }
 0x210   :  { %v1053_v33 = vpop.f32.mrf.mxu0  ;;  %v6018_v59 = vunpack.i.h.bf16 %v6016_v37  ;;  %v6017_v42 = vunpack.i.l.bf16 %v6016_v37 }
 0x211   :  { %v1557_v40 = vmax.f32 %v1433_v28, %v1309_v30  ;;  %v1054_v43 = vadd.f32 %v6992_v54, %v1053_v33  ;;  %6090 = vrot.lane.b32.xlu1 %v6089_v31, %s6410_s21  ;;  %v1434_v58 = vmax.f32 %v1308_v18, %v1309_v30 }
 0x212   :  { %v5472_v44 = vpop.f32.mrf.mxu0  ;;  %v2423_v52 = vsel %vm1602_vm4, %v7048_v8, %v6018_v59  ;;  %v2422_v53 = vsel %vm1602_vm4, %v7013_v15, %v6017_v42  ;;  %v1827_v6 = vld [vmem:[#allocation2 + $0x268] sm:$0xff] }
 0x213   :  { %1682 = vst.msk [vmem:[#allocation2 + $0x278] sm:$0xff] %vm1602_vm4, %v1557_v40  ;;  %v1310_v48 = vmax.f32 %v1054_v43, 0.0  ;;  %v6021_v49 = vpop.permute.xlu1 %6020 }
 0x214   :  { %v6023_v50 = vunpack.i.h.bf16 %v6021_v49  ;;  %v6022_v19 = vunpack.i.l.bf16 %v6021_v49  ;;  %v1056_v32 = vpop.f32.mrf.mxu0 }
 0x215   :  { %v1558_v46 = vmax.f32 %v1434_v58, %v1310_v48  ;;  %v1057_v56 = vadd.f32 %v6992_v54, %v1056_v32  ;;  %v1435_v38 = vmax.f32 %v1309_v30, %v1310_v48 }
 0x216   :  { %v2485_v57 = vsel %vm2461_vm6, %v2423_v52, %v6023_v50  ;;  %v2484_v60 = vsel %vm2461_vm6, %v2422_v53, %v6022_v19  ;;  %v5473_v9 = vpop.f32.mrf.mxu0  ;;  %v7314_v16 = vld [vmem:[#allocation2 + $0x270] sm:$0xff] }
 0x217   :  { %1683 = vst.msk [vmem:[#allocation2 + $0x280] sm:$0xff] %vm1602_vm4, %v1558_v46  ;;  %v2534_v62 = vpack.c.bf16 %v2485_v57, %v2484_v60  ;;  %v1311_v63 = vmax.f32 %v1057_v56, 0.0 }
 0x218   :  { %v1061_v4 = vpop.f32.mrf.mxu0 }
 0x219   :  { %v1559_v5 = vmax.f32 %v1435_v38, %v1311_v63  ;;  %v1062_v8 = vadd.f32 %v6992_v54, %v1061_v4  ;;  %5607 = vmatmul.mubr.msk.bf16.gmra.mxu1 %vm2576_vm7, %v2534_v62  ;;  %v1436_v3 = vmax.f32 %v1310_v48, %v1311_v63 }
 0x21a   :  { %v5476_v15 = vpop.f32.mrf.mxu0  ;;  %v1828_v7 = vld [vmem:[#allocation2 + $0x278] sm:$0xff]  ;;  %5610 = vmatprep.mubr.msk.bf16.mxu1 %vm6408_vm2, %v6406_v0 }
 0x21b   :  { %1684 = vst.msk [vmem:[#allocation2 + $0x288] sm:$0xff] %vm1602_vm4, %v1559_v5  ;;  %v1312_v11 = vmax.f32 %v1062_v8, 0.0  ;;  %v6094_v12 = vpack.i.bf16 %v1828_v7, %v1827_v6 }
 0x21c   :  { %v1064_v13 = vpop.f32.mrf.mxu0 }
 0x21d   :  { %v1560_v14 = vmax.f32 %v1436_v3, %v1312_v11  ;;  %v1065_v23 = vadd.f32 %v6992_v54, %v1064_v13  ;;  %6095 = vrot.lane.b32.xlu0 %v6094_v12, %s6409_s20  ;;  %v1437_v18 = vmax.f32 %v1311_v63, %v1312_v11  ;;  %v7321_v54 = vld [vmem:[%s8303_s2] ss:$0 sm:$0xff] }
 0x21e   :  { %v5477_v34 = vpop.f32.mrf.mxu0  ;;  %v1890_v17 = vld [vmem:[#allocation2 + $0x280] sm:$0xff] }
 0x21f   :  { %1685 = vst.msk [vmem:[#allocation2 + $0x290] sm:$0xff] %vm1602_vm4, %v1560_v14  ;;  %v1313_v21 = vmax.f32 %v1065_v23, 0.0  ;;  %v6026_v22 = vpop.permute.xlu0 %6025  ;;  %v6099_v24 = vpack.i.bf16 %v1890_v17, %v7314_v16 }
 0x220   :  { %v1069_v29 = vpop.f32.mrf.mxu0  ;;  %v6028_v27 = vunpack.i.h.bf16 %v6026_v22  ;;  %v6027_v28 = vunpack.i.l.bf16 %v6026_v22 }
 0x221   :  { %v1561_v25 = vmax.f32 %v1437_v18, %v1313_v21  ;;  %v1070_v30 = vadd.f32 %v7321_v54, %v1069_v29  ;;  %6100 = vrot.lane.b32.xlu1 %v6099_v24, %s6410_s21  ;;  %v1438_v31 = vmax.f32 %v1312_v11, %v1313_v21 }
 0x222   :  { %v5480_v37 = vpop.f32.mrf.mxu0  ;;  %v2425_v44 = vsel %vm1602_vm4, %v7085_v1, %v6028_v27  ;;  %v2424_v58 = vsel %vm1602_vm4, %v7050_v35, %v6027_v28  ;;  %v7337_v1 = vld [vmem:[%s8305_s4] ss:$0 sm:$0xff]  ;;  %v1829_v62 = vld [vmem:[#allocation2 + $0x288] sm:$0xff] }
 0x223   :  { %1686 = vst.msk [vmem:[#allocation2 + $0x298] sm:$0xff] %vm1602_vm4, %v1561_v25  ;;  %v1314_v33 = vmax.f32 %v1070_v30, 0.0  ;;  %v6031_v40 = vpop.permute.xlu1 %6030 }
 0x224   :  { %v6033_v59 = vunpack.i.h.bf16 %v6031_v40  ;;  %v6032_v42 = vunpack.i.l.bf16 %v6031_v40  ;;  %v1072_v43 = vpop.f32.mrf.mxu0 }
 0x225   :  { %v1562_v48 = vmax.f32 %v1438_v31, %v1314_v33  ;;  %v1073_v49 = vadd.f32 %v7321_v54, %v1072_v43  ;;  %v1439_v52 = vmax.f32 %v1313_v21, %v1314_v33 }
 0x226   :  { %v2487_v50 = vsel %vm2461_vm6, %v2425_v44, %v6033_v59  ;;  %v2486_v19 = vsel %vm2461_vm6, %v2424_v58, %v6032_v42  ;;  %v5481_v32 = vpop.f32.mrf.mxu0  ;;  %v7349_v23 = vld [vmem:[#allocation2 + $0x290] sm:$0xff] }
 0x227   :  { %1687 = vst.msk [vmem:[#allocation2 + $0x2a0] sm:$0xff] %vm1602_vm4, %v1562_v48  ;;  %v2535_v53 = vpack.c.bf16 %v2487_v50, %v2486_v19  ;;  %v1315_v46 = vmax.f32 %v1073_v49, 0.0 }
 0x228   :  { %v1077_v56 = vpop.f32.mrf.mxu0 }
 0x229   :  { %v1563_v35 = vmax.f32 %v1439_v52, %v1315_v46  ;;  %v1078_v57 = vadd.f32 %v7321_v54, %v1077_v56  ;;  %v2708_v60 = vpop.f32.mrf.mxu1  ;;  %5611 = vmatmul.mubr.msk.bf16.gmra.mxu1 %vm2576_vm7, %v2535_v53  ;;  %v1440_v4 = vmax.f32 %v1314_v33, %v1315_v46 }
 0x22a   :  { %v2709_v9 = vadd.f32 %v7337_v1, %v2708_v60  ;;  %v5484_v38 = vpop.f32.mrf.mxu0  ;;  %v1830_v63 = vld [vmem:[#allocation2 + $0x298] sm:$0xff]  ;;  %5614 = vmatprep.mubr.msk.bf16.mxu1 %vm6408_vm2, %v6406_v0 }
 0x22b   :  { %1688 = vst.msk [vmem:[#allocation2 + $0x2a8] sm:$0xff] %vm1602_vm4, %v1563_v35  ;;  %v1316_v5 = vmax.f32 %v1078_v57, 0.0  ;;  %v5564_v8 = vpop.f32.mrf.mxu1  ;;  %v6104_v15 = vpack.i.bf16 %v1830_v63, %v1829_v62 }
 0x22c   :  { %v2954_v6 = vmax.f32 %v2709_v9, 0.0  ;;  %v1080_v7 = vpop.f32.mrf.mxu0 }
 0x22d   :  { %v1564_v3 = vmax.f32 %v1440_v4, %v1316_v5  ;;  %v1081_v11 = vadd.f32 %v7321_v54, %v1080_v7  ;;  %v2711_v12 = vpop.f32.mrf.mxu1  ;;  %6105 = vrot.lane.b32.xlu0 %v6104_v15, %s6409_s20  ;;  %v1441_v17 = vmax.f32 %v1315_v46, %v1316_v5 }
 0x22e   :  { %3015 = vst.msk [vmem:[#allocation3] sm:$0xff] %vm2461_vm6, %v2954_v6  ;;  %v2712_v13 = vadd.f32 %v7337_v1, %v2711_v12  ;;  %v5485_v14 = vpop.f32.mrf.mxu0  ;;  %v1892_v34 = vld [vmem:[#allocation2 + $0x2a0] sm:$0xff] }
 0x22f   :  { %1689 = vst.msk [vmem:[#allocation2 + $0x2b0] sm:$0xff] %vm1602_vm4, %v1564_v3  ;;  %v1317_v18 = vmax.f32 %v1081_v11, 0.0  ;;  %v5565_v21 = vpop.f32.mrf.mxu1  ;;  %v6036_v22 = vpop.permute.xlu0 %6035  ;;  %v6109_v24 = vpack.i.bf16 %v1892_v34, %v7349_v23 }
 0x230   :  { %v2955_v29 = vmax.f32 %v2712_v13, 0.0  ;;  %v1085_v25 = vpop.f32.mrf.mxu0  ;;  %v6038_v28 = vunpack.i.h.bf16 %v6036_v22  ;;  %v6037_v30 = vunpack.i.l.bf16 %v6036_v22 }
 0x231   :  { %v1565_v27 = vmax.f32 %v1441_v17, %v1317_v18  ;;  %v1086_v37 = vadd.f32 %v7321_v54, %v1085_v25  ;;  %6110 = vrot.lane.b32.xlu1 %v6109_v24, %s6410_s21  ;;  %v1442_v33 = vmax.f32 %v1316_v5, %v1317_v18 }
 0x232   :  { %3016 = vst.msk [vmem:[#allocation3 + $0x8] sm:$0xff] %vm2461_vm6, %v2955_v29  ;;  %v5488_v31 = vpop.f32.mrf.mxu0  ;;  %v2427_v58 = vsel %vm1602_vm4, %v7122_v61, %v6038_v28  ;;  %v2426_v48 = vsel %vm1602_vm4, %v7087_v2, %v6037_v30  ;;  %v1831_v38 = vld [vmem:[#allocation2 + $0x2a8] sm:$0xff] }
 0x233   :  { %1690 = vst.msk [vmem:[#allocation2 + $0x2b8] sm:$0xff] %vm1602_vm4, %v1565_v27  ;;  %v1318_v40 = vmax.f32 %v1086_v37, 0.0  ;;  %v6041_v59 = vpop.permute.xlu1 %6040 }
 0x234   :  { %v6043_v42 = vunpack.i.h.bf16 %v6041_v59  ;;  %v6042_v43 = vunpack.i.l.bf16 %v6041_v59  ;;  %v1088_v44 = vpop.f32.mrf.mxu0 }
 0x235   :  { %v1566_v49 = vmax.f32 %v1442_v33, %v1318_v40  ;;  %v1089_v50 = vadd.f32 %v7321_v54, %v1088_v44  ;;  %v1443_v53 = vmax.f32 %v1317_v18, %v1318_v40 }
 0x236   :  { %v2489_v19 = vsel %vm2461_vm6, %v2427_v58, %v6043_v42  ;;  %v2488_v32 = vsel %vm2461_vm6, %v2426_v48, %v6042_v43  ;;  %v5489_v52 = vpop.f32.mrf.mxu0  ;;  %v7375_v14 = vld [vmem:[#allocation2 + $0x2b0] sm:$0xff] }
 0x237   :  { %1691 = vst.msk [vmem:[#allocation2 + $0x2c0] sm:$0xff] %vm1602_vm4, %v1566_v49  ;;  %v2536_v46 = vpack.c.bf16 %v2489_v19, %v2488_v32  ;;  %v1319_v56 = vmax.f32 %v1089_v50, 0.0 }
 0x238   :  { %v1093_v35 = vpop.f32.mrf.mxu0 }
 0x239   :  { %v1567_v57 = vmax.f32 %v1443_v53, %v1319_v56  ;;  %v1094_v61 = vadd.f32 %v7321_v54, %v1093_v35  ;;  %v2716_v60 = vpop.f32.mrf.mxu1  ;;  %5615 = vmatmul.mubr.msk.bf16.gmra.mxu1 %vm2576_vm7, %v2536_v46  ;;  %v1444_v63 = vmax.f32 %v1318_v40, %v1319_v56  ;;  %v3107_v27 = vld [vmem:[#allocation3 + $0x8] sm:$0xff]  ;;  %v3076_v40 = vld [vmem:[#allocation3] sm:$0xff] }
 0x23a   :  { %v2717_v2 = vadd.f32 %v7337_v1, %v2716_v60  ;;  %v5492_v9 = vpop.f32.mrf.mxu0  ;;  %v1832_v62 = vld [vmem:[#allocation2 + $0x2b8] sm:$0xff]  ;;  %5618 = vmatprep.mubr.msk.bf16.mxu1 %vm6408_vm2, %v6406_v0  ;;  %v3137_v44 = vmax.f32 %v3076_v40, %v3107_v27 }
 0x23b   :  { %1692 = vst.msk [vmem:[#allocation2 + $0x2c8] sm:$0xff] %vm1602_vm4, %v1567_v57  ;;  %v1320_v4 = vmax.f32 %v1094_v61, 0.0  ;;  %v5568_v5 = vpop.f32.mrf.mxu1  ;;  %v6114_v8 = vpack.i.bf16 %v1832_v62, %v1831_v38 }
 0x23c   :  { %v2956_v15 = vmax.f32 %v2717_v2, 0.0  ;;  %v1096_v6 = vpop.f32.mrf.mxu0 }
 0x23d   :  { %v1568_v7 = vmax.f32 %v1444_v63, %v1320_v4  ;;  %v1097_v3 = vadd.f32 %v7321_v54, %v1096_v6  ;;  %v2719_v11 = vpop.f32.mrf.mxu1  ;;  %6115 = vrot.lane.b32.xlu0 %v6114_v8, %s6409_s20  ;;  %v1445_v17 = vmax.f32 %v1319_v56, %v1320_v4 }
 0x23e   :  { %3017 = vst.msk [vmem:[#allocation3 + $0x10] sm:$0xff] %vm2461_vm6, %v2956_v15  ;;  %v2720_v12 = vadd.f32 %v7337_v1, %v2719_v11  ;;  %v5493_v13 = vpop.f32.mrf.mxu0  ;;  %v1894_v34 = vld [vmem:[#allocation2 + $0x2c0] sm:$0xff] }
 0x23f   :  { %1693 = vst.msk [vmem:[#allocation2 + $0x2d0] sm:$0xff] %vm1602_vm4, %v1568_v7  ;;  %v1321_v18 = vmax.f32 %v1097_v3, 0.0  ;;  %v5569_v21 = vpop.f32.mrf.mxu1  ;;  %v6046_v22 = vpop.permute.xlu0 %6045  ;;  %v6119_v24 = vpack.i.bf16 %v1894_v34, %v7375_v14 }
 0x240   :  { %v2957_v29 = vmax.f32 %v2720_v12, 0.0  ;;  %v1101_v25 = vpop.f32.mrf.mxu0  ;;  %v6048_v30 = vunpack.i.h.bf16 %v6046_v22  ;;  %v6047_v37 = vunpack.i.l.bf16 %v6046_v22 }
 0x241   :  { %v1569_v28 = vmax.f32 %v1445_v17, %v1321_v18  ;;  %v1102_v31 = vadd.f32 %v7321_v54, %v1101_v25  ;;  %6120 = vrot.lane.b32.xlu1 %v6119_v24, %s6410_s21  ;;  %v1446_v59 = vmax.f32 %v1320_v4, %v1321_v18 }
 0x242   :  { %3018 = vst.msk [vmem:[#allocation3 + $0x18] sm:$0xff] %vm2461_vm6, %v2957_v29  ;;  %v5496_v33 = vpop.f32.mrf.mxu0  ;;  %v2429_v19 = vsel %vm1602_vm4, %v7159_v55, %v6048_v30  ;;  %v2428_v32 = vsel %vm1602_vm4, %v7124_v39, %v6047_v37  ;;  %v1833_v4 = vld [vmem:[#allocation2 + $0x2c8] sm:$0xff] }
 0x243   :  { %1694 = vst.msk [vmem:[#allocation2 + $0x2d8] sm:$0xff] %vm1602_vm4, %v1569_v28  ;;  %v1322_v42 = vmax.f32 %v1102_v31, 0.0  ;;  %v6051_v43 = vpop.permute.xlu1 %6050 }
 0x244   :  { %v6053_v58 = vunpack.i.h.bf16 %v6051_v43  ;;  %v6052_v48 = vunpack.i.l.bf16 %v6051_v43  ;;  %v1104_v49 = vpop.f32.mrf.mxu0 }
 0x245   :  { %v7383_v50 = vld [vmem:[#allocation3 + $0x10] sm:$0xff]  ;;  %v1570_v52 = vmax.f32 %v1446_v59, %v1322_v42  ;;  %v1105_v53 = vadd.f32 %v7321_v54, %v1104_v49  ;;  %v1447_v61 = vmax.f32 %v1321_v18, %v1322_v42 }
 0x246   :  { %v3198_v46 = vmax.f32 %v3137_v44, %v7383_v50  ;;  %v2491_v56 = vsel %vm2461_vm6, %v2429_v19, %v6053_v58  ;;  %v2490_v35 = vsel %vm2461_vm6, %v2428_v32, %v6052_v48  ;;  %v5497_v57 = vpop.f32.mrf.mxu0  ;;  %v7405_v21 = vld [vmem:[#allocation2 + $0x2d0] sm:$0xff] }
 0x247   :  { %1695 = vst.msk [vmem:[#allocation2 + $0x2e0] sm:$0xff] %vm1602_vm4, %v1570_v52  ;;  %v2537_v60 = vpack.c.bf16 %v2491_v56, %v2490_v35  ;;  %v1323_v2 = vmax.f32 %v1105_v53, 0.0 }
 0x248   :  { %3228 = vst.msk [vmem:[#allocation4] sm:$0xff] %vm2461_vm6, %v3198_v46  ;;  %v1109_v55 = vpop.f32.mrf.mxu0 }
 0x249   :  { %v1571_v9 = vmax.f32 %v1447_v61, %v1323_v2  ;;  %v1110_v39 = vadd.f32 %v7321_v54, %v1109_v55  ;;  %v2724_v38 = vpop.f32.mrf.mxu1  ;;  %5619 = vmatmul.mubr.msk.bf16.gmra.mxu1 %vm2576_vm7, %v2537_v60  ;;  %v1448_v8 = vmax.f32 %v1322_v42, %v1323_v2  ;;  %v3108_v31 = vld [vmem:[#allocation3 + $0x18] sm:$0xff] }
 0x24a   :  { %v2725_v62 = vadd.f32 %v7337_v1, %v2724_v38  ;;  %v5500_v63 = vpop.f32.mrf.mxu0  ;;  %v1834_v5 = vld [vmem:[#allocation2 + $0x2d8] sm:$0xff]  ;;  %5622 = vmatprep.mubr.msk.bf16.mxu1 %vm6408_vm2, %v6406_v0  ;;  %v3138_v49 = vmax.f32 %v7383_v50, %v3108_v31 }
 0x24b   :  { %1696 = vst.msk [vmem:[#allocation2 + $0x2e8] sm:$0xff] %vm1602_vm4, %v1571_v9  ;;  %v1324_v15 = vmax.f32 %v1110_v39, 0.0  ;;  %v5572_v6 = vpop.f32.mrf.mxu1  ;;  %v6124_v7 = vpack.i.bf16 %v1834_v5, %v1833_v4 }
 0x24c   :  { %v2958_v3 = vmax.f32 %v2725_v62, 0.0  ;;  %v1112_v11 = vpop.f32.mrf.mxu0 }
 0x24d   :  { %v1572_v12 = vmax.f32 %v1448_v8, %v1324_v15  ;;  %v1113_v13 = vadd.f32 %v7321_v54, %v1112_v11  ;;  %v2727_v34 = vpop.f32.mrf.mxu1  ;;  %6125 = vrot.lane.b32.xlu0 %v6124_v7, %s6409_s20  ;;  %v1449_v24 = vmax.f32 %v1323_v2, %v1324_v15 }
 0x24e   :  { %3019 = vst.msk [vmem:[#allocation3 + $0x20] sm:$0xff] %vm2461_vm6, %v2958_v3  ;;  %v2728_v17 = vadd.f32 %v7337_v1, %v2727_v34  ;;  %v5501_v18 = vpop.f32.mrf.mxu0  ;;  %v1896_v22 = vld [vmem:[#allocation2 + $0x2e0] sm:$0xff] }
 0x24f   :  { %1697 = vst.msk [vmem:[#allocation2 + $0x2f0] sm:$0xff] %vm1602_vm4, %v1572_v12  ;;  %v1325_v29 = vmax.f32 %v1113_v13, 0.0  ;;  %v5573_v25 = vpop.f32.mrf.mxu1  ;;  %v6056_v27 = vpop.permute.xlu0 %6055  ;;  %v6129_v28 = vpack.i.bf16 %v1896_v22, %v7405_v21 }
 0x250   :  { %v2959_v30 = vmax.f32 %v2728_v17, 0.0  ;;  %v1117_v37 = vpop.f32.mrf.mxu0  ;;  %v6058_v40 = vunpack.i.h.bf16 %v6056_v27  ;;  %v6057_v59 = vunpack.i.l.bf16 %v6056_v27 }
 0x251   :  { %v1573_v33 = vmax.f32 %v1449_v24, %v1325_v29  ;;  %v1118_v42 = vadd.f32 %v7321_v54, %v1117_v37  ;;  %6130 = vrot.lane.b32.xlu1 %v6129_v28, %s6410_s21  ;;  %v1450_v44 = vmax.f32 %v1324_v15, %v1325_v29 }
 0x252   :  { %3020 = vst.msk [vmem:[#allocation3 + $0x28] sm:$0xff] %vm2461_vm6, %v2959_v30  ;;  %v5504_v43 = vpop.f32.mrf.mxu0  ;;  %v2431_v46 = vsel %vm1602_vm4, %v7196_v51, %v6058_v40  ;;  %v2430_v56 = vsel %vm1602_vm4, %v7161_v10, %v6057_v59  ;;  %v1835_v5 = vld [vmem:[#allocation2 + $0x2e8] sm:$0xff] }
 0x253   :  { %1698 = vst.msk [vmem:[#allocation2 + $0x2f8] sm:$0xff] %vm1602_vm4, %v1573_v33  ;;  %v1326_v58 = vmax.f32 %v1118_v42, 0.0  ;;  %v6061_v48 = vpop.permute.xlu1 %6060 }
 0x254   :  { %v6063_v19 = vunpack.i.h.bf16 %v6061_v48  ;;  %v6062_v32 = vunpack.i.l.bf16 %v6061_v48  ;;  %v1120_v52 = vpop.f32.mrf.mxu0 }
 0x255   :  { %v7414_v53 = vld [vmem:[#allocation3 + $0x20] sm:$0xff]  ;;  %v1574_v35 = vmax.f32 %v1450_v44, %v1326_v58  ;;  %v1121_v57 = vadd.f32 %v7321_v54, %v1120_v52  ;;  %v1451_v55 = vmax.f32 %v1325_v29, %v1326_v58 }
 0x256   :  { %v3199_v61 = vmax.f32 %v3138_v49, %v7414_v53  ;;  %v2493_v60 = vsel %vm2461_vm6, %v2431_v46, %v6063_v19  ;;  %v2492_v50 = vsel %vm2461_vm6, %v2430_v56, %v6062_v32  ;;  %v5505_v2 = vpop.f32.mrf.mxu0  ;;  %v7436_v24 = vld [vmem:[#allocation2 + $0x2f0] sm:$0xff] }
 0x257   :  { %1699 = vst.msk [vmem:[#allocation2 + $0x300] sm:$0xff] %vm1602_vm4, %v1574_v35  ;;  %v2538_v9 = vpack.c.bf16 %v2493_v60, %v2492_v50  ;;  %v1327_v39 = vmax.f32 %v1121_v57, 0.0 }
 0x258   :  { %3229 = vst.msk [vmem:[#allocation4 + $0x8] sm:$0xff] %vm2461_vm6, %v3199_v61  ;;  %v1125_v51 = vpop.f32.mrf.mxu0 }
 0x259   :  { %v1575_v38 = vmax.f32 %v1451_v55, %v1327_v39  ;;  %v1126_v10 = vadd.f32 %v7321_v54, %v1125_v51  ;;  %v2732_v62 = vpop.f32.mrf.mxu1  ;;  %5623 = vmatmul.mubr.msk.bf16.gmra.mxu1 %vm2576_vm7, %v2538_v9  ;;  %v1452_v15 = vmax.f32 %v1326_v58, %v1327_v39  ;;  %v3109_v40 = vld [vmem:[#allocation3 + $0x28] sm:$0xff] }
 0x25a   :  { %v2733_v63 = vadd.f32 %v7337_v1, %v2732_v62  ;;  %v5508_v4 = vpop.f32.mrf.mxu0  ;;  %v1836_v8 = vld [vmem:[#allocation2 + $0x2f8] sm:$0xff]  ;;  %5626 = vmatprep.mubr.msk.bf16.mxu1 %vm6408_vm2, %v6406_v0  ;;  %v3139_v32 = vmax.f32 %v7414_v53, %v3109_v40 }
 0x25b   :  { %1700 = vst.msk [vmem:[#allocation2 + $0x308] sm:$0xff] %vm1602_vm4, %v1575_v38  ;;  %v1328_v6 = vmax.f32 %v1126_v10, 0.0  ;;  %v5576_v7 = vpop.f32.mrf.mxu1  ;;  %v6134_v3 = vpack.i.bf16 %v1836_v8, %v1835_v5 }
 0x25c   :  { %v2960_v11 = vmax.f32 %v2733_v63, 0.0  ;;  %v1128_v12 = vpop.f32.mrf.mxu0 }
 0x25d   :  { %v1576_v13 = vmax.f32 %v1452_v15, %v1328_v6  ;;  %v1129_v34 = vadd.f32 %v7321_v54, %v1128_v12  ;;  %v2735_v17 = vpop.f32.mrf.mxu1  ;;  %6135 = vrot.lane.b32.xlu0 %v6134_v3, %s6409_s20  ;;  %v1453_v25 = vmax.f32 %v1327_v39, %v1328_v6 }
 0x25e   :  { %3021 = vst.msk [vmem:[#allocation3 + $0x30] sm:$0xff] %vm2461_vm6, %v2960_v11  ;;  %v2736_v18 = vadd.f32 %v7337_v1, %v2735_v17  ;;  %v5509_v22 = vpop.f32.mrf.mxu0  ;;  %v7438_v29 = vld [vmem:[#allocation2 + $0x300] sm:$0xff] }
 0x25f   :  { %1701 = vst.msk [vmem:[#allocation2 + $0x310] sm:$0xff] %vm1602_vm4, %v1576_v13  ;;  %v1329_v27 = vmax.f32 %v1129_v34, 0.0  ;;  %v5577_v28 = vpop.f32.mrf.mxu1  ;;  %v6066_v30 = vpop.permute.xlu0 %6065  ;;  %v6139_v37 = vpack.i.bf16 %v7438_v29, %v7436_v24 }
 0x260   :  { %v2961_v31 = vmax.f32 %v2736_v18, 0.0  ;;  %v1133_v33 = vpop.f32.mrf.mxu0  ;;  %v6068_v42 = vunpack.i.h.bf16 %v6066_v30  ;;  %v6067_v43 = vunpack.i.l.bf16 %v6066_v30 }
 0x261   :  { %v1577_v59 = vmax.f32 %v1453_v25, %v1329_v27  ;;  %v1134_v44 = vadd.f32 %v7321_v54, %v1133_v33  ;;  %6140 = vrot.lane.b32.xlu1 %v6139_v37, %s6410_s21  ;;  %v1454_v48 = vmax.f32 %v1328_v6, %v1329_v27 }
 0x262   :  { %3022 = vst.msk [vmem:[#allocation3 + $0x38] sm:$0xff] %vm2461_vm6, %v2961_v31  ;;  %v5512_v58 = vpop.f32.mrf.mxu0  ;;  %v2433_v57 = vsel %vm1602_vm4, %v7233_v45, %v6068_v42  ;;  %v2432_v61 = vsel %vm1602_vm4, %v7198_v47, %v6067_v43  ;;  %v1837_v5 = vld [vmem:[#allocation2 + $0x308] sm:$0xff] }
 0x263   :  { %1702 = vst.msk [vmem:[#allocation2 + $0x318] sm:$0xff] %vm1602_vm4, %v1577_v59  ;;  %v1330_v49 = vmax.f32 %v1134_v44, 0.0  ;;  %v6071_v19 = vpop.permute.xlu1 %6070 }
 0x264   :  { %v6073_v52 = vunpack.i.h.bf16 %v6071_v19  ;;  %v6072_v46 = vunpack.i.l.bf16 %v6071_v19  ;;  %v1136_v56 = vpop.f32.mrf.mxu0 }
 0x265   :  { %v7448_v35 = vld [vmem:[#allocation3 + $0x30] sm:$0xff]  ;;  %v1578_v60 = vmax.f32 %v1454_v48, %v1330_v49  ;;  %v1137_v50 = vadd.f32 %v7321_v54, %v1136_v56  ;;  %v1455_v39 = vmax.f32 %v1329_v27, %v1330_v49 }
 0x266   :  { %v3200_v2 = vmax.f32 %v3139_v32, %v7448_v35  ;;  %v2495_v55 = vsel %vm2461_vm6, %v2433_v57, %v6073_v52  ;;  %v2494_v53 = vsel %vm2461_vm6, %v2432_v61, %v6072_v46  ;;  %v5513_v9 = vpop.f32.mrf.mxu0  ;;  %v7470_v25 = vld [vmem:[#allocation2 + $0x310] sm:$0xff] }
 0x267   :  { %1703 = vst.msk [vmem:[#allocation2 + $0x320] sm:$0xff] %vm1602_vm4, %v1578_v60  ;;  %v2539_v51 = vpack.c.bf16 %v2495_v55, %v2494_v53  ;;  %v1331_v38 = vmax.f32 %v1137_v50, 0.0 }
 0x268   :  { %3230 = vst.msk [vmem:[#allocation4 + $0x10] sm:$0xff] %vm2461_vm6, %v3200_v2  ;;  %v1141_v45 = vpop.f32.mrf.mxu0 }
 0x269   :  { %v1579_v10 = vmax.f32 %v1455_v39, %v1331_v38  ;;  %v1142_v47 = vadd.f32 %v7321_v54, %v1141_v45  ;;  %v2740_v62 = vpop.f32.mrf.mxu1  ;;  %5627 = vmatmul.mubr.msk.bf16.gmra.mxu1 %vm2576_vm7, %v2539_v51  ;;  %v1456_v15 = vmax.f32 %v1330_v49, %v1331_v38  ;;  %v3110_v42 = vld [vmem:[#allocation3 + $0x38] sm:$0xff] }
 0x26a   :  { %v2741_v63 = vadd.f32 %v7337_v1, %v2740_v62  ;;  %v5516_v4 = vpop.f32.mrf.mxu0  ;;  %v1838_v8 = vld [vmem:[#allocation2 + $0x318] sm:$0xff]  ;;  %5630 = vmatprep.mubr.msk.bf16.mxu1 %vm6408_vm2, %v6406_v0  ;;  %v3140_v46 = vmax.f32 %v7448_v35, %v3110_v42 }
 0x26b   :  { %1704 = vst.msk [vmem:[#allocation2 + $0x328] sm:$0xff] %vm1602_vm4, %v1579_v10  ;;  %v1332_v6 = vmax.f32 %v1142_v47, 0.0  ;;  %v5580_v7 = vpop.f32.mrf.mxu1  ;;  %v6144_v3 = vpack.i.bf16 %v1838_v8, %v1837_v5 }
 0x26c   :  { %v2962_v11 = vmax.f32 %v2741_v63, 0.0  ;;  %v1144_v12 = vpop.f32.mrf.mxu0 }
 0x26d   :  { %v1580_v13 = vmax.f32 %v1456_v15, %v1332_v6  ;;  %v1145_v34 = vadd.f32 %v7321_v54, %v1144_v12  ;;  %v2743_v17 = vpop.f32.mrf.mxu1  ;;  %6145 = vrot.lane.b32.xlu0 %v6144_v3, %s6409_s20  ;;  %v1457_v28 = vmax.f32 %v1331_v38, %v1332_v6 }
 0x26e   :  { %3023 = vst.msk [vmem:[#allocation3 + $0x40] sm:$0xff] %vm2461_vm6, %v2962_v11  ;;  %v2744_v18 = vadd.f32 %v7337_v1, %v2743_v17  ;;  %v5517_v22 = vpop.f32.mrf.mxu0  ;;  %v7472_v27 = vld [vmem:[#allocation2 + $0x320] sm:$0xff] }
 0x26f   :  { %1705 = vst.msk [vmem:[#allocation2 + $0x330] sm:$0xff] %vm1602_vm4, %v1580_v13  ;;  %v1333_v30 = vmax.f32 %v1145_v34, 0.0  ;;  %v5581_v37 = vpop.f32.mrf.mxu1  ;;  %v6076_v31 = vpop.permute.xlu0 %6075  ;;  %v6149_v33 = vpack.i.bf16 %v7472_v27, %v7470_v25 }
 0x270   :  { %v2963_v40 = vmax.f32 %v2744_v18, 0.0  ;;  %v1149_v59 = vpop.f32.mrf.mxu0  ;;  %v6078_v44 = vunpack.i.h.bf16 %v6076_v31  ;;  %v6077_v58 = vunpack.i.l.bf16 %v6076_v31 }
 0x271   :  { %v1581_v43 = vmax.f32 %v1457_v28, %v1333_v30  ;;  %v1150_v48 = vadd.f32 %v7321_v54, %v1149_v59  ;;  %6150 = vrot.lane.b32.xlu1 %v6149_v33, %s6410_s21  ;;  %v1458_v19 = vmax.f32 %v1332_v6, %v1333_v30 }
 0x272   :  { %3024 = vst.msk [vmem:[#allocation3 + $0x48] sm:$0xff] %vm2461_vm6, %v2963_v40  ;;  %v5520_v49 = vpop.f32.mrf.mxu0  ;;  %v2435_v50 = vsel %vm1602_vm4, %v7267_v36, %v6078_v44  ;;  %v2434_v2 = vsel %vm1602_vm4, %v7235_v20, %v6077_v58  ;;  %v1839_v5 = vld [vmem:[#allocation2 + $0x328] sm:$0xff] }
 0x273   :  { %1706 = vst.msk [vmem:[#allocation2 + $0x338] sm:$0xff] %vm1602_vm4, %v1581_v43  ;;  %v1334_v32 = vmax.f32 %v1150_v48, 0.0  ;;  %v6081_v52 = vpop.permute.xlu1 %6080 }
 0x274   :  { %v6083_v56 = vunpack.i.h.bf16 %v6081_v52  ;;  %v6082_v57 = vunpack.i.l.bf16 %v6081_v52  ;;  %v1152_v61 = vpop.f32.mrf.mxu0 }
 0x275   :  { %v7482_v60 = vld [vmem:[#allocation3 + $0x40] sm:$0xff]  ;;  %v1582_v55 = vmax.f32 %v1458_v19, %v1334_v32  ;;  %v1153_v53 = vadd.f32 %v7321_v54, %v1152_v61  ;;  %v1459_v38 = vmax.f32 %v1333_v30, %v1334_v32 }
 0x276   :  { %v3201_v9 = vmax.f32 %v3140_v46, %v7482_v60  ;;  %v2497_v39 = vsel %vm2461_vm6, %v2435_v50, %v6083_v56  ;;  %v2496_v35 = vsel %vm2461_vm6, %v2434_v2, %v6082_v57  ;;  %v5521_v51 = vpop.f32.mrf.mxu0  ;;  %v7504_v28 = vld [vmem:[#allocation2 + $0x330] sm:$0xff] }
 0x277   :  { %1707 = vst.msk [vmem:[#allocation2 + $0x340] sm:$0xff] %vm1602_vm4, %v1582_v55  ;;  %v2540_v45 = vpack.c.bf16 %v2497_v39, %v2496_v35  ;;  %v1335_v10 = vmax.f32 %v1153_v53, 0.0 }
 0x278   :  { %3231 = vst.msk [vmem:[#allocation4 + $0x18] sm:$0xff] %vm2461_vm6, %v3201_v9  ;;  %v1157_v36 = vpop.f32.mrf.mxu0 }
 0x279   :  { %v1583_v47 = vmax.f32 %v1459_v38, %v1335_v10  ;;  %v1158_v20 = vadd.f32 %v7321_v54, %v1157_v36  ;;  %v2748_v62 = vpop.f32.mrf.mxu1  ;;  %5631 = vmatmul.mubr.msk.bf16.gmra.mxu1 %vm2576_vm7, %v2540_v45  ;;  %v1460_v15 = vmax.f32 %v1334_v32, %v1335_v10  ;;  %v3111_v44 = vld [vmem:[#allocation3 + $0x48] sm:$0xff] }
 0x27a   :  { %v2749_v63 = vadd.f32 %v7337_v1, %v2748_v62  ;;  %v5524_v4 = vpop.f32.mrf.mxu0  ;;  %v1840_v8 = vld [vmem:[#allocation2 + $0x338] sm:$0xff]  ;;  %5634 = vmatprep.mubr.msk.bf16.mxu1 %vm6408_vm2, %v6406_v0  ;;  %v3141_v57 = vmax.f32 %v7482_v60, %v3111_v44 }
 0x27b   :  { %1708 = vst.msk [vmem:[#allocation2 + $0x348] sm:$0xff] %vm1602_vm4, %v1583_v47  ;;  %v1336_v6 = vmax.f32 %v1158_v20, 0.0  ;;  %v5584_v7 = vpop.f32.mrf.mxu1  ;;  %v6154_v3 = vpack.i.bf16 %v1840_v8, %v1839_v5 }
 0x27c   :  { %v2964_v11 = vmax.f32 %v2749_v63, 0.0  ;;  %v1160_v12 = vpop.f32.mrf.mxu0 }
 0x27d   :  { %v1584_v13 = vmax.f32 %v1460_v15, %v1336_v6  ;;  %v1161_v34 = vadd.f32 %v7321_v54, %v1160_v12  ;;  %v2751_v17 = vpop.f32.mrf.mxu1  ;;  %6155 = vrot.lane.b32.xlu0 %v6154_v3, %s6409_s20  ;;  %v1461_v37 = vmax.f32 %v1335_v10, %v1336_v6 }
 0x27e   :  { %3025 = vst.msk [vmem:[#allocation3 + $0x50] sm:$0xff] %vm2461_vm6, %v2964_v11  ;;  %v2752_v18 = vadd.f32 %v7337_v1, %v2751_v17  ;;  %v5525_v22 = vpop.f32.mrf.mxu0  ;;  %v7506_v30 = vld [vmem:[#allocation2 + $0x340] sm:$0xff] }
 0x27f   :  { %1709 = vst.msk [vmem:[#allocation2 + $0x350] sm:$0xff] %vm1602_vm4, %v1584_v13  ;;  %v1337_v31 = vmax.f32 %v1161_v34, 0.0  ;;  %v5585_v33 = vpop.f32.mrf.mxu1  ;;  %v6086_v40 = vpop.permute.xlu0 %6085  ;;  %v6159_v59 = vpack.i.bf16 %v7506_v30, %v7504_v28  ;;  %v6339_v34 = vld [vmem:[%s8306_s5 + $0x18] sm:$0x3f]  }
 0x280   :  { %v2965_v42 = vmax.f32 %v2752_v18, 0.0  ;;  %v1165_v43 = vpop.f32.mrf.mxu0  ;;  %v6088_v48 = vunpack.i.h.bf16 %v6086_v40  ;;  %v6087_v49 = vunpack.i.l.bf16 %v6086_v40  ;;  %v3512_v40 = vsel %vm3510_vm8, %v6339_v34, 0 }
 0x281   :  { %v1585_v58 = vmax.f32 %v1461_v37, %v1337_v31  ;;  %v1166_v19 = vadd.f32 %v7321_v54, %v1165_v43  ;;  %6160 = vrot.lane.b32.xlu1 %v6159_v59, %s6410_s21  ;;  %v1462_v52 = vmax.f32 %v1336_v6, %v1337_v31  ;;  %5687 = vmatpush3.bf16.msra.mxu1 %v3512_v40 }
 0x282   :  { %3026 = vst.msk [vmem:[#allocation3 + $0x58] sm:$0xff] %vm2461_vm6, %v2965_v42  ;;  %v5528_v32 = vpop.f32.mrf.mxu0  ;;  %v2437_v53 = vsel %vm1602_vm4, %v7292_v26, %v6088_v48  ;;  %v2436_v9 = vsel %vm1602_vm4, %v7269_v41, %v6087_v49  ;;  %v1841_v5 = vld [vmem:[#allocation2 + $0x348] sm:$0xff]  ;;  %5688 = vmatprep.subr.bf16.mxu1 %v6406_v0 }
 0x283   :  { %1710 = vst.msk [vmem:[#allocation2 + $0x358] sm:$0xff] %vm1602_vm4, %v1585_v58  ;;  %v1338_v46 = vmax.f32 %v1166_v19, 0.0  ;;  %v6091_v56 = vpop.permute.xlu1 %6090 }
 0x284   :  { %v6093_v61 = vunpack.i.h.bf16 %v6091_v56  ;;  %v6092_v50 = vunpack.i.l.bf16 %v6091_v56  ;;  %v1168_v2 = vpop.f32.mrf.mxu0 }
 0x285   :  { %v7516_v55 = vld [vmem:[#allocation3 + $0x50] sm:$0xff]  ;;  %v1586_v39 = vmax.f32 %v1462_v52, %v1338_v46  ;;  %v1169_v35 = vadd.f32 %v7321_v54, %v1168_v2  ;;  %v1463_v10 = vmax.f32 %v1337_v31, %v1338_v46 }
 0x286   :  { %v3202_v51 = vmax.f32 %v3141_v57, %v7516_v55  ;;  %v2499_v38 = vsel %vm2461_vm6, %v2437_v53, %v6093_v61  ;;  %v2498_v60 = vsel %vm2461_vm6, %v2436_v9, %v6092_v50  ;;  %v5529_v45 = vpop.f32.mrf.mxu0  ;;  %v7534_v13 = vld [vmem:[#allocation2 + $0x350] sm:$0xff] }
 0x287   :  { %1711 = vst.msk [vmem:[#allocation2 + $0x360] sm:$0xff] %vm1602_vm4, %v1586_v39  ;;  %v2541_v36 = vpack.c.bf16 %v2499_v38, %v2498_v60  ;;  %v1339_v47 = vmax.f32 %v1169_v35, 0.0  ;;  %v6401_v60 = vld [vmem:[#allocation2 + $0x260] sm:$0xff] }
 0x288   :  { %3232 = vst.msk [vmem:[#allocation4 + $0x20] sm:$0xff] %vm2461_vm6, %v3202_v51  ;;  %v1173_v26 = vpop.f32.mrf.mxu0 }
 0x289   :  { %v1587_v20 = vmax.f32 %v1463_v10, %v1339_v47  ;;  %v1174_v41 = vadd.f32 %v7321_v54, %v1173_v26  ;;  %v2756_v62 = vpop.f32.mrf.mxu1  ;;  %5635 = vmatmul.mubr.msk.bf16.gmra.mxu1 %vm2576_vm7, %v2541_v36  ;;  %v1464_v15 = vmax.f32 %v1338_v46, %v1339_v47  ;;  %v3112_v19 = vld [vmem:[#allocation3 + $0x58] sm:$0xff] }
 0x28a   :  { %v2757_v63 = vadd.f32 %v7337_v1, %v2756_v62  ;;  %v5532_v4 = vpop.f32.mrf.mxu0  ;;  %v1842_v8 = vld [vmem:[#allocation2 + $0x358] sm:$0xff]  ;;  %5638 = vmatprep.mubr.msk.bf16.mxu1 %vm6408_vm2, %v6406_v0  ;;  %v3142_v53 = vmax.f32 %v7516_v55, %v3112_v19 }
 0x28b   :  { %1712 = vst.msk [vmem:[#allocation2 + $0x368] sm:$0xff] %vm1602_vm4, %v1587_v20  ;;  %v1340_v6 = vmax.f32 %v1174_v41, 0.0  ;;  %v5588_v7 = vpop.f32.mrf.mxu1  ;;  %v6164_v3 = vpack.i.bf16 %v1842_v8, %v1841_v5 }
 0x28c   :  { %v2966_v11 = vmax.f32 %v2757_v63, 0.0  ;;  %v1176_v12 = vpop.f32.mrf.mxu0 }
 0x28d   :  { %v1588_v17 = vmax.f32 %v1464_v15, %v1340_v6  ;;  %v1177_v18 = vadd.f32 %v7321_v54, %v1176_v12  ;;  %v2759_v22 = vpop.f32.mrf.mxu1  ;;  %6165 = vrot.lane.b32.xlu0 %v6164_v3, %s6409_s20  ;;  %v1465_v59 = vmax.f32 %v1339_v47, %v1340_v6 }
 0x28e   :  { %3027 = vst.msk [vmem:[#allocation3 + $0x60] sm:$0xff] %vm2461_vm6, %v2966_v11  ;;  %v2760_v37 = vadd.f32 %v7337_v1, %v2759_v22  ;;  %v5533_v31 = vpop.f32.mrf.mxu0  ;;  %v7543_v33 = vld [vmem:[#allocation2 + $0x360] sm:$0xff] }
 0x28f   :  { %1713 = vst.msk [vmem:[#allocation2 + $0x370] sm:$0xff] %vm1602_vm4, %v1588_v17  ;;  %v1341_v42 = vmax.f32 %v1177_v18, 0.0  ;;  %v5589_v43 = vpop.f32.mrf.mxu1  ;;  %v6096_v44 = vpop.permute.xlu0 %6095  ;;  %v6169_v58 = vpack.i.bf16 %v7543_v33, %v7534_v13 }
 0x290   :  { %v2967_v48 = vmax.f32 %v2760_v37, 0.0  ;;  %v1181_v49 = vpop.f32.mrf.mxu0  ;;  %v6098_v52 = vunpack.i.h.bf16 %v6096_v44  ;;  %v6097_v46 = vunpack.i.l.bf16 %v6096_v44 }
 0x291   :  { %v1589_v32 = vmax.f32 %v1465_v59, %v1341_v42  ;;  %v1182_v56 = vadd.f32 %v7321_v54, %v1181_v49  ;;  %6170 = vrot.lane.b32.xlu1 %v6169_v58, %s6410_s21  ;;  %v1466_v61 = vmax.f32 %v1340_v6, %v1341_v42 }
 0x292   :  { %3028 = vst.msk [vmem:[#allocation3 + $0x68] sm:$0xff] %vm2461_vm6, %v2967_v48  ;;  %v5536_v57 = vpop.f32.mrf.mxu0  ;;  %v2439_v38 = vsel %vm1602_vm4, %v7314_v16, %v6098_v52  ;;  %v2438_v45 = vsel %vm1602_vm4, %v6401_v60, %v6097_v46  ;;  %v1843_v7 = vld [vmem:[#allocation2 + $0x368] sm:$0xff] }
 0x293   :  { %1714 = vst.msk [vmem:[#allocation2 + $0x378] sm:$0xff] %vm1602_vm4, %v1589_v32  ;;  %v1342_v50 = vmax.f32 %v1182_v56, 0.0  ;;  %v6101_v2 = vpop.permute.xlu1 %6100 }
 0x294   :  { %v6103_v9 = vunpack.i.h.bf16 %v6101_v2  ;;  %v6102_v39 = vunpack.i.l.bf16 %v6101_v2  ;;  %v1184_v35 = vpop.f32.mrf.mxu0 }
 0x295   :  { %v7554_v51 = vld [vmem:[#allocation3 + $0x60] sm:$0xff]  ;;  %v1590_v10 = vmax.f32 %v1466_v61, %v1342_v50  ;;  %v1185_v36 = vadd.f32 %v7321_v54, %v1184_v35  ;;  %v1467_v41 = vmax.f32 %v1341_v42, %v1342_v50 }
 0x296   :  { %v3203_v47 = vmax.f32 %v3142_v53, %v7554_v51  ;;  %v2501_v26 = vsel %vm2461_vm6, %v2439_v38, %v6103_v9  ;;  %v2500_v55 = vsel %vm2461_vm6, %v2438_v45, %v6102_v39  ;;  %v5537_v20 = vpop.f32.mrf.mxu0  ;;  %v7575_v43 = vld [vmem:[#allocation2 + $0x370] sm:$0xff]  ;;  %v7585_v61 = vld [vmem:[%s8303_s2] ss:$0 sm:$0xff] }
 0x297   :  { %1715 = vst.msk [vmem:[#allocation2 + $0x380] sm:$0xff] %vm1602_vm4, %v1590_v10  ;;  %v2542_v62 = vpack.c.bf16 %v2501_v26, %v2500_v55  ;;  %v1343_v63 = vmax.f32 %v1185_v36, 0.0  ;;  %v1767_v38 = vld [vmem:[#allocation2 + $0x280] sm:$0xff] }
 0x298   :  { %3233 = vst.msk [vmem:[#allocation4 + $0x28] sm:$0xff] %vm2461_vm6, %v3203_v47  ;;  %v1189_v16 = vpop.f32.mrf.mxu0 }
 0x299   :  { %v1591_v4 = vmax.f32 %v1467_v41, %v1343_v63  ;;  %v1190_v5 = vadd.f32 %v7321_v54, %v1189_v16  ;;  %v2764_v8 = vpop.f32.mrf.mxu1  ;;  %5639 = vmatmul.mubr.msk.bf16.gmra.mxu1 %vm2576_vm7, %v2542_v62  ;;  %v1468_v11 = vmax.f32 %v1342_v50, %v1343_v63  ;;  %v3113_v46 = vld [vmem:[#allocation3 + $0x68] sm:$0xff] }
 0x29a   :  { %v2765_v15 = vadd.f32 %v7337_v1, %v2764_v8  ;;  %v5540_v6 = vpop.f32.mrf.mxu0  ;;  %v1844_v3 = vld [vmem:[#allocation2 + $0x378] sm:$0xff]  ;;  %5642 = vmatprep.mubr.msk.bf16.mxu1 %vm6408_vm2, %v6406_v0  ;;  %v3143_v35 = vmax.f32 %v7554_v51, %v3113_v46 }
 0x29b   :  { %1716 = vst.msk [vmem:[#allocation2 + $0x388] sm:$0xff] %vm1602_vm4, %v1591_v4  ;;  %v1344_v12 = vmax.f32 %v1190_v5, 0.0  ;;  %v5592_v34 = vpop.f32.mrf.mxu1  ;;  %v6174_v17 = vpack.i.bf16 %v1844_v3, %v1843_v7  ;;  %v7608_v7 = vld [vmem:[%s8305_s4] ss:$0 sm:$0xff] }
 0x29c   :  { %v2968_v18 = vmax.f32 %v2765_v15, 0.0  ;;  %v1192_v22 = vpop.f32.mrf.mxu0 }
 0x29d   :  { %v1592_v37 = vmax.f32 %v1468_v11, %v1344_v12  ;;  %v1193_v31 = vadd.f32 %v7321_v54, %v1192_v22  ;;  %v2767_v40 = vpop.f32.mrf.mxu1  ;;  %6175 = vrot.lane.b32.xlu0 %v6174_v17, %s6409_s20  ;;  %v1469_v58 = vmax.f32 %v1343_v63, %v1344_v12 }
 0x29e   :  { %3029 = vst.msk [vmem:[#allocation3 + $0x70] sm:$0xff] %vm2461_vm6, %v2968_v18  ;;  %v2768_v59 = vadd.f32 %v7337_v1, %v2767_v40  ;;  %v5541_v42 = vpop.f32.mrf.mxu0  ;;  %v7577_v44 = vld [vmem:[#allocation2 + $0x380] sm:$0xff] }
 0x29f   :  { %1717 = vst.msk [vmem:[#allocation2 + $0x390] sm:$0xff] %vm1602_vm4, %v1592_v37  ;;  %v1345_v48 = vmax.f32 %v1193_v31, 0.0  ;;  %v5593_v49 = vpop.f32.mrf.mxu1  ;;  %v6106_v19 = vpop.permute.xlu0 %6105  ;;  %v6179_v54 = vpack.i.bf16 %v7577_v44, %v7575_v43 }
 0x2a0   :  { %v2969_v32 = vmax.f32 %v2768_v59, 0.0  ;;  %v1197_v52 = vpop.f32.mrf.mxu0  ;;  %v6108_v57 = vunpack.i.h.bf16 %v6106_v19  ;;  %v6107_v1 = vunpack.i.l.bf16 %v6106_v19 }
 0x2a1   :  { %v1593_v56 = vmax.f32 %v1469_v58, %v1345_v48  ;;  %v1198_v50 = vadd.f32 %v7585_v61, %v1197_v52  ;;  %6180 = vrot.lane.b32.xlu1 %v6179_v54, %s6410_s21  ;;  %v1470_v53 = vmax.f32 %v1344_v12, %v1345_v48 }
 0x2a2   :  { %3030 = vst.msk [vmem:[#allocation3 + $0x78] sm:$0xff] %vm2461_vm6, %v2969_v32  ;;  %v5544_v2 = vpop.f32.mrf.mxu0  ;;  %v2441_v47 = vsel %vm1602_vm4, %v7349_v23, %v6108_v57  ;;  %v2440_v26 = vsel %vm1602_vm4, %v1767_v38, %v6107_v1  ;;  %v1845_v12 = vld [vmem:[#allocation2 + $0x388] sm:$0xff] }
 0x2a3   :  { %1718 = vst.msk [vmem:[#allocation2 + $0x398] sm:$0xff] %vm1602_vm4, %v1593_v56  ;;  %v1346_v9 = vmax.f32 %v1198_v50, 0.0  ;;  %v6111_v39 = vpop.permute.xlu1 %6110 }
 0x2a4   :  { %v6113_v60 = vunpack.i.h.bf16 %v6111_v39  ;;  %v6112_v45 = vunpack.i.l.bf16 %v6111_v39  ;;  %v1200_v10 = vpop.f32.mrf.mxu0 }
 0x2a5   :  { %v7592_v36 = vld [vmem:[#allocation3 + $0x70] sm:$0xff]  ;;  %v1594_v55 = vmax.f32 %v1470_v53, %v1346_v9  ;;  %v1201_v20 = vadd.f32 %v7585_v61, %v1200_v10  ;;  %v1471_v16 = vmax.f32 %v1345_v48, %v1346_v9 }
 0x2a6   :  { %v3204_v41 = vmax.f32 %v3143_v35, %v7592_v36  ;;  %v2503_v62 = vsel %vm2461_vm6, %v2441_v47, %v6113_v60  ;;  %v2502_v51 = vsel %vm2461_vm6, %v2440_v26, %v6112_v45  ;;  %v5545_v63 = vpop.f32.mrf.mxu0  ;;  %v7618_v19 = vld [vmem:[#allocation2 + $0x390] sm:$0xff]  ;;  %v1769_v26 = vld [vmem:[#allocation2 + $0x2a0] sm:$0xff] }
 0x2a7   :  { %1719 = vst.msk [vmem:[#allocation2 + $0x3a0] sm:$0xff] %vm1602_vm4, %v1594_v55  ;;  %v2543_v4 = vpack.c.bf16 %v2503_v62, %v2502_v51  ;;  %v1347_v5 = vmax.f32 %v1201_v20, 0.0 }
 0x2a8   :  { %3234 = vst.msk [vmem:[#allocation4 + $0x30] sm:$0xff] %vm2461_vm6, %v3204_v41  ;;  %v1205_v23 = vpop.f32.mrf.mxu0 }
 0x2a9   :  { %v1595_v8 = vmax.f32 %v1471_v16, %v1347_v5  ;;  %v1206_v15 = vadd.f32 %v7585_v61, %v1205_v23  ;;  %v2772_v6 = vpop.f32.mrf.mxu1  ;;  %5643 = vmatmul.mubr.msk.bf16.gmra.mxu1 %vm2576_vm7, %v2543_v4  ;;  %v1472_v17 = vmax.f32 %v1346_v9, %v1347_v5  ;;  %v3114_v2 = vld [vmem:[#allocation3 + $0x78] sm:$0xff] }
 0x2aa   :  { %v2773_v3 = vadd.f32 %v7608_v7, %v2772_v6  ;;  %v5548_v11 = vpop.f32.mrf.mxu0  ;;  %v1846_v34 = vld [vmem:[#allocation2 + $0x398] sm:$0xff]  ;;  %5646 = vmatprep.mubr.msk.bf16.mxu1 %vm6408_vm2, %v6406_v0  ;;  %v3144_v47 = vmax.f32 %v7592_v36, %v3114_v2 }
 0x2ab   :  { %1720 = vst.msk [vmem:[#allocation2 + $0x3a8] sm:$0xff] %vm1602_vm4, %v1595_v8  ;;  %v1348_v18 = vmax.f32 %v1206_v15, 0.0  ;;  %v5596_v22 = vpop.f32.mrf.mxu1  ;;  %v6184_v37 = vpack.i.bf16 %v1846_v34, %v1845_v12 }
 0x2ac   :  { %v2970_v31 = vmax.f32 %v2773_v3, 0.0  ;;  %v1208_v40 = vpop.f32.mrf.mxu0 }
 0x2ad   :  { %v1596_v59 = vmax.f32 %v1472_v17, %v1348_v18  ;;  %v1209_v42 = vadd.f32 %v7585_v61, %v1208_v40  ;;  %v2775_v58 = vpop.f32.mrf.mxu1  ;;  %6185 = vrot.lane.b32.xlu0 %v6184_v37, %s6409_s20  ;;  %v1473_v32 = vmax.f32 %v1347_v5, %v1348_v18 }
 0x2ae   :  { %3031 = vst.msk [vmem:[#allocation3 + $0x80] sm:$0xff] %vm2461_vm6, %v2970_v31  ;;  %v2776_v48 = vadd.f32 %v7608_v7, %v2775_v58  ;;  %v5549_v49 = vpop.f32.mrf.mxu0  ;;  %v7620_v54 = vld [vmem:[#allocation2 + $0x3a0] sm:$0xff] }
 0x2af   :  { %1721 = vst.msk [vmem:[#allocation2 + $0x3b0] sm:$0xff] %vm1602_vm4, %v1596_v59  ;;  %v1349_v52 = vmax.f32 %v1209_v42, 0.0  ;;  %v5597_v46 = vpop.f32.mrf.mxu1  ;;  %v6116_v56 = vpop.permute.xlu0 %6115  ;;  %v6189_v57 = vpack.i.bf16 %v7620_v54, %v7618_v19 }
 0x2b0   :  { %v2971_v1 = vmax.f32 %v2776_v48, 0.0  ;;  %v1213_v50 = vpop.f32.mrf.mxu0  ;;  %v6118_v9 = vunpack.i.h.bf16 %v6116_v56  ;;  %v6117_v39 = vunpack.i.l.bf16 %v6116_v56 }
 0x2b1   :  { %v1597_v53 = vmax.f32 %v1473_v32, %v1349_v52  ;;  %v1214_v35 = vadd.f32 %v7585_v61, %v1213_v50  ;;  %6190 = vrot.lane.b32.xlu1 %v6189_v57, %s6410_s21  ;;  %v1474_v60 = vmax.f32 %v1348_v18, %v1349_v52  ;;  %v6340_v32 = vld [vmem:[%s8306_s5 + $0x10] sm:$0xff]  }
 0x2b2   :  { %3032 = vst.msk [vmem:[#allocation3 + $0x88] sm:$0xff] %vm2461_vm6, %v2971_v1  ;;  %v5552_v38 = vpop.f32.mrf.mxu0  ;;  %v2443_v51 = vsel %vm1602_vm4, %v7375_v14, %v6118_v9  ;;  %v2442_v63 = vsel %vm1602_vm4, %v1769_v26, %v6117_v39  ;;  %v1847_v22 = vld [vmem:[#allocation2 + $0x3a8] sm:$0xff]  ;;  %5689 = vmatpush3.bf16.msra.mxu1 %v6340_v32  ;;  %v1771_v26 = vld [vmem:[#allocation2 + $0x2c0] sm:$0xff] }
 0x2b3   :  { %1722 = vst.msk [vmem:[#allocation2 + $0x3b8] sm:$0xff] %vm1602_vm4, %v1597_v53  ;;  %v1350_v45 = vmax.f32 %v1214_v35, 0.0  ;;  %v6121_v10 = vpop.permute.xlu1 %6120  ;;  %5690 = vmatprep.subr.bf16.mxu1 %v6406_v0  ;;  %v6341_v38 = vld [vmem:[%s8306_s5 + $0x8] sm:$0xff]  }
 0x2b4   :  { %v6123_v55 = vunpack.i.h.bf16 %v6121_v10  ;;  %v6122_v20 = vunpack.i.l.bf16 %v6121_v10  ;;  %v1216_v41 = vpop.f32.mrf.mxu0 }
 0x2b5   :  { %v7630_v62 = vld [vmem:[#allocation3 + $0x80] sm:$0xff]  ;;  %v1598_v16 = vmax.f32 %v1474_v60, %v1350_v45  ;;  %v1217_v4 = vadd.f32 %v7585_v61, %v1216_v41  ;;  %v1475_v15 = vmax.f32 %v1349_v52, %v1350_v45  ;;  %v3273_v41 = vld [vmem:[#allocation4 + $0x8] sm:$0xff] }
 0x2b6   :  { %v3205_v5 = vmax.f32 %v3144_v47, %v7630_v62  ;;  %v2505_v23 = vsel %vm2461_vm6, %v2443_v51, %v6123_v55  ;;  %v2504_v36 = vsel %vm2461_vm6, %v2442_v63, %v6122_v20  ;;  %v5553_v8 = vpop.f32.mrf.mxu0  ;;  %v7653_v46 = vld [vmem:[#allocation2 + $0x3b0] sm:$0xff]  ;;  %5691 = vmatpush3.bf16.msra.mxu1 %v6341_v38 }
 0x2b7   :  { %1723 = vst.msk [vmem:[#allocation2 + $0x3c0] sm:$0xff] %vm1602_vm4, %v1598_v16  ;;  %v2544_v6 = vpack.c.bf16 %v2505_v23, %v2504_v36  ;;  %v1351_v3 = vmax.f32 %v1217_v4, 0.0  ;;  %5692 = vmatprep.subr.bf16.mxu1 %v6406_v0 }
 0x2b8   :  { %3235 = vst.msk [vmem:[#allocation4 + $0x38] sm:$0xff] %vm2461_vm6, %v3205_v5  ;;  %v1221_v14 = vpop.f32.mrf.mxu0  ;;  %v6342_v5 = vld [vmem:[%s8306_s5] sm:$0xff]   ;;  %s6411_s5 = smov 40  }
 0x2b9   :  { %v1599_v11 = vmax.f32 %v1475_v15, %v1351_v3  ;;  %v1222_v12 = vadd.f32 %v7585_v61, %v1221_v14  ;;  %v2780_v34 = vpop.f32.mrf.mxu1  ;;  %5647 = vmatmul.mubr.msk.bf16.gmra.mxu1 %vm2576_vm7, %v2544_v6  ;;  %v1476_v40 = vmax.f32 %v1350_v45, %v1351_v3  ;;  %v3115_v9 = vld [vmem:[#allocation3 + $0x88] sm:$0xff]  ;;  %v3274_v45 = vld [vmem:[#allocation4 + $0x18] sm:$0xff]  ;;  %v7682_v14 = vld [vmem:[#allocation4 + $0x10] sm:$0xff] }
 0x2ba   :  { %v2781_v17 = vadd.f32 %v7608_v7, %v2780_v34  ;;  %v5556_v18 = vpop.f32.mrf.mxu0  ;;  %v1848_v37 = vld [vmem:[#allocation2 + $0x3b8] sm:$0xff]  ;;  %5650 = vmatprep.mubr.msk.bf16.mxu1 %vm6408_vm2, %v6406_v0  ;;  %v3145_v47 = vmax.f32 %v7630_v62, %v3115_v9  ;;  %v6204_v4 = vpack.i.bf16 %v3274_v45, %v3273_v41  ;;  %v7677_v6 = vld [vmem:[#allocation4 + $0x20] sm:$0xff]  ;;  %5693 = vmatpush3.bf16.msra.mxu1 %v6342_v5 }
 0x2bb   :  { %1724 = vst.msk [vmem:[#allocation2 + $0x3c8] sm:$0xff] %vm1602_vm4, %v1599_v11  ;;  %v1352_v31 = vmax.f32 %v1222_v12, 0.0  ;;  %v5600_v59 = vpop.f32.mrf.mxu1  ;;  %v6194_v42 = vpack.i.bf16 %v1848_v37, %v1847_v22  ;;  %v6209_v34 = vpack.i.bf16 %v7677_v6, %v7682_v14  ;;  %5722 = vmatprep.subr.bf16.mxu1 %v6406_v0 }
 0x2bc   :  { %v2972_v58 = vmax.f32 %v2781_v17, 0.0  ;;  %v1224_v48 = vpop.f32.mrf.mxu0 }
 0x2bd   :  { %v1600_v61 = vmax.f32 %v1476_v40, %v1352_v31  ;;  %v2783_v49 = vpop.f32.mrf.mxu1  ;;  %6195 = vrot.lane.b32.xlu0 %v6194_v42, %s6409_s20  ;;  %v7695_v42 = vld [vmem:[#allocation4 + $0x30] sm:$0xff] }
 0x2be   :  { %3033 = vst.msk [vmem:[#allocation3 + $0x90] sm:$0xff] %vm2461_vm6, %v2972_v58  ;;  %v2784_v52 = vadd.f32 %v7608_v7, %v2783_v49  ;;  %v7655_v56 = vld [vmem:[#allocation2 + $0x3c0] sm:$0xff]  ;;  %v5557_v57 = vpop.f32.mrf.mxu0 }
 0x2bf   :  { %1725 = vst.msk [vmem:[#allocation2 + $0x3d0] sm:$0xff] %vm1602_vm4, %v1600_v61  ;;  %v5601_v1 = vpop.f32.mrf.mxu1  ;;  %v6126_v50 = vpop.permute.xlu0 %6125  ;;  %v6199_v2 = vpack.i.bf16 %v7655_v56, %v7653_v46  ;;  %v3276_v15 = vld [vmem:[#allocation4 + $0x38] sm:$0xff] }
 0x2c0   :  { %v2973_v53 = vmax.f32 %v2784_v52, 0.0  ;;  %v6128_v39 = vunpack.i.h.bf16 %v6126_v50  ;;  %v6127_v35 = vunpack.i.l.bf16 %v6126_v50 }
 0x2c1   :  { %6200 = vrot.lane.b32.xlu1 %v6199_v2, %s6410_s21 }
 0x2c2   :  { %3034 = vst.msk [vmem:[#allocation3 + $0x98] sm:$0xff] %vm2461_vm6, %v2973_v53  ;;  %v1849_v60 = vld [vmem:[#allocation2 + $0x3c8] sm:$0xff]  ;;  %v2445_v63 = vsel %vm1602_vm4, %v7405_v21, %v6128_v39  ;;  %v2444_v16 = vsel %vm1602_vm4, %v1771_v26, %v6127_v35  ;;  %v3275_v21 = vld [vmem:[#allocation4 + $0x28] sm:$0xff]  ;;  %v6404_v39 = vld [vmem:[#allocation2 + $0x2e0] sm:$0xff] }
 0x2c3   :  { %v6131_v10 = vpop.permute.xlu1 %6130  ;;  %2093 = vrot.lane.b32.xlu0 %v1849_v60, %s6409_s20  ;;  %v6214_v12 = vpack.i.bf16 %v3276_v15, %v3275_v21 }
 0x2c4   :  { %v6133_v55 = vunpack.i.h.bf16 %v6131_v10  ;;  %v6132_v20 = vunpack.i.l.bf16 %v6131_v10 }
 0x2c5   :  { %v3085_v51 = vld [vmem:[#allocation3 + $0x90] sm:$0xff] }
 0x2c6   :  { %v3206_v23 = vmax.f32 %v3145_v47, %v3085_v51  ;;  %v2507_v62 = vsel %vm2461_vm6, %v2445_v63, %v6133_v55  ;;  %v2506_v36 = vsel %vm2461_vm6, %v2444_v16, %v6132_v20  ;;  %v1911_v8 = vld [vmem:[#allocation2 + $0x3d0] sm:$0xff] }
 0x2c7   :  { %v2545_v3 = vpack.c.bf16 %v2507_v62, %v2506_v36  ;;  %6205 = vrot.lane.b32.xlu0 %v6204_v4, %s6410_s21  ;;  %2337 = vrot.lane.b32.xlu1 %v1911_v8, %s6410_s21 }
 0x2c8   :  { %3236 = vst.msk [vmem:[#allocation4 + $0x40] sm:$0xff] %vm2461_vm6, %v3206_v23 }
 0x2c9   :  { %v2788_v11 = vpop.f32.mrf.mxu1  ;;  %5651 = vmatmul.mubr.msk.bf16.gmra.mxu1 %vm2576_vm7, %v2545_v3  ;;  %v3116_v49 = vld [vmem:[#allocation3 + $0x98] sm:$0xff] }
 0x2ca   :  { %v2789_v17 = vadd.f32 %v7608_v7, %v2788_v11  ;;  %5654 = vmatprep.mubr.msk.bf16.mxu1 %vm6408_vm2, %v6406_v0  ;;  %v3146_v1 = vmax.f32 %v3085_v51, %v3116_v49 }
 0x2cb   :  { %v5604_v18 = vpop.f32.mrf.mxu1  ;;  %6215 = vrot.lane.b32.xlu0 %v6214_v12, %s6410_s21  ;;  %6210 = vrot.lane.b32.xlu1 %v6209_v34, %s6411_s5 }
 0x2cc   :  { %v2974_v22 = vmax.f32 %v2789_v17, 0.0 }
 0x2cd   :  { %v2791_v37 = vpop.f32.mrf.mxu1 }
 0x2ce   :  { %3035 = vst.msk [vmem:[#allocation3 + $0xa0] sm:$0xff] %vm2461_vm6, %v2974_v22  ;;  %v2792_v31 = vadd.f32 %v7608_v7, %v2791_v37 }
 0x2cf   :  { %v5605_v40 = vpop.f32.mrf.mxu1  ;;  %v6136_v59 = vpop.permute.xlu0 %6135  ;;  %v7697_v58 = vld [vmem:[#allocation4 + $0x40] sm:$0xff] }
 0x2d0   :  { %v2975_v48 = vmax.f32 %v2792_v31, 0.0  ;;  %v6219_v61 = vpack.i.bf16 %v7697_v58, %v7695_v42  ;;  %v6138_v32 = vunpack.i.h.bf16 %v6136_v59  ;;  %v6137_v52 = vunpack.i.l.bf16 %v6136_v59 }
 0x2d2   :  { %3036 = vst.msk [vmem:[#allocation3 + $0xa8] sm:$0xff] %vm2461_vm6, %v2975_v48  ;;  %6220 = vrot.lane.b32.xlu1 %v6219_v61, %s6411_s5  ;;  %v2447_v9 = vsel %vm1602_vm4, %v7436_v24, %v6138_v32  ;;  %v2446_v35 = vsel %vm1602_vm4, %v6404_v39, %v6137_v52 }
 0x2d3   :  { %v6141_v57 = vpop.permute.xlu1 %6140 }
 0x2d4   :  { %v6143_v50 = vunpack.i.h.bf16 %v6141_v57  ;;  %v6142_v2 = vunpack.i.l.bf16 %v6141_v57 }
 0x2d5   :  { %v3086_v53 = vld [vmem:[#allocation3 + $0xa0] sm:$0xff] }
 0x2d6   :  { %v3207_v38 = vmax.f32 %v3146_v1, %v3086_v53  ;;  %v2509_v60 = vsel %vm2461_vm6, %v2447_v9, %v6143_v50  ;;  %v2508_v45 = vsel %vm2461_vm6, %v2446_v35, %v6142_v2 }
 0x2d7   :  { %v2546_v10 = vpack.c.bf16 %v2509_v60, %v2508_v45 }
 0x2d8   :  { %3237 = vst.msk [vmem:[#allocation4 + $0x48] sm:$0xff] %vm2461_vm6, %v3207_v38 }
 0x2d9   :  { %v2796_v47 = vpop.f32.mrf.mxu1  ;;  %5655 = vmatmul.mubr.msk.bf16.gmra.mxu1 %vm2576_vm7, %v2546_v10  ;;  %v3117_v4 = vld [vmem:[#allocation3 + $0xa8] sm:$0xff] }
 0x2da   :  { %v2797_v26 = vadd.f32 %v7608_v7, %v2796_v47  ;;  %5658 = vmatprep.mubr.msk.bf16.mxu1 %vm6408_vm2, %v6406_v0  ;;  %v3147_v36 = vmax.f32 %v3086_v53, %v3117_v4 }
 0x2db   :  { %v5608_v24 = vpop.f32.mrf.mxu1 }
 0x2dc   :  { %v2976_v55 = vmax.f32 %v2797_v26, 0.0 }
 0x2dd   :  { %v2799_v20 = vpop.f32.mrf.mxu1 }
 0x2de   :  { %3037 = vst.msk [vmem:[#allocation3 + $0xb0] sm:$0xff] %vm2461_vm6, %v2976_v55  ;;  %v2800_v41 = vadd.f32 %v7608_v7, %v2799_v20 }
 0x2df   :  { %v5609_v51 = vpop.f32.mrf.mxu1  ;;  %v6146_v63 = vpop.permute.xlu0 %6145 }
 0x2e0   :  { %v2977_v16 = vmax.f32 %v2800_v41, 0.0  ;;  %v6148_v5 = vunpack.i.h.bf16 %v6146_v63  ;;  %v6147_v23 = vunpack.i.l.bf16 %v6146_v63  ;;  %v3277_v41 = vld [vmem:[#allocation4 + $0x48] sm:$0xff] }
 0x2e2   :  { %3038 = vst.msk [vmem:[#allocation3 + $0xb8] sm:$0xff] %vm2461_vm6, %v2977_v16  ;;  %v2449_v21 = vsel %vm1602_vm4, %v7470_v25, %v6148_v5  ;;  %v2448_v11 = vsel %vm1602_vm4, %v7438_v29, %v6147_v23 }
 0x2e3   :  { %v6151_v62 = vpop.permute.xlu1 %6150 }
 0x2e4   :  { %v6153_v8 = vunpack.i.h.bf16 %v6151_v62  ;;  %v6152_v15 = vunpack.i.l.bf16 %v6151_v62 }
 0x2e5   :  { %v3087_v3 = vld [vmem:[#allocation3 + $0xb0] sm:$0xff] }
 0x2e6   :  { %v3208_v12 = vmax.f32 %v3147_v36, %v3087_v3  ;;  %v2511_v34 = vsel %vm2461_vm6, %v2449_v21, %v6153_v8  ;;  %v2510_v17 = vsel %vm2461_vm6, %v2448_v11, %v6152_v15 }
 0x2e7   :  { %v2547_v18 = vpack.c.bf16 %v2511_v34, %v2510_v17 }
 0x2e8   :  { %3238 = vst.msk [vmem:[#allocation4 + $0x50] sm:$0xff] %vm2461_vm6, %v3208_v12 }
 0x2e9   :  { %v2804_v22 = vpop.f32.mrf.mxu1  ;;  %5659 = vmatmul.mubr.msk.bf16.gmra.mxu1 %vm2576_vm7, %v2547_v18  ;;  %v3118_v49 = vld [vmem:[#allocation3 + $0xb8] sm:$0xff] }
 0x2ea   :  { %v2805_v37 = vadd.f32 %v7608_v7, %v2804_v22  ;;  %5662 = vmatprep.mubr.msk.bf16.mxu1 %vm6408_vm2, %v6406_v0  ;;  %v3148_v1 = vmax.f32 %v3087_v3, %v3118_v49 }
 0x2eb   :  { %v5612_v25 = vpop.f32.mrf.mxu1 }
 0x2ec   :  { %v2978_v31 = vmax.f32 %v2805_v37, 0.0 }
 0x2ed   :  { %v2807_v40 = vpop.f32.mrf.mxu1 }
 0x2ee   :  { %3039 = vst.msk [vmem:[#allocation3 + $0xc0] sm:$0xff] %vm2461_vm6, %v2978_v31  ;;  %v2808_v29 = vadd.f32 %v7608_v7, %v2807_v40 }
 0x2ef   :  { %v5613_v59 = vpop.f32.mrf.mxu1  ;;  %v6156_v48 = vpop.permute.xlu0 %6155 }
 0x2f0   :  { %v2979_v61 = vmax.f32 %v2808_v29, 0.0  ;;  %v6158_v32 = vunpack.i.h.bf16 %v6156_v48  ;;  %v6157_v52 = vunpack.i.l.bf16 %v6156_v48  ;;  %v7758_v59 = vld [vmem:[#allocation4 + $0x50] sm:$0xff] }
 0x2f2   :  { %3040 = vst.msk [vmem:[#allocation3 + $0xc8] sm:$0xff] %vm2461_vm6, %v2979_v61  ;;  %v2451_v9 = vsel %vm1602_vm4, %v7504_v28, %v6158_v32  ;;  %v2450_v39 = vsel %vm1602_vm4, %v7472_v27, %v6157_v52 }
 0x2f3   :  { %v6161_v57 = vpop.permute.xlu1 %6160 }
 0x2f4   :  { %v6163_v50 = vunpack.i.h.bf16 %v6161_v57  ;;  %v6162_v2 = vunpack.i.l.bf16 %v6161_v57 }
 0x2f5   :  { %v3088_v53 = vld [vmem:[#allocation3 + $0xc0] sm:$0xff] }
 0x2f6   :  { %v3209_v35 = vmax.f32 %v3148_v1, %v3088_v53  ;;  %v2513_v38 = vsel %vm2461_vm6, %v2451_v9, %v6163_v50  ;;  %v2512_v60 = vsel %vm2461_vm6, %v2450_v39, %v6162_v2 }
 0x2f7   :  { %v2548_v45 = vpack.c.bf16 %v2513_v38, %v2512_v60 }
 0x2f8   :  { %3239 = vst.msk [vmem:[#allocation4 + $0x58] sm:$0xff] %vm2461_vm6, %v3209_v35 }
 0x2f9   :  { %v2812_v10 = vpop.f32.mrf.mxu1  ;;  %5663 = vmatmul.mubr.msk.bf16.gmra.mxu1 %vm2576_vm7, %v2548_v45  ;;  %v3119_v4 = vld [vmem:[#allocation3 + $0xc8] sm:$0xff] }
 0x2fa   :  { %v2813_v47 = vadd.f32 %v7608_v7, %v2812_v10  ;;  %5666 = vmatprep.mubr.msk.bf16.mxu1 %vm6408_vm2, %v6406_v0  ;;  %v3149_v36 = vmax.f32 %v3088_v53, %v3119_v4 }
 0x2fb   :  { %v5616_v28 = vpop.f32.mrf.mxu1 }
 0x2fc   :  { %v2980_v26 = vmax.f32 %v2813_v47, 0.0 }
 0x2fd   :  { %v2815_v24 = vpop.f32.mrf.mxu1 }
 0x2fe   :  { %3041 = vst.msk [vmem:[#allocation3 + $0xd0] sm:$0xff] %vm2461_vm6, %v2980_v26  ;;  %v2816_v27 = vadd.f32 %v7608_v7, %v2815_v24 }
 0x2ff   :  { %v5617_v55 = vpop.f32.mrf.mxu1  ;;  %v6166_v20 = vpop.permute.xlu0 %6165  ;;  %v3278_v51 = vld [vmem:[#allocation4 + $0x58] sm:$0xff] }
 0x300   :  { %v2981_v63 = vmax.f32 %v2816_v27, 0.0  ;;  %v6224_v16 = vpack.i.bf16 %v3278_v51, %v3277_v41  ;;  %v6168_v5 = vunpack.i.h.bf16 %v6166_v20  ;;  %v6167_v23 = vunpack.i.l.bf16 %v6166_v20 }
 0x302   :  { %3042 = vst.msk [vmem:[#allocation3 + $0xd8] sm:$0xff] %vm2461_vm6, %v2981_v63  ;;  %6225 = vrot.lane.b32.xlu0 %v6224_v16, %s6410_s21  ;;  %v2453_v21 = vsel %vm1602_vm4, %v7534_v13, %v6168_v5  ;;  %v2452_v11 = vsel %vm1602_vm4, %v7506_v30, %v6167_v23 }
 0x303   :  { %v6171_v62 = vpop.permute.xlu1 %6170 }
 0x304   :  { %v6173_v8 = vunpack.i.h.bf16 %v6171_v62  ;;  %v6172_v15 = vunpack.i.l.bf16 %v6171_v62 }
 0x305   :  { %v3089_v3 = vld [vmem:[#allocation3 + $0xd0] sm:$0xff] }
 0x306   :  { %v3210_v12 = vmax.f32 %v3149_v36, %v3089_v3  ;;  %v2515_v34 = vsel %vm2461_vm6, %v2453_v21, %v6173_v8  ;;  %v2514_v17 = vsel %vm2461_vm6, %v2452_v11, %v6172_v15 }
 0x307   :  { %v2549_v18 = vpack.c.bf16 %v2515_v34, %v2514_v17 }
 0x308   :  { %3240 = vst.msk [vmem:[#allocation4 + $0x60] sm:$0xff] %vm2461_vm6, %v3210_v12 }
 0x309   :  { %v2820_v22 = vpop.f32.mrf.mxu1  ;;  %5667 = vmatmul.mubr.msk.bf16.gmra.mxu1 %vm2576_vm7, %v2549_v18  ;;  %v3120_v32 = vld [vmem:[#allocation3 + $0xd8] sm:$0xff] }
 0x30a   :  { %v2821_v37 = vadd.f32 %v7608_v7, %v2820_v22  ;;  %5670 = vmatprep.mubr.msk.bf16.mxu1 %vm6408_vm2, %v6406_v0  ;;  %v3150_v50 = vmax.f32 %v3089_v3, %v3120_v32 }
 0x30b   :  { %v5620_v13 = vpop.f32.mrf.mxu1 }
 0x30c   :  { %v2982_v25 = vmax.f32 %v2821_v37, 0.0 }
 0x30d   :  { %v2823_v31 = vpop.f32.mrf.mxu1 }
 0x30e   :  { %3043 = vst.msk [vmem:[#allocation3 + $0xe0] sm:$0xff] %vm2461_vm6, %v2982_v25  ;;  %v2824_v30 = vadd.f32 %v7608_v7, %v2823_v31 }
 0x30f   :  { %v5621_v40 = vpop.f32.mrf.mxu1  ;;  %v6176_v29 = vpop.permute.xlu0 %6175  ;;  %v7760_v48 = vld [vmem:[#allocation4 + $0x60] sm:$0xff] }
 0x310   :  { %v2983_v61 = vmax.f32 %v2824_v30, 0.0  ;;  %v6229_v49 = vpack.i.bf16 %v7760_v48, %v7758_v59  ;;  %v6178_v52 = vunpack.i.h.bf16 %v6176_v29  ;;  %v6177_v57 = vunpack.i.l.bf16 %v6176_v29 }
 0x312   :  { %3044 = vst.msk [vmem:[#allocation3 + $0xe8] sm:$0xff] %vm2461_vm6, %v2983_v61  ;;  %6230 = vrot.lane.b32.xlu1 %v6229_v49, %s6411_s5  ;;  %v2455_v39 = vsel %vm1602_vm4, %v7575_v43, %v6178_v52  ;;  %v2454_v35 = vsel %vm1602_vm4, %v7543_v33, %v6177_v57 }
 0x313   :  { %v6181_v1 = vpop.permute.xlu1 %6180 }
 0x314   :  { %v6183_v2 = vunpack.i.h.bf16 %v6181_v1  ;;  %v6182_v53 = vunpack.i.l.bf16 %v6181_v1 }
 0x315   :  { %v3090_v9 = vld [vmem:[#allocation3 + $0xe0] sm:$0xff] }
 0x316   :  { %v3211_v38 = vmax.f32 %v3150_v50, %v3090_v9  ;;  %v2517_v60 = vsel %vm2461_vm6, %v2455_v39, %v6183_v2  ;;  %v2516_v45 = vsel %vm2461_vm6, %v2454_v35, %v6182_v53 }
 0x317   :  { %v2550_v10 = vpack.c.bf16 %v2517_v60, %v2516_v45 }
 0x318   :  { %3241 = vst.msk [vmem:[#allocation4 + $0x68] sm:$0xff] %vm2461_vm6, %v3211_v38 }
 0x319   :  { %v2828_v47 = vpop.f32.mrf.mxu1  ;;  %5671 = vmatmul.mubr.msk.bf16.gmra.mxu1 %vm2576_vm7, %v2550_v10  ;;  %v3121_v41 = vld [vmem:[#allocation3 + $0xe8] sm:$0xff] }
 0x31a   :  { %v2829_v28 = vadd.f32 %v7608_v7, %v2828_v47  ;;  %5674 = vmatprep.mubr.msk.bf16.mxu1 %vm6408_vm2, %v6406_v0  ;;  %v3151_v4 = vmax.f32 %v3090_v9, %v3121_v41 }
 0x31b   :  { %v5624_v43 = vpop.f32.mrf.mxu1 }
 0x31c   :  { %v2984_v26 = vmax.f32 %v2829_v28, 0.0 }
 0x31d   :  { %v2831_v24 = vpop.f32.mrf.mxu1 }
 0x31e   :  { %3045 = vst.msk [vmem:[#allocation3 + $0xf0] sm:$0xff] %vm2461_vm6, %v2984_v26  ;;  %v2832_v33 = vadd.f32 %v7608_v7, %v2831_v24 }
 0x31f   :  { %v5625_v27 = vpop.f32.mrf.mxu1  ;;  %v6186_v55 = vpop.permute.xlu0 %6185 }
 0x320   :  { %v2985_v20 = vmax.f32 %v2832_v33, 0.0  ;;  %v6188_v51 = vunpack.i.h.bf16 %v6186_v55  ;;  %v6187_v63 = vunpack.i.l.bf16 %v6186_v55  ;;  %v3279_v55 = vld [vmem:[#allocation4 + $0x68] sm:$0xff] }
 0x322   :  { %3046 = vst.msk [vmem:[#allocation3 + $0xf8] sm:$0xff] %vm2461_vm6, %v2985_v20  ;;  %v2457_v36 = vsel %vm1602_vm4, %v7618_v19, %v6188_v51  ;;  %v2456_v8 = vsel %vm1602_vm4, %v7577_v44, %v6187_v63 }
 0x323   :  { %v6191_v16 = vpop.permute.xlu1 %6190 }
 0x324   :  { %v6193_v5 = vunpack.i.h.bf16 %v6191_v16  ;;  %v6192_v23 = vunpack.i.l.bf16 %v6191_v16 }
 0x325   :  { %v3091_v62 = vld [vmem:[#allocation3 + $0xf0] sm:$0xff] }
 0x326   :  { %v3212_v15 = vmax.f32 %v3151_v4, %v3091_v62  ;;  %v2519_v3 = vsel %vm2461_vm6, %v2457_v36, %v6193_v5  ;;  %v2518_v21 = vsel %vm2461_vm6, %v2456_v8, %v6192_v23  ;;  %v3258_v4 = vld [vmem:[#allocation4] sm:$0xff] }
 0x327   :  { %v2551_v11 = vpack.c.bf16 %v2519_v3, %v2518_v21 }
 0x328   :  { %3242 = vst.msk [vmem:[#allocation4 + $0x70] sm:$0xff] %vm2461_vm6, %v3212_v15 }
 0x329   :  { %v2836_v12 = vpop.f32.mrf.mxu1  ;;  %5675 = vmatmul.mubr.msk.bf16.gmra.mxu1 %vm2576_vm7, %v2551_v11  ;;  %v3122_v25 = vld [vmem:[#allocation3 + $0xf8] sm:$0xff] }
 0x32a   :  { %v2837_v34 = vadd.f32 %v7608_v7, %v2836_v12  ;;  %5678 = vmatprep.mubr.msk.bf16.mxu1 %vm6408_vm2, %v6406_v0  ;;  %v3152_v29 = vmax.f32 %v3091_v62, %v3122_v25 }
 0x32b   :  { %v5628_v19 = vpop.f32.mrf.mxu1 }
 0x32c   :  { %v2986_v17 = vmax.f32 %v2837_v34, 0.0 }
 0x32d   :  { %v2839_v18 = vpop.f32.mrf.mxu1 }
 0x32e   :  { %3047 = vst.msk [vmem:[#allocation3 + $0x100] sm:$0xff] %vm2461_vm6, %v2986_v17  ;;  %v2840_v44 = vadd.f32 %v7608_v7, %v2839_v18 }
 0x32f   :  { %v5629_v22 = vpop.f32.mrf.mxu1  ;;  %v6196_v37 = vpop.permute.xlu0 %6195 }
 0x330   :  { %v2987_v13 = vmax.f32 %v2840_v44, 0.0  ;;  %v6198_v31 = vunpack.i.h.bf16 %v6196_v37  ;;  %v6197_v30 = vunpack.i.l.bf16 %v6196_v37 }
 0x332   :  { %3048 = vst.msk [vmem:[#allocation3 + $0x108] sm:$0xff] %vm2461_vm6, %v2987_v13  ;;  %v2459_v52 = vsel %vm1602_vm4, %v7653_v46, %v6198_v31  ;;  %v2458_v57 = vsel %vm1602_vm4, %v7620_v54, %v6197_v30 }
 0x333   :  { %v6201_v40 = vpop.permute.xlu1 %6200 }
 0x334   :  { %v6203_v61 = vunpack.i.h.bf16 %v6201_v40  ;;  %v6202_v49 = vunpack.i.l.bf16 %v6201_v40 }
 0x335   :  { %v3092_v32 = vld [vmem:[#allocation3 + $0x100] sm:$0xff]  ;;  %v2094_v53 = vpop.permute.xlu0 %2093 }
 0x336   :  { %v3213_v1 = vmax.f32 %v3152_v29, %v3092_v32  ;;  %v2521_v50 = vsel %vm2461_vm6, %v2459_v52, %v6203_v61  ;;  %v2520_v2 = vsel %vm2461_vm6, %v2458_v57, %v6202_v49  ;;  %v2460_v54 = vsel %vm1602_vm4, %v7655_v56, %v2094_v53 }
 0x337   :  { %v2552_v9 = vpack.c.bf16 %v2521_v50, %v2520_v2 }
 0x338   :  { %3243 = vst.msk [vmem:[#allocation4 + $0x78] sm:$0xff] %vm2461_vm6, %v3213_v1 }
 0x339   :  { %v2844_v39 = vpop.f32.mrf.mxu1  ;;  %5679 = vmatmul.mubr.msk.bf16.gmra.mxu1 %vm2576_vm7, %v2552_v9  ;;  %v2338_v38 = vpop.permute.xlu1 %2337  ;;  %v3123_v16 = vld [vmem:[#allocation3 + $0x108] sm:$0xff] }
 0x33a   :  { %v2845_v35 = vadd.f32 %v7608_v7, %v2844_v39  ;;  %5682 = vmatprep.mubr.msk.bf16.mxu1 %vm6408_vm2, %v6406_v0  ;;  %v6206_v45 = vpop.permute.xlu0 %6205  ;;  %v2522_v10 = vsel %vm2461_vm6, %v2460_v54, %v2338_v38  ;;  %v3153_v62 = vmax.f32 %v3092_v32, %v3123_v16  ;;  %v7833_v32 = vld [vmem:[#allocation4 + $0x70] sm:$0xff] }
 0x33b   :  { %v5632_v46 = vpop.f32.mrf.mxu1  ;;  %v6208_v26 = vunpack.i.h.bf16 %v6206_v45  ;;  %v6207_v24 = vunpack.i.l.bf16 %v6206_v45  ;;  %v2553_v33 = vpack.c.bf16 %v2522_v10, %v2522_v10 }
 0x33c   :  { %v2988_v60 = vmax.f32 %v2845_v35, 0.0 }
 0x33d   :  { %v2847_v47 = vpop.f32.mrf.mxu1  ;;  %v6211_v43 = vpop.permute.xlu1 %6210  ;;  %v3415_v5 = vsel %vm2461_vm6, %v7682_v14, %v6208_v26  ;;  %v3414_v23 = vsel %vm2461_vm6, %v3258_v4, %v6207_v24 }
 0x33e   :  { %3049 = vst.msk [vmem:[#allocation3 + $0x110] sm:$0xff] %vm2461_vm6, %v2988_v60  ;;  %v2848_v28 = vadd.f32 %v7608_v7, %v2847_v47  ;;  %v6213_v51 = vunpack.i.h.bf16 %v6211_v43  ;;  %v6212_v56 = vunpack.i.l.bf16 %v6211_v43  ;;  %v6216_v36 = vpop.permute.xlu0 %6215 }
 0x33f   :  { %v5633_v27 = vpop.f32.mrf.mxu1  ;;  %v3280_v20 = vld [vmem:[#allocation4 + $0x78] sm:$0xff]  ;;  %v6218_v12 = vunpack.i.h.bf16 %v6216_v36  ;;  %v6217_v34 = vunpack.i.l.bf16 %v6216_v36 }
 0x340   :  { %v2989_v41 = vmax.f32 %v2848_v28, 0.0  ;;  %v6234_v63 = vpack.i.bf16 %v3280_v20, %v3279_v55  ;;  %v3430_v8 = vsel %vm3428_vm9, %v3415_v5, %v6213_v51  ;;  %v3429_v15 = vsel %vm3428_vm9, %v3414_v23, %v6212_v56 }
 0x341   :  { %5683 = vmatmul.mubr.msk.bf16.gmra.mxu1 %vm2576_vm7, %v2553_v33  ;;  %v3443_v19 = vpack.c.bf16 %v3430_v8, %v3429_v15  ;;  %v3417_v22 = vsel %vm2461_vm6, %v7695_v42, %v6218_v12  ;;  %v3416_v37 = vsel %vm2461_vm6, %v7677_v6, %v6217_v34 }
 0x342   :  { %3050 = vst.msk [vmem:[#allocation3 + $0x118] sm:$0xff] %vm2461_vm6, %v2989_v41  ;;  %6235 = vrot.lane.b32.xlu0 %v6234_v63, %s6410_s21  ;;  %5694 = vmatprep.mubr.msk.bf16.mxu1 %vm6408_vm2, %v6406_v0 }
 0x344   :  { %v6221_v21 = vpop.permute.xlu1 %6220 }
 0x345   :  { %v3093_v3 = vld [vmem:[#allocation3 + $0x110] sm:$0xff]  ;;  %v6223_v17 = vunpack.i.h.bf16 %v6221_v21  ;;  %v6222_v18 = vunpack.i.l.bf16 %v6221_v21 }
 0x346   :  { %v3214_v11 = vmax.f32 %v3153_v62, %v3093_v3 }
 0x347   :  { %v3432_v25 = vsel %vm3428_vm9, %v3417_v22, %v6223_v17  ;;  %v3431_v31 = vsel %vm3428_vm9, %v3416_v37, %v6222_v18 }
 0x348   :  { %3244 = vst.msk [vmem:[#allocation4 + $0x80] sm:$0xff] %vm2461_vm6, %v3214_v11  ;;  %v3444_v61 = vpack.c.bf16 %v3432_v25, %v3431_v31 }
 0x349   :  { %v2852_v14 = vpop.f32.mrf.mxu1  ;;  %5695 = vmatmul.mubr.msk.bf16.vlgmr.msra.gmra.mxu1 %vm3488_vm10, %v3443_v19  ;;  %v3124_v57 = vld [vmem:[#allocation3 + $0x118] sm:$0xff] }
 0x34a   :  { %v2853_v44 = vadd.f32 %v7608_v7, %v2852_v14  ;;  %5698 = vmatprep.mubr.msk.bf16.mxu1 %vm6408_vm2, %v6406_v0  ;;  %v3154_v1 = vmax.f32 %v3093_v3, %v3124_v57 }
 0x34b   :  { %v5636_v13 = vpop.f32.mrf.mxu1 }
 0x34c   :  { %v2990_v30 = vmax.f32 %v2853_v44, 0.0 }
 0x34d   :  { %v2855_v40 = vpop.f32.mrf.mxu1 }
 0x34e   :  { %3051 = vst.msk [vmem:[#allocation3 + $0x120] sm:$0xff] %vm2461_vm6, %v2990_v30  ;;  %v2856_v29 = vadd.f32 %v7608_v7, %v2855_v40 }
 0x34f   :  { %v5637_v49 = vpop.f32.mrf.mxu1  ;;  %v7835_v52 = vld [vmem:[#allocation4 + $0x80] sm:$0xff] }
 0x350   :  { %v2991_v42 = vmax.f32 %v2856_v29, 0.0  ;;  %v6239_v6 = vpack.i.bf16 %v7835_v52, %v7833_v32 }
 0x351   :  { %5699 = vmatmul.mubr.msk.bf16.gmra.mxu1 %vm3488_vm10, %v3444_v61 }
 0x352   :  { %3052 = vst.msk [vmem:[#allocation3 + $0x128] sm:$0xff] %vm2461_vm6, %v2991_v42  ;;  %6240 = vrot.lane.b32.xlu1 %v6239_v6, %s6411_s5  ;;  %5702 = vmatprep.mubr.msk.bf16.mxu1 %vm6408_vm2, %v6406_v0 }
 0x355   :  { %v3094_v50 = vld [vmem:[#allocation3 + $0x120] sm:$0xff] }
 0x356   :  { %v3215_v2 = vmax.f32 %v3154_v1, %v3094_v50 }
 0x358   :  { %3245 = vst.msk [vmem:[#allocation4 + $0x88] sm:$0xff] %vm2461_vm6, %v3215_v2 }
 0x359   :  { %v2860_v53 = vpop.f32.mrf.mxu1  ;;  %v3125_v45 = vld [vmem:[#allocation3 + $0x128] sm:$0xff] }
 0x35a   :  { %v2861_v9 = vadd.f32 %v7608_v7, %v2860_v53  ;;  %v3155_v10 = vmax.f32 %v3094_v50, %v3125_v45 }
 0x35b   :  { %v5640_v39 = vpop.f32.mrf.mxu1 }
 0x35c   :  { %v2992_v35 = vmax.f32 %v2861_v9, 0.0 }
 0x35d   :  { %v2863_v38 = vpop.f32.mrf.mxu1 }
 0x35e   :  { %3053 = vst.msk [vmem:[#allocation3 + $0x130] sm:$0xff] %vm2461_vm6, %v2992_v35  ;;  %v2864_v54 = vadd.f32 %v7608_v7, %v2863_v38 }
 0x35f   :  { %v5641_v46 = vpop.f32.mrf.mxu1  ;;  %v3281_v21 = vld [vmem:[#allocation4 + $0x88] sm:$0xff] }
 0x360   :  { %v2993_v60 = vmax.f32 %v2864_v54, 0.0 }
 0x362   :  { %3054 = vst.msk [vmem:[#allocation3 + $0x138] sm:$0xff] %vm2461_vm6, %v2993_v60 }
 0x365   :  { %v3095_v47 = vld [vmem:[#allocation3 + $0x130] sm:$0xff] }
 0x366   :  { %v3216_v28 = vmax.f32 %v3155_v10, %v3095_v47 }
 0x368   :  { %3246 = vst.msk [vmem:[#allocation4 + $0x90] sm:$0xff] %vm2461_vm6, %v3216_v28 }
 0x369   :  { %v2868_v43 = vpop.f32.mrf.mxu1  ;;  %v3126_v51 = vld [vmem:[#allocation3 + $0x138] sm:$0xff] }
 0x36a   :  { %v2869_v26 = vadd.f32 %v7608_v7, %v2868_v43  ;;  %v3156_v56 = vmax.f32 %v3095_v47, %v3126_v51 }
 0x36b   :  { %v5644_v24 = vpop.f32.mrf.mxu1 }
 0x36c   :  { %v2994_v33 = vmax.f32 %v2869_v26, 0.0 }
 0x36d   :  { %v2871_v27 = vpop.f32.mrf.mxu1 }
 0x36e   :  { %3055 = vst.msk [vmem:[#allocation3 + $0x140] sm:$0xff] %vm2461_vm6, %v2994_v33  ;;  %v2872_v55 = vadd.f32 %v7608_v7, %v2871_v27 }
 0x36f   :  { %v5645_v20 = vpop.f32.mrf.mxu1  ;;  %v7873_v50 = vld [vmem:[#allocation4 + $0x90] sm:$0xff] }
 0x370   :  { %v2995_v41 = vmax.f32 %v2872_v55, 0.0 }
 0x372   :  { %3056 = vst.msk [vmem:[#allocation3 + $0x148] sm:$0xff] %vm2461_vm6, %v2995_v41  ;;  %v7890_v41 = vld [vmem:[%s8305_s4] ss:$0 sm:$0xff] }
 0x374   :  { %v6226_v15 = vpop.permute.xlu0 %6225 }
 0x375   :  { %v3096_v63 = vld [vmem:[#allocation3 + $0x140] sm:$0xff]  ;;  %v6228_v17 = vunpack.i.h.bf16 %v6226_v15  ;;  %v6227_v18 = vunpack.i.l.bf16 %v6226_v15 }
 0x376   :  { %v3217_v16 = vmax.f32 %v3156_v56, %v3096_v63 }
 0x377   :  { %v3419_v25 = vsel %vm2461_vm6, %v7758_v59, %v6228_v17  ;;  %v3418_v31 = vsel %vm2461_vm6, %v7697_v58, %v6227_v18 }
 0x378   :  { %3247 = vst.msk [vmem:[#allocation4 + $0x98] sm:$0xff] %vm2461_vm6, %v3217_v16 }
 0x379   :  { %v2876_v4 = vpop.f32.mrf.mxu1  ;;  %v3127_v19 = vld [vmem:[#allocation3 + $0x148] sm:$0xff] }
 0x37a   :  { %v2877_v5 = vadd.f32 %v7608_v7, %v2876_v4  ;;  %v3157_v14 = vmax.f32 %v3096_v63, %v3127_v19 }
 0x37b   :  { %v5648_v23 = vpop.f32.mrf.mxu1 }
 0x37c   :  { %v2996_v62 = vmax.f32 %v2877_v5, 0.0 }
 0x37d   :  { %v2879_v36 = vpop.f32.mrf.mxu1 }
 0x37e   :  { %3057 = vst.msk [vmem:[#allocation3 + $0x150] sm:$0xff] %vm2461_vm6, %v2996_v62  ;;  %v2880_v8 = vadd.f32 %v7608_v7, %v2879_v36 }
 0x37f   :  { %v5649_v3 = vpop.f32.mrf.mxu1  ;;  %v3282_v11 = vld [vmem:[#allocation4 + $0x98] sm:$0xff] }
 0x380   :  { %v2997_v12 = vmax.f32 %v2880_v8, 0.0  ;;  %v6244_v34 = vpack.i.bf16 %v3282_v11, %v3281_v21 }
 0x382   :  { %3058 = vst.msk [vmem:[#allocation3 + $0x158] sm:$0xff] %vm2461_vm6, %v2997_v12  ;;  %6245 = vrot.lane.b32.xlu0 %v6244_v34, %s6410_s21 }
 0x384   :  { %v6231_v44 = vpop.permute.xlu1 %6230 }
 0x385   :  { %v3097_v22 = vld [vmem:[#allocation3 + $0x150] sm:$0xff]  ;;  %v6233_v37 = vunpack.i.h.bf16 %v6231_v44  ;;  %v6232_v13 = vunpack.i.l.bf16 %v6231_v44 }
 0x386   :  { %v3218_v30 = vmax.f32 %v3157_v14, %v3097_v22 }
 0x387   :  { %v3434_v40 = vsel %vm3428_vm9, %v3419_v25, %v6233_v37  ;;  %v3433_v29 = vsel %vm3428_vm9, %v3418_v31, %v6232_v13 }
 0x388   :  { %3248 = vst.msk [vmem:[#allocation4 + $0xa0] sm:$0xff] %vm2461_vm6, %v3218_v30  ;;  %v3445_v61 = vpack.c.bf16 %v3434_v40, %v3433_v29 }
 0x389   :  { %v2884_v49 = vpop.f32.mrf.mxu1  ;;  %v3128_v39 = vld [vmem:[#allocation3 + $0x158] sm:$0xff] }
 0x38a   :  { %v2885_v42 = vadd.f32 %v7608_v7, %v2884_v49  ;;  %5703 = vmatmul.mubr.msk.bf16.gmra.mxu1 %vm3488_vm10, %v3445_v61  ;;  %v3158_v35 = vmax.f32 %v3097_v22, %v3128_v39 }
 0x38b   :  { %v5652_v6 = vpop.f32.mrf.mxu1  ;;  %5706 = vmatprep.mubr.msk.bf16.mxu1 %vm6408_vm2, %v6406_v0 }
 0x38c   :  { %v2998_v59 = vmax.f32 %v2885_v42, 0.0 }
 0x38d   :  { %v2887_v57 = vpop.f32.mrf.mxu1 }
 0x38e   :  { %3059 = vst.msk [vmem:[#allocation3 + $0x160] sm:$0xff] %vm2461_vm6, %v2998_v59  ;;  %v2888_v58 = vadd.f32 %v7608_v7, %v2887_v57 }
 0x38f   :  { %v5653_v1 = vpop.f32.mrf.mxu1  ;;  %v7875_v2 = vld [vmem:[#allocation4 + $0xa0] sm:$0xff] }
 0x390   :  { %v2999_v53 = vmax.f32 %v2888_v58, 0.0  ;;  %v6249_v9 = vpack.i.bf16 %v7875_v2, %v7873_v50 }
 0x392   :  { %3060 = vst.msk [vmem:[#allocation3 + $0x168] sm:$0xff] %vm2461_vm6, %v2999_v53  ;;  %6250 = vrot.lane.b32.xlu1 %v6249_v9, %s6411_s5 }
 0x395   :  { %v3098_v38 = vld [vmem:[#allocation3 + $0x160] sm:$0xff] }
 0x396   :  { %v3219_v54 = vmax.f32 %v3158_v35, %v3098_v38 }
 0x398   :  { %3249 = vst.msk [vmem:[#allocation4 + $0xa8] sm:$0xff] %vm2461_vm6, %v3219_v54 }
 0x399   :  { %v2892_v46 = vpop.f32.mrf.mxu1  ;;  %v3129_v24 = vld [vmem:[#allocation3 + $0x168] sm:$0xff] }
 0x39a   :  { %v2893_v60 = vadd.f32 %v7608_v7, %v2892_v46  ;;  %v3159_v33 = vmax.f32 %v3098_v38, %v3129_v24 }
 0x39b   :  { %v5656_v45 = vpop.f32.mrf.mxu1 }
 0x39c   :  { %v3000_v10 = vmax.f32 %v2893_v60, 0.0 }
 0x39d   :  { %v2895_v47 = vpop.f32.mrf.mxu1 }
 0x39e   :  { %3061 = vst.msk [vmem:[#allocation3 + $0x170] sm:$0xff] %vm2461_vm6, %v3000_v10  ;;  %v2896_v28 = vadd.f32 %v7608_v7, %v2895_v47 }
 0x39f   :  { %v5657_v43 = vpop.f32.mrf.mxu1  ;;  %v3283_v18 = vld [vmem:[#allocation4 + $0xa8] sm:$0xff] }
 0x3a0   :  { %v3001_v26 = vmax.f32 %v2896_v28, 0.0 }
 0x3a2   :  { %3062 = vst.msk [vmem:[#allocation3 + $0x178] sm:$0xff] %vm2461_vm6, %v3001_v26 }
 0x3a5   :  { %v3099_v27 = vld [vmem:[#allocation3 + $0x170] sm:$0xff] }
 0x3a6   :  { %v3220_v55 = vmax.f32 %v3159_v33, %v3099_v27 }
 0x3a8   :  { %3250 = vst.msk [vmem:[#allocation4 + $0xb0] sm:$0xff] %vm2461_vm6, %v3220_v55 }
 0x3a9   :  { %v2900_v20 = vpop.f32.mrf.mxu1  ;;  %v3130_v23 = vld [vmem:[#allocation3 + $0x178] sm:$0xff] }
 0x3aa   :  { %v2901_v51 = vadd.f32 %v7890_v41, %v2900_v20  ;;  %v3160_v62 = vmax.f32 %v3099_v27, %v3130_v23 }
 0x3ab   :  { %v5660_v56 = vpop.f32.mrf.mxu1 }
 0x3ac   :  { %v3002_v7 = vmax.f32 %v2901_v51, 0.0 }
 0x3ad   :  { %v2903_v63 = vpop.f32.mrf.mxu1 }
 0x3ae   :  { %3063 = vst.msk [vmem:[#allocation3 + $0x180] sm:$0xff] %vm2461_vm6, %v3002_v7  ;;  %v2904_v16 = vadd.f32 %v7890_v41, %v2903_v63 }
 0x3af   :  { %v5661_v4 = vpop.f32.mrf.mxu1  ;;  %v7915_v38 = vld [vmem:[#allocation4 + $0xb0] sm:$0xff] }
 0x3b0   :  { %v3003_v5 = vmax.f32 %v2904_v16, 0.0 }
 0x3b2   :  { %3064 = vst.msk [vmem:[#allocation3 + $0x188] sm:$0xff] %vm2461_vm6, %v3003_v5 }
 0x3b4   :  { %v6236_v19 = vpop.permute.xlu0 %6235 }
 0x3b5   :  { %v3100_v36 = vld [vmem:[#allocation3 + $0x180] sm:$0xff]  ;;  %v6238_v13 = vunpack.i.h.bf16 %v6236_v19  ;;  %v6237_v25 = vunpack.i.l.bf16 %v6236_v19 }
 0x3b6   :  { %v3221_v8 = vmax.f32 %v3160_v62, %v3100_v36 }
 0x3b7   :  { %v3421_v49 = vsel %vm2461_vm6, %v7833_v32, %v6238_v13  ;;  %v3420_v42 = vsel %vm2461_vm6, %v7760_v48, %v6237_v25 }
 0x3b8   :  { %3251 = vst.msk [vmem:[#allocation4 + $0xb8] sm:$0xff] %vm2461_vm6, %v3221_v8 }
 0x3b9   :  { %v2908_v15 = vpop.f32.mrf.mxu1  ;;  %v3131_v37 = vld [vmem:[#allocation3 + $0x188] sm:$0xff] }
 0x3ba   :  { %v2909_v3 = vadd.f32 %v7890_v41, %v2908_v15  ;;  %v3161_v31 = vmax.f32 %v3100_v36, %v3131_v37 }
 0x3bb   :  { %v5664_v21 = vpop.f32.mrf.mxu1 }
 0x3bc   :  { %v3004_v11 = vmax.f32 %v2909_v3, 0.0 }
 0x3bd   :  { %v2911_v12 = vpop.f32.mrf.mxu1 }
 0x3be   :  { %3065 = vst.msk [vmem:[#allocation3 + $0x190] sm:$0xff] %vm2461_vm6, %v3004_v11  ;;  %v2912_v34 = vadd.f32 %v7890_v41, %v2911_v12 }
 0x3bf   :  { %v5665_v17 = vpop.f32.mrf.mxu1  ;;  %v3284_v14 = vld [vmem:[#allocation4 + $0xb8] sm:$0xff] }
 0x3c0   :  { %v3005_v44 = vmax.f32 %v2912_v34, 0.0  ;;  %v6254_v22 = vpack.i.bf16 %v3284_v14, %v3283_v18 }
 0x3c2   :  { %3066 = vst.msk [vmem:[#allocation3 + $0x198] sm:$0xff] %vm2461_vm6, %v3005_v44  ;;  %6255 = vrot.lane.b32.xlu0 %v6254_v22, %s6410_s21 }
 0x3c4   :  { %v6241_v30 = vpop.permute.xlu1 %6240 }
 0x3c5   :  { %v3101_v40 = vld [vmem:[#allocation3 + $0x190] sm:$0xff]  ;;  %v6243_v29 = vunpack.i.h.bf16 %v6241_v30  ;;  %v6242_v61 = vunpack.i.l.bf16 %v6241_v30 }
 0x3c6   :  { %v3222_v6 = vmax.f32 %v3161_v31, %v3101_v40 }
 0x3c7   :  { %v3436_v59 = vsel %vm3428_vm9, %v3421_v49, %v6243_v29  ;;  %v3435_v57 = vsel %vm3428_vm9, %v3420_v42, %v6242_v61 }
 0x3c8   :  { %3252 = vst.msk [vmem:[#allocation4 + $0xc0] sm:$0xff] %vm2461_vm6, %v3222_v6  ;;  %v3446_v58 = vpack.c.bf16 %v3436_v59, %v3435_v57 }
 0x3c9   :  { %v2916_v1 = vpop.f32.mrf.mxu1  ;;  %v3132_v45 = vld [vmem:[#allocation3 + $0x198] sm:$0xff] }
 0x3ca   :  { %v2917_v53 = vadd.f32 %v7890_v41, %v2916_v1  ;;  %5707 = vmatmul.mubr.msk.bf16.gmra.mxu1 %vm3488_vm10, %v3446_v58  ;;  %v3162_v10 = vmax.f32 %v3101_v40, %v3132_v45 }
 0x3cb   :  { %v5668_v9 = vpop.f32.mrf.mxu1  ;;  %5710 = vmatprep.mubr.msk.bf16.mxu1 %vm6408_vm2, %v6406_v0 }
 0x3cc   :  { %v3006_v32 = vmax.f32 %v2917_v53, 0.0  ;;  %v6343_v53 = vld [vmem:[%s8307_s7 + $0x10] ss:$0 sps:$4 sm:$0xff]  }
 0x3cd   :  { %v2919_v39 = vpop.f32.mrf.mxu1 }
 0x3ce   :  { %3067 = vst.msk [vmem:[#allocation3 + $0x1a0] sm:$0xff] %vm2461_vm6, %v3006_v32  ;;  %v2920_v48 = vadd.f32 %v7890_v41, %v2919_v39 }
 0x3cf   :  { %v5669_v35 = vpop.f32.mrf.mxu1  ;;  %v7917_v54 = vld [vmem:[#allocation4 + $0xc0] sm:$0xff] }
 0x3d0   :  { %v3007_v46 = vmax.f32 %v2920_v48, 0.0  ;;  %v6259_v60 = vpack.i.bf16 %v7917_v54, %v7915_v38 }
 0x3d2   :  { %3068 = vst.msk [vmem:[#allocation3 + $0x1a8] sm:$0xff] %vm2461_vm6, %v3007_v46  ;;  %6260 = vrot.lane.b32.xlu1 %v6259_v60, %s6411_s5  ;;  %v3644_v60 = vsel %vm3642_vm11, %v6343_v53, 0 }
 0x3d3   :  { %5723 = vmatpush3.bf16.msra.mxu1 %v3644_v60  ;;  %v6381_v60 = vld [vmem:[%s8308_s11 + $0x20] sm:$0xff]  }
 0x3d4   :  { %5724 = vmatprep.subr.bf16.mxu1 %v6406_v0 }
 0x3d5   :  { %v3102_v47 = vld [vmem:[#allocation3 + $0x1a0] sm:$0xff] }
 0x3d6   :  { %v3223_v28 = vmax.f32 %v3162_v10, %v3102_v47 }
 0x3d8   :  { %3253 = vst.msk [vmem:[#allocation4 + $0xc8] sm:$0xff] %vm2461_vm6, %v3223_v28 }
 0x3d9   :  { %v2924_v43 = vpop.f32.mrf.mxu1  ;;  %v3133_v56 = vld [vmem:[#allocation3 + $0x1a8] sm:$0xff] }
 0x3da   :  { %v2925_v26 = vadd.f32 %v7890_v41, %v2924_v43  ;;  %v3163_v7 = vmax.f32 %v3102_v47, %v3133_v56 }
 0x3db   :  { %v5672_v24 = vpop.f32.mrf.mxu1 }
 0x3dc   :  { %v3008_v33 = vmax.f32 %v2925_v26, 0.0 }
 0x3dd   :  { %v2927_v27 = vpop.f32.mrf.mxu1 }
 0x3de   :  { %3069 = vst.msk [vmem:[#allocation3 + $0x1b0] sm:$0xff] %vm2461_vm6, %v3008_v33  ;;  %v2928_v55 = vadd.f32 %v7890_v41, %v2927_v27  ;;  %v6345_v33 = vld [vmem:[%s8307_s7] sm:$0xff]  }
 0x3df   :  { %v5673_v20 = vpop.f32.mrf.mxu1  ;;  %v3285_v25 = vld [vmem:[#allocation4 + $0xc8] sm:$0xff] }
 0x3e0   :  { %v3009_v51 = vmax.f32 %v2928_v55, 0.0 }
 0x3e2   :  { %3070 = vst.msk [vmem:[#allocation3 + $0x1b8] sm:$0xff] %vm2461_vm6, %v3009_v51 }
 0x3e5   :  { %v3103_v63 = vld [vmem:[#allocation3 + $0x1b0] sm:$0xff] }
 0x3e6   :  { %v3224_v16 = vmax.f32 %v3163_v7, %v3103_v63 }
 0x3e8   :  { %3254 = vst.msk [vmem:[#allocation4 + $0xd0] sm:$0xff] %vm2461_vm6, %v3224_v16 }
 0x3e9   :  { %v2932_v4 = vpop.f32.mrf.mxu1  ;;  %v3134_v21 = vld [vmem:[#allocation3 + $0x1b8] sm:$0xff] }
 0x3ea   :  { %v2933_v5 = vadd.f32 %v7890_v41, %v2932_v4  ;;  %v3164_v11 = vmax.f32 %v3103_v63, %v3134_v21 }
 0x3eb   :  { %v5676_v23 = vpop.f32.mrf.mxu1 }
 0x3ec   :  { %v3010_v62 = vmax.f32 %v2933_v5, 0.0 }
 0x3ed   :  { %v2935_v36 = vpop.f32.mrf.mxu1 }
 0x3ee   :  { %3071 = vst.msk [vmem:[#allocation3 + $0x1c0] sm:$0xff] %vm2461_vm6, %v3010_v62  ;;  %v2936_v8 = vadd.f32 %v7890_v41, %v2935_v36 }
 0x3ef   :  { %v5677_v15 = vpop.f32.mrf.mxu1  ;;  %v3300_v24 = vld [vmem:[#allocation4 + $0xd0] sm:$0xff] }
 0x3f0   :  { %v3011_v3 = vmax.f32 %v2936_v8, 0.0 }
 0x3f2   :  { %3072 = vst.msk [vmem:[#allocation3 + $0x1c8] sm:$0xff] %vm2461_vm6, %v3011_v3 }
 0x3f4   :  { %v6246_v37 = vpop.permute.xlu0 %6245 }
 0x3f5   :  { %v3104_v12 = vld [vmem:[#allocation3 + $0x1c0] sm:$0xff]  ;;  %v6248_v49 = vunpack.i.h.bf16 %v6246_v37  ;;  %v6247_v42 = vunpack.i.l.bf16 %v6246_v37 }
 0x3f6   :  { %v3225_v34 = vmax.f32 %v3164_v11, %v3104_v12  ;;  %v7992_v37 = vld [vmem:[%s8309_s6] ss:$0 sm:$0xff] }
 0x3f7   :  { %v3423_v35 = vsel %vm2461_vm6, %v7873_v50, %v6248_v49 }
 0x3f8   :  { %3255 = vst.msk [vmem:[#allocation4 + $0xd8] sm:$0xff] %vm2461_vm6, %v3225_v34 }
 0x3f9   :  { %v2940_v19 = vpop.f32.mrf.mxu1  ;;  %v3135_v29 = vld [vmem:[#allocation3 + $0x1c8] sm:$0xff] }
 0x3fa   :  { %v2941_v17 = vadd.f32 %v7890_v41, %v2940_v19  ;;  %v3165_v57 = vmax.f32 %v3104_v12, %v3135_v29 }
 0x3fb   :  { %v5680_v18 = vpop.f32.mrf.mxu1 }
 0x3fc   :  { %v3012_v14 = vmax.f32 %v2941_v17, 0.0 }
 0x3fd   :  { %v2943_v44 = vpop.f32.mrf.mxu1 }
 0x3fe   :  { %3073 = vst.msk [vmem:[#allocation3 + $0x1d0] sm:$0xff] %vm2461_vm6, %v3012_v14  ;;  %v2944_v22 = vadd.f32 %v7890_v41, %v2943_v44 }
 0x3ff   :  { %v5681_v13 = vpop.f32.mrf.mxu1  ;;  %v3286_v31 = vld [vmem:[#allocation4 + $0xd8] sm:$0xff] }
 0x400   :  { %v3013_v30 = vmax.f32 %v2944_v22, 0.0  ;;  %v6264_v40 = vpack.i.bf16 %v3286_v31, %v3285_v25 }
 0x401   :  { %v2948_v61 = vpop.f32.mrf.mxu1 }
 0x402   :  { %3074 = vst.msk [vmem:[#allocation3 + $0x1d8] sm:$0xff] %vm2461_vm6, %v3013_v30  ;;  %v2949_v6 = vadd.f32 %v7890_v41, %v2948_v61  ;;  %6265 = vrot.lane.b32.xlu0 %v6264_v40, %s6410_s21  ;;  %v3422_v41 = vsel %vm2461_vm6, %v7835_v52, %v6247_v42  ;;  %v6344_v52 = vld [vmem:[%s8307_s7 + $0x8] sm:$0xff]  }
 0x403   :  { %v5684_v59 = vpop.f32.mrf.mxu1  ;;  %5725 = vmatpush3.bf16.msra.mxu1 %v6344_v52 }
 0x404   :  { %v3014_v58 = vmax.f32 %v2949_v6, 0.0  ;;  %v6251_v1 = vpop.permute.xlu1 %6250  ;;  %5726 = vmatprep.subr.bf16.mxu1 %v6406_v0 }
 0x405   :  { %v3105_v9 = vld [vmem:[#allocation3 + $0x1d0] sm:$0xff]  ;;  %v6253_v32 = vunpack.i.h.bf16 %v6251_v1  ;;  %v6252_v39 = vunpack.i.l.bf16 %v6251_v1  ;;  %v2951_v48 = vpop.f32.mrf.mxu1 }
 0x406   :  { %v3226_v46 = vmax.f32 %v3165_v57, %v3105_v9  ;;  %3075 = vst.msk [vmem:[#allocation3 + $0x1e0] sm:$0xff] %vm2461_vm6, %v3014_v58  ;;  %v6347_v9 = vld [vmem:[%s8307_s7 + $0x1c] sm:$0xff]  }
 0x407   :  { %v3438_v45 = vsel %vm3428_vm9, %v3423_v35, %v6253_v32  ;;  %v3437_v10 = vsel %vm3428_vm9, %v3422_v41, %v6252_v39  ;;  %v5685_v47 = vpop.f32.mrf.mxu1  ;;  %5727 = vmatpush3.bf16.msra.mxu1 %v6345_v33  ;;  %v6348_v39 = vld [vmem:[%s8307_s7 + $0x14] sm:$0xff]   ;;  %v6354_v33 = vld [vmem:[%s8307_s7 + $0x3c] sm:$0xff]  }
 0x408   :  { %3256 = vst.msk [vmem:[#allocation4 + $0xe0] sm:$0xff] %vm2461_vm6, %v3226_v46  ;;  %v3447_v28 = vpack.c.bf16 %v3438_v45, %v3437_v10  ;;  %5732 = vmatprep.subr.bf16.mxu1 %v6406_v0  ;;  %v6349_v35 = vld [vmem:[%s8307_s7 + $0x38] ss:$0 sps:$4 sm:$0xff]   ;;  %v6350_v45 = vld [vmem:[%s8307_s7 + $0x30] sm:$0xff]   ;;  %v6351_v47 = vld [vmem:[%s8307_s7 + $0x28] sm:$0xff]  }
 0x409   :  { %v3548_v50 = vpop.f32.mrf.mxu1  ;;  %v3788_v46 = vsel %vm3642_vm11, %v6349_v35, 0 }
 0x40a   :  { %5711 = vmatmul.mubr.msk.bf16.gmra.mxu1 %vm3488_vm10, %v3447_v28  ;;  %v3549_v61 = vadd.f32 %v7992_v37, %v3548_v50  ;;  %v6352_v50 = vld [vmem:[%s8307_s7 + $0x4c] ss:$0 sps:$4 sm:$0xff]  }
 0x40b   :  { %v5696_v43 = vpop.f32.mrf.mxu1  ;;  %5714 = vmatprep.mubr.msk.bf16.mxu1 %vm6408_vm2, %v6406_v0 }
 0x40c   :  { %v3603_v6 = vmax.f32 %v3549_v61, 0.0  ;;  %v3857_v43 = vsel %vm3642_vm11, %v6352_v50, 0 }
 0x40d   :  { %v7960_v26 = vpop.f32.mrf.mxu1 }
 0x40e   :  { %v3618_v58 = vpack.c.bf16 %v3603_v6, %v3603_v6  ;;  %v3552_v32 = vadd.f32 %v7992_v37, %v7960_v26  ;;  %v6353_v26 = vld [vmem:[%s8307_s7 + $0x44] sm:$0xff]  }
 0x40f   :  { %v5697_v27 = vpop.f32.mrf.mxu1  ;;  %v3301_v55 = vld [vmem:[#allocation4 + $0xe0] sm:$0xff] }
 0x410   :  { %v6269_v20 = vpack.i.bf16 %v3301_v55, %v3300_v24  ;;  %v3604_v48 = vmax.f32 %v3552_v32, 0.0  ;;  %v6355_v55 = vld [vmem:[%s8307_s7 + $0x60] ss:$0 sps:$4 sm:$0xff]   ;;  %v6373_v32 = vld [vmem:[%s8307_s7 + $0xb4] sm:$0xff]  }
 0x411   :  { %v7966_v51 = vpop.f32.mrf.mxu1 }
 0x412   :  { %6270 = vrot.lane.b32.xlu1 %v6269_v20, %s6411_s5  ;;  %v3693_v41 = vpack.c.bf16 %v3604_v48, %v3604_v48  ;;  %v3557_v10 = vadd.f32 %v7992_v37, %v7966_v51  ;;  %v3926_v51 = vsel %vm3642_vm11, %v6355_v55, 0  ;;  %v6374_v48 = vld [vmem:[%s8307_s7 + $0xd8] ss:$0 sps:$4 sm:$0xff]   ;;  %v6379_v55 = vld [vmem:[%s8307_s7 + $0xdc] sm:$0xff]  }
 0x413   :  { %v5700_v56 = vpop.f32.mrf.mxu1 }
 0x414   :  { %v3605_v28 = vmax.f32 %v3557_v10, 0.0  ;;  %v6356_v56 = vld [vmem:[%s8307_s7 + $0x58] sm:$0xff]  }
 0x415   :  { %v7969_v7 = vpop.f32.mrf.mxu1 }
 0x416   :  { %v3762_v52 = vpack.c.bf16 %v3605_v28, %v3605_v28 }
 0x417   :  { %v5701_v63 = vpop.f32.mrf.mxu1 }
 0x418   :  { %v6357_v63 = vld [vmem:[%s8307_s7 + $0x50] sm:$0xff]  }
 0x434   :  { %v6256_v16 = vpop.permute.xlu0 %6255 }
 0x435   :  { %v6258_v4 = vunpack.i.h.bf16 %v6256_v16  ;;  %v6257_v5 = vunpack.i.l.bf16 %v6256_v16 }
 0x437   :  { %v3425_v8 = vsel %vm2461_vm6, %v7915_v38, %v6258_v4  ;;  %v3424_v15 = vsel %vm2461_vm6, %v7875_v2, %v6257_v5  ;;  %v6371_v2 = vld [vmem:[%s8308_s11 + $0x28] ss:$0 sps:$4 sm:$0x33]   ;;  %v6358_v4 = vld [vmem:[%s8307_s7 + $0x74] ss:$0 sps:$4 sm:$0xff]  }
 0x438   :  { %v4764_v38 = vsel %vm685_vm1, %v6371_v2, 0 }
 0x439   :  { %5883 = vmatpush3.bf16.msra.mxu0 %v4764_v38 }
 0x43a   :  { %5884 = vmatprep.subr.bf16.mxu0 %v6406_v0 }
 0x43d   :  { %5885 = vmatpush3.bf16.msra.mxu0 %v6381_v60  ;;  %v6376_v60 = vld [vmem:[%s8307_s7 + $0xc8] sm:$0xff]  }
 0x43e   :  { %5886 = vmatprep.subr.bf16.mxu0 %v6406_v0 }
 0x444   :  { %v6261_v23 = vpop.permute.xlu1 %6260 }
 0x445   :  { %v6263_v62 = vunpack.i.h.bf16 %v6261_v23  ;;  %v6262_v36 = vunpack.i.l.bf16 %v6261_v23  ;;  %v3995_v23 = vsel %vm3642_vm11, %v6358_v4, 0  ;;  %v6383_v4 = vld [vmem:[%s8307_s7 + $0xf0] sm:$0xff]  }
 0x447   :  { %v3440_v3 = vsel %vm3428_vm9, %v3425_v8, %v6263_v62  ;;  %v3439_v21 = vsel %vm3428_vm9, %v3424_v15, %v6262_v36  ;;  %v6359_v62 = vld [vmem:[%s8307_s7 + $0x6c] sm:$0xff]   ;;  %v6360_v8 = vld [vmem:[%s8307_s7 + $0x64] sm:$0xff]  }
 0x448   :  { %v3448_v11 = vpack.c.bf16 %v3440_v3, %v3439_v21  ;;  %v6361_v3 = vld [vmem:[%s8307_s7 + $0x88] ss:$0 sps:$4 sm:$0xff]  }
 0x44a   :  { %v7977_v12 = vpop.f32.mrf.mxu1  ;;  %5715 = vmatmul.mubr.msk.bf16.gmra.mxu1 %vm3488_vm10, %v3448_v11 }
 0x44b   :  { %5718 = vmatprep.mubr.msk.bf16.mxu1 %vm6408_vm2, %v6406_v0 }
 0x44c   :  { %v5704_v34 = vpop.f32.mrf.mxu1 }
 0x44d   :  { %v4064_v34 = vsel %vm3642_vm11, %v6361_v3, 0 }
 0x44e   :  { %v7982_v19 = vpop.f32.mrf.mxu1 }
 0x44f   :  { %v3568_v36 = vadd.f32 %v7992_v37, %v7982_v19 }
 0x450   :  { %v5705_v17 = vpop.f32.mrf.mxu1 }
 0x451   :  { %v3608_v15 = vmax.f32 %v3568_v36, 0.0  ;;  %v6362_v17 = vld [vmem:[%s8307_s7 + $0x80] sm:$0xff]  }
 0x453   :  { %v3969_v11 = vpack.c.bf16 %v3608_v15, %v3608_v15 }
 0x474   :  { %v6266_v18 = vpop.permute.xlu0 %6265 }
 0x475   :  { %v6268_v14 = vunpack.i.h.bf16 %v6266_v18  ;;  %v6267_v44 = vunpack.i.l.bf16 %v6266_v18  ;;  %v6363_v18 = vld [vmem:[%s8307_s7 + $0x78] sm:$0xff]  }
 0x477   :  { %v3427_v31 = vsel %vm2461_vm6, %v3300_v24, %v6268_v14  ;;  %v3426_v30 = vsel %vm2461_vm6, %v7917_v54, %v6267_v44  ;;  %v6346_v54 = vld [vmem:[%s8307_s7 + $0x24] ss:$0 sps:$4 sm:$0xff]   ;;  %v3560_v24 = vadd.f32 %v7992_v37, %v7969_v7  ;;  %v3565_v7 = vadd.f32 %v7992_v37, %v7977_v12  ;;  %v6364_v44 = vld [vmem:[%s8307_s7 + $0x9c] ss:$0 sps:$4 sm:$0xff]  }
 0x478   :  { %v3719_v53 = vsel %vm3642_vm11, %v6346_v54, 0 }
 0x479   :  { %v3606_v27 = vmax.f32 %v3560_v24, 0.0  ;;  %v3607_v16 = vmax.f32 %v3565_v7, 0.0 }
 0x47b   :  { %v3831_v20 = vpack.c.bf16 %v3606_v27, %v3606_v27  ;;  %v3900_v5 = vpack.c.bf16 %v3607_v16, %v3607_v16  ;;  %v6382_v16 = vld [vmem:[%s8307_s7 + $0xf8] sm:$0xff]  }
 0x484   :  { %v6271_v22 = vpop.permute.xlu1 %6270 }
 0x485   :  { %v6273_v13 = vunpack.i.h.bf16 %v6271_v22  ;;  %v6272_v25 = vunpack.i.l.bf16 %v6271_v22 }
 0x487   :  { %v3442_v40 = vsel %vm3428_vm9, %v3427_v31, %v6273_v13  ;;  %v3441_v29 = vsel %vm3428_vm9, %v3426_v30, %v6272_v25  ;;  %v4133_v13 = vsel %vm3642_vm11, %v6364_v44, 0  ;;  %v6365_v25 = vld [vmem:[%s8307_s7 + $0x94] sm:$0xff]   ;;  %v6366_v30 = vld [vmem:[%s8307_s7 + $0x8c] sm:$0xff]   ;;  %v4988_v44 = vld [vmem:[%s8310_s8] ss:$0 sm:$0xff] }
 0x488   :  { %v3449_v49 = vpack.c.bf16 %v3442_v40, %v3441_v29  ;;  %v6367_v29 = vld [vmem:[%s8307_s7 + $0xb0] ss:$0 sps:$4 sm:$0xff]  }
 0x48a   :  { %v8000_v42 = vpop.f32.mrf.mxu1  ;;  %5719 = vmatmul.mubr.msk.bf16.gmra.mxu1 %vm3488_vm10, %v3449_v49  ;;  %v4202_v49 = vsel %vm3642_vm11, %v6367_v29, 0 }
 0x48b   :  { %5728 = vmatprep.mubr.msk.bf16.mxu1 %vm6408_vm2, %v6406_v0  ;;  %v3573_v2 = vadd.f32 %v7992_v37, %v8000_v42  ;;  %v6368_v42 = vld [vmem:[%s8307_s7 + $0xa8] sm:$0xff]  }
 0x48c   :  { %v5708_v59 = vpop.f32.mrf.mxu1 }
 0x48d   :  { %v3609_v14 = vmax.f32 %v3573_v2, 0.0  ;;  %v6369_v59 = vld [vmem:[%s8307_s7 + $0xa0] sm:$0xff]  }
 0x48e   :  { %v8008_v57 = vpop.f32.mrf.mxu1 }
 0x48f   :  { %v4038_v22 = vpack.c.bf16 %v3609_v14, %v3609_v14  ;;  %v3576_v31 = vadd.f32 %v7992_v37, %v8008_v57  ;;  %v6370_v57 = vld [vmem:[%s8307_s7 + $0xc4] ss:$0 sps:$4 sm:$0xff]  }
 0x490   :  { %v5709_v1 = vpop.f32.mrf.mxu1 }
 0x491   :  { %v3610_v40 = vmax.f32 %v3576_v31, 0.0  ;;  %v4271_v1 = vsel %vm3642_vm11, %v6370_v57, 0 }
 0x492   :  { %5729 = vmatmul.mubr.msk.bf16.vlgmr.msra.gmra.mxu1 %vm3428_vm9, %v3618_v58 }
 0x493   :  { %5733 = vmatpush3.bf16.msra.mxu1 %v3719_v53  ;;  %5738 = vmatprep.mubr.msk.bf16.mxu1 %vm6408_vm2, %v6406_v0  ;;  %v4107_v61 = vpack.c.bf16 %v3610_v40, %v3610_v40  ;;  %v6372_v53 = vld [vmem:[%s8307_s7 + $0xbc] sm:$0xff]   ;;  %v6388_v40 = vld [vmem:[%s8308_s11 + $0x10] sm:$0xff]  }
 0x494   :  { %5734 = vmatprep.subr.bf16.mxu1 %v6406_v0 }
 0x497   :  { %5735 = vmatpush3.bf16.msra.mxu1 %v6347_v9 }
 0x498   :  { %5736 = vmatprep.subr.bf16.mxu1 %v6406_v0 }
 0x49b   :  { %5737 = vmatpush3.bf16.msra.mxu1 %v6348_v39 }
 0x49c   :  { %5742 = vmatprep.subr.bf16.mxu1 %v6406_v0 }
 0x49e   :  { %5739 = vmatmul.mubr.msk.bf16.vlgmr.msra.gmra.mxu1 %vm3428_vm9, %v3693_v41  ;;  %v4340_v41 = vsel %vm3642_vm11, %v6374_v48, 0 }
 0x49f   :  { %5743 = vmatpush3.bf16.msra.mxu1 %v3788_v46  ;;  %5748 = vmatprep.mubr.msk.bf16.mxu1 %vm6408_vm2, %v6406_v0  ;;  %v6375_v46 = vld [vmem:[%s8307_s7 + $0xd0] sm:$0xff]  }
 0x4a0   :  { %5744 = vmatprep.subr.bf16.mxu1 %v6406_v0 }
 0x4a3   :  { %5745 = vmatpush3.bf16.msra.mxu1 %v6350_v45 }
 0x4a4   :  { %5746 = vmatprep.subr.bf16.mxu1 %v6406_v0 }
 0x4a7   :  { %5747 = vmatpush3.bf16.msra.mxu1 %v6351_v47  ;;  %v6377_v47 = vld [vmem:[%s8307_s7 + $0xec] ss:$0 sps:$4 sm:$0xff]  }
 0x4a8   :  { %5752 = vmatprep.subr.bf16.mxu1 %v6406_v0 }
 0x4aa   :  { %5749 = vmatmul.mubr.msk.bf16.vlgmr.msra.gmra.mxu1 %vm3428_vm9, %v3762_v52 }
 0x4ab   :  { %5753 = vmatpush3.bf16.msra.mxu1 %v3857_v43  ;;  %5758 = vmatprep.mubr.msk.bf16.mxu1 %vm6408_vm2, %v6406_v0 }
 0x4ac   :  { %5754 = vmatprep.subr.bf16.mxu1 %v6406_v0 }
 0x4af   :  { %5755 = vmatpush3.bf16.msra.mxu1 %v6353_v26  ;;  %v4409_v26 = vsel %vm3642_vm11, %v6377_v47, 0 }
 0x4b0   :  { %5756 = vmatprep.subr.bf16.mxu1 %v6406_v0 }
 0x4b3   :  { %5757 = vmatpush3.bf16.msra.mxu1 %v6354_v33  ;;  %v6378_v33 = vld [vmem:[%s8307_s7 + $0xe4] sm:$0xff]  }
 0x4b4   :  { %5762 = vmatprep.subr.bf16.mxu1 %v6406_v0 }
 0x4b6   :  { %5759 = vmatmul.mubr.msk.bf16.vlgmr.msra.gmra.mxu1 %vm3428_vm9, %v3831_v20 }
 0x4b7   :  { %5763 = vmatpush3.bf16.msra.mxu1 %v3926_v51  ;;  %5768 = vmatprep.mubr.msk.bf16.mxu1 %vm6408_vm2, %v6406_v0  ;;  %v6380_v51 = vld [vmem:[%s8307_s7 + $0x100] ss:$0 sps:$4 sm:$0xff]  }
 0x4b8   :  { %5764 = vmatprep.subr.bf16.mxu1 %v6406_v0  ;;  %v4478_v7 = vsel %vm3642_vm11, %v6380_v51, 0 }
 0x4bb   :  { %5765 = vmatpush3.bf16.msra.mxu1 %v6356_v56 }
 0x4bc   :  { %5766 = vmatprep.subr.bf16.mxu1 %v6406_v0 }
 0x4bf   :  { %5767 = vmatpush3.bf16.msra.mxu1 %v6357_v63  ;;  %v6387_v63 = vld [vmem:[%s8308_s11 + $0x18] sm:$0xff]  }
 0x4c0   :  { %5772 = vmatprep.subr.bf16.mxu1 %v6406_v0  ;;  %5887 = vmatpush3.bf16.msra.mxu0 %v6387_v63  ;;  %v6397_v63 = vld [vmem:[%s8308_s11 + $0x8] sm:$0xff]  }
 0x4c1   :  { %5888 = vmatprep.subr.bf16.mxu0 %v6406_v0 }
 0x4c2   :  { %5769 = vmatmul.mubr.msk.bf16.vlgmr.msra.gmra.mxu1 %vm3428_vm9, %v3900_v5 }
 0x4c3   :  { %5773 = vmatpush3.bf16.msra.mxu1 %v3995_v23  ;;  %5778 = vmatprep.mubr.msk.bf16.mxu1 %vm6408_vm2, %v6406_v0 }
 0x4c4   :  { %5774 = vmatprep.subr.bf16.mxu1 %v6406_v0  ;;  %5889 = vmatpush3.bf16.msra.mxu0 %v6388_v40 }
 0x4c5   :  { %5890 = vmatprep.subr.bf16.mxu0 %v6406_v0 }
 0x4c7   :  { %5775 = vmatpush3.bf16.msra.mxu1 %v6359_v62  ;;  %v6384_v62 = vld [vmem:[%s8307_s7 + $0x114] ss:$0 sps:$4 sm:$0xff]  }
 0x4c8   :  { %5776 = vmatprep.subr.bf16.mxu1 %v6406_v0  ;;  %5891 = vmatpush3.bf16.msra.mxu0 %v6397_v63 }
 0x4c9   :  { %5892 = vmatprep.subr.bf16.mxu0 %v6406_v0 }
 0x4ca   :  { %v3580_v21 = vpop.f32.mrf.mxu1 }
 0x4cb   :  { %5777 = vmatpush3.bf16.msra.mxu1 %v6360_v8  ;;  %v3581_v6 = vadd.f32 %v7992_v37, %v3580_v21  ;;  %v4547_v21 = vsel %vm3642_vm11, %v6384_v62, 0 }
 0x4cc   :  { %v5712_v12 = vpop.f32.mrf.mxu1  ;;  %5782 = vmatprep.subr.bf16.mxu1 %v6406_v0 }
 0x4cd   :  { %v3611_v54 = vmax.f32 %v3581_v6, 0.0 }
 0x4ce   :  { %5779 = vmatmul.mubr.msk.bf16.vlgmr.msra.gmra.mxu1 %vm3428_vm9, %v3969_v11  ;;  %v3583_v19 = vpop.f32.mrf.mxu1 }
 0x4cf   :  { %5783 = vmatpush3.bf16.msra.mxu1 %v4064_v34  ;;  %5788 = vmatprep.mubr.msk.bf16.mxu1 %vm6408_vm2, %v6406_v0  ;;  %v4176_v58 = vpack.c.bf16 %v3611_v54, %v3611_v54  ;;  %v3584_v9 = vadd.f32 %v7992_v37, %v3583_v19  ;;  %v6385_v34 = vld [vmem:[%s8307_s7 + $0x10c] sm:$0xff]  }
 0x4d0   :  { %v5713_v38 = vpop.f32.mrf.mxu1  ;;  %5784 = vmatprep.subr.bf16.mxu1 %v6406_v0  ;;  %v6391_v54 = vld [vmem:[%s8311_s9 + $0x28] sm:$0xff]  }
 0x4d1   :  { %v3612_v39 = vmax.f32 %v3584_v9, 0.0  ;;  %v6386_v38 = vld [vmem:[%s8307_s7 + $0x104] sm:$0xff]  }
 0x4d3   :  { %5785 = vmatpush3.bf16.msra.mxu1 %v6362_v17  ;;  %v4245_v35 = vpack.c.bf16 %v3612_v39, %v3612_v39 }
 0x4d4   :  { %5786 = vmatprep.subr.bf16.mxu1 %v6406_v0 }
 0x4d7   :  { %5787 = vmatpush3.bf16.msra.mxu1 %v6363_v18 }
 0x4d8   :  { %5792 = vmatprep.subr.bf16.mxu1 %v6406_v0 }
 0x4da   :  { %5789 = vmatmul.mubr.msk.bf16.vlgmr.msra.gmra.mxu1 %vm3428_vm9, %v4038_v22 }
 0x4db   :  { %5793 = vmatpush3.bf16.msra.mxu1 %v4133_v13  ;;  %5798 = vmatprep.mubr.msk.bf16.mxu1 %vm6408_vm2, %v6406_v0 }
 0x4dc   :  { %5794 = vmatprep.subr.bf16.mxu1 %v6406_v0 }
 0x4df   :  { %5795 = vmatpush3.bf16.msra.mxu1 %v6365_v25 }
 0x4e0   :  { %5796 = vmatprep.subr.bf16.mxu1 %v6406_v0 }
 0x4e3   :  { %5797 = vmatpush3.bf16.msra.mxu1 %v6366_v30 }
 0x4e4   :  { %5802 = vmatprep.subr.bf16.mxu1 %v6406_v0 }
 0x4e6   :  { %5799 = vmatmul.mubr.msk.bf16.vlgmr.msra.gmra.mxu1 %vm3428_vm9, %v4107_v61  ;;  %v6389_v61 = vld [vmem:[%s8311_s9 + $0x38] ss:$0 sps:$4 sm:$0xff]  }
 0x4e7   :  { %5803 = vmatpush3.bf16.msra.mxu1 %v4202_v49  ;;  %5808 = vmatprep.mubr.msk.bf16.mxu1 %vm6408_vm2, %v6406_v0  ;;  %v4664_v49 = vsel %vm3642_vm11, %v6389_v61, 0 }
 0x4e8   :  { %5804 = vmatprep.subr.bf16.mxu1 %v6406_v0 }
 0x4eb   :  { %5805 = vmatpush3.bf16.msra.mxu1 %v6368_v42  ;;  %v6390_v42 = vld [vmem:[%s8311_s9 + $0x30] sm:$0xff]  }
 0x4ec   :  { %5806 = vmatprep.subr.bf16.mxu1 %v6406_v0 }
 0x4ef   :  { %5807 = vmatpush3.bf16.msra.mxu1 %v6369_v59 }
 0x4f0   :  { %5812 = vmatprep.subr.bf16.mxu1 %v6406_v0 }
 0x4f2   :  { %5809 = vmatmul.mubr.msk.bf16.vlgmr.msra.gmra.mxu1 %vm3428_vm9, %v4176_v58 }
 0x4f3   :  { %5813 = vmatpush3.bf16.msra.mxu1 %v4271_v1  ;;  %5818 = vmatprep.mubr.msk.bf16.mxu1 %vm6408_vm2, %v6406_v0  ;;  %v6392_v1 = vld [vmem:[%s8311_s9 + $0x20] sm:$0xff]  }
 0x4f4   :  { %5814 = vmatprep.subr.bf16.mxu1 %v6406_v0 }
 0x4f7   :  { %5815 = vmatpush3.bf16.msra.mxu1 %v6372_v53 }
 0x4f8   :  { %5816 = vmatprep.subr.bf16.mxu1 %v6406_v0 }
 0x4fb   :  { %5817 = vmatpush3.bf16.msra.mxu1 %v6373_v32 }
 0x4fc   :  { %5822 = vmatprep.subr.bf16.mxu1 %v6406_v0 }
 0x4fe   :  { %5819 = vmatmul.mubr.msk.bf16.vlgmr.msra.gmra.mxu1 %vm3428_vm9, %v4245_v35 }
 0x4ff   :  { %5823 = vmatpush3.bf16.msra.mxu1 %v4340_v41  ;;  %5828 = vmatprep.mubr.msk.bf16.mxu1 %vm6408_vm2, %v6406_v0 }
 0x500   :  { %5824 = vmatprep.subr.bf16.mxu1 %v6406_v0 }
 0x503   :  { %5825 = vmatpush3.bf16.msra.mxu1 %v6375_v46 }
 0x504   :  { %5826 = vmatprep.subr.bf16.mxu1 %v6406_v0 }
 0x507   :  { %5827 = vmatpush3.bf16.msra.mxu1 %v6376_v60 }
 0x508   :  { %5832 = vmatprep.subr.bf16.mxu1 %v6406_v0 }
 0x50a   :  { %v3588_v45 = vpop.f32.mrf.mxu1 }
 0x50b   :  { %v3589_v10 = vadd.f32 %v7992_v37, %v3588_v45 }
 0x50c   :  { %v5716_v28 = vpop.f32.mrf.mxu1 }
 0x50d   :  { %v3613_v50 = vmax.f32 %v3589_v10, 0.0 }
 0x50e   :  { %v3591_v52 = vpop.f32.mrf.mxu1 }
 0x50f   :  { %v4314_v43 = vpack.c.bf16 %v3613_v50, %v3613_v50  ;;  %v3592_v27 = vadd.f32 %v7992_v37, %v3591_v52 }
 0x510   :  { %v5717_v24 = vpop.f32.mrf.mxu1 }
 0x511   :  { %5829 = vmatmul.mubr.msk.bf16.vlgmr.msra.gmra.mxu1 %vm3428_vm9, %v4314_v43  ;;  %v3614_v20 = vmax.f32 %v3592_v27, 0.0  ;;  %v6393_v43 = vld [vmem:[%s8311_s9 + $0x18] sm:$0xff]   ;;  %v6394_v24 = vld [vmem:[%s8311_s9 + $0x10] sm:$0xff]  }
 0x512   :  { %5833 = vmatpush3.bf16.msra.mxu1 %v4409_v26  ;;  %5838 = vmatprep.mubr.msk.bf16.mxu1 %vm6408_vm2, %v6406_v0 }
 0x513   :  { %5834 = vmatprep.subr.bf16.mxu1 %v6406_v0  ;;  %v4383_v56 = vpack.c.bf16 %v3614_v20, %v3614_v20 }
 0x516   :  { %5835 = vmatpush3.bf16.msra.mxu1 %v6378_v33 }
 0x517   :  { %5836 = vmatprep.subr.bf16.mxu1 %v6406_v0 }
 0x51a   :  { %5837 = vmatpush3.bf16.msra.mxu1 %v6379_v55  ;;  %v6395_v55 = vld [vmem:[%s8311_s9 + $0x8] sm:$0xff]  }
 0x51b   :  { %5842 = vmatprep.subr.bf16.mxu1 %v6406_v0 }
 0x51d   :  { %5839 = vmatmul.mubr.msk.bf16.vlgmr.msra.gmra.mxu1 %vm3428_vm9, %v4383_v56  ;;  %v6396_v56 = vld [vmem:[%s8311_s9] sm:$0xff]  }
 0x51e   :  { %5843 = vmatpush3.bf16.msra.mxu1 %v4478_v7  ;;  %5848 = vmatprep.mubr.msk.bf16.mxu1 %vm6408_vm2, %v6406_v0 }
 0x51f   :  { %5844 = vmatprep.subr.bf16.mxu1 %v6406_v0 }
 0x522   :  { %5845 = vmatpush3.bf16.msra.mxu1 %v6382_v16 }
 0x523   :  { %5846 = vmatprep.subr.bf16.mxu1 %v6406_v0 }
 0x526   :  { %5847 = vmatpush3.bf16.msra.mxu1 %v6383_v4  ;;  %v6398_v4 = vld [vmem:[%s8308_s11] sm:$0xff]  }
 0x527   :  { %5852 = vmatprep.subr.bf16.mxu1 %v6406_v0  ;;  %5893 = vmatpush3.bf16.msra.mxu0 %v6398_v4 }
 0x54a   :  { %v3596_v5 = vpop.f32.mrf.mxu1 }
 0x54b   :  { %v3597_v23 = vadd.f32 %v7992_v37, %v3596_v5 }
 0x54c   :  { %v5720_v36 = vpop.f32.mrf.mxu1 }
 0x54d   :  { %v3615_v8 = vmax.f32 %v3597_v23, 0.0 }
 0x54e   :  { %v3599_v15 = vpop.f32.mrf.mxu1 }
 0x54f   :  { %v4452_v3 = vpack.c.bf16 %v3615_v8, %v3615_v8  ;;  %v3600_v19 = vadd.f32 %v7992_v37, %v3599_v15 }
 0x550   :  { %v5721_v11 = vpop.f32.mrf.mxu1 }
 0x551   :  { %5849 = vmatmul.mubr.msk.bf16.vlgmr.msra.gmra.mxu1 %vm3428_vm9, %v4452_v3  ;;  %v3616_v18 = vmax.f32 %v3600_v19, 0.0 }
 0x552   :  { %5853 = vmatpush3.bf16.msra.mxu1 %v4547_v21  ;;  %v3680_v12 = vpop.f32.mrf.mxu1  ;;  %5858 = vmatprep.mubr.msk.bf16.mxu1 %vm6408_vm2, %v6406_v0 }
 0x553   :  { %5854 = vmatprep.subr.bf16.mxu1 %v6406_v0  ;;  %v4521_v22 = vpack.c.bf16 %v3616_v18, %v3616_v18  ;;  %v3692_v37 = vadd.f32 %v4988_v44, %v3680_v12 }
 0x554   :  { %v5730_v17 = vpop.f32.mrf.mxu1 }
 0x556   :  { %5855 = vmatpush3.bf16.msra.mxu1 %v6385_v34  ;;  %v3683_v2 = vpop.f32.mrf.mxu1 }
 0x557   :  { %5856 = vmatprep.subr.bf16.mxu1 %v6406_v0 }
 0x558   :  { %v5731_v14 = vpop.f32.mrf.mxu1 }
 0x55a   :  { %5857 = vmatpush3.bf16.msra.mxu1 %v6386_v38 }
 0x55b   :  { %5862 = vmatprep.subr.bf16.mxu1 %v6406_v0 }
 0x55d   :  { %5859 = vmatmul.mubr.msk.bf16.vlgmr.msra.gmra.mxu1 %vm3428_vm9, %v4521_v22 }
 0x55e   :  { %v3755_v13 = vpop.f32.mrf.mxu1  ;;  %5878 = vmatprep.mubr.msk.bf16.mxu1 %vm6408_vm2, %v6406_v0  ;;  %5863 = vmatpush3.bf16.msra.mxu1 %v4664_v49 }
 0x55f   :  { %v3761_v25 = vadd.f32 %v3755_v13, %v3692_v37  ;;  %5864 = vmatprep.subr.bf16.mxu1 %v6406_v0 }
 0x560   :  { %v5740_v31 = vpop.f32.mrf.mxu1 }
 0x562   :  { %v3758_v30 = vpop.f32.mrf.mxu1  ;;  %5865 = vmatpush3.bf16.msra.mxu1 %v6390_v42 }
 0x563   :  { %5866 = vmatprep.subr.bf16.mxu1 %v6406_v0 }
 0x564   :  { %v5741_v29 = vpop.f32.mrf.mxu1 }
 0x566   :  { %5867 = vmatpush3.bf16.msra.mxu1 %v6391_v54 }
 0x567   :  { %5868 = vmatprep.subr.bf16.mxu1 %v6406_v0 }
 0x56a   :  { %v3824_v6 = vpop.f32.mrf.mxu1  ;;  %5869 = vmatpush3.bf16.msra.mxu1 %v6392_v1 }
 0x56b   :  { %v3830_v59 = vadd.f32 %v3824_v6, %v3761_v25  ;;  %5870 = vmatprep.subr.bf16.mxu1 %v6406_v0 }
 0x56c   :  { %v5750_v57 = vpop.f32.mrf.mxu1 }
 0x56e   :  { %v3827_v58 = vpop.f32.mrf.mxu1  ;;  %5871 = vmatpush3.bf16.msra.mxu1 %v6393_v43 }
 0x56f   :  { %5872 = vmatprep.subr.bf16.mxu1 %v6406_v0 }
 0x570   :  { %v5751_v53 = vpop.f32.mrf.mxu1 }
 0x571   :  { %v5106_v53 = vld [vmem:[%s8312_s10] ss:$0 sm:$0xff] }
 0x572   :  { %5873 = vmatpush3.bf16.msra.mxu1 %v6394_v24 }
 0x573   :  { %5874 = vmatprep.subr.bf16.mxu1 %v6406_v0 }
 0x576   :  { %v3893_v9 = vpop.f32.mrf.mxu1  ;;  %5875 = vmatpush3.bf16.msra.mxu1 %v6395_v55 }
 0x577   :  { %v3899_v32 = vadd.f32 %v3893_v9, %v3830_v59  ;;  %5876 = vmatprep.subr.bf16.mxu1 %v6406_v0 }
 0x578   :  { %v5760_v39 = vpop.f32.mrf.mxu1 }
 0x57a   :  { %v3896_v48 = vpop.f32.mrf.mxu1  ;;  %5877 = vmatpush3.bf16.msra.mxu1 %v6396_v56 }
 0x57c   :  { %v5761_v35 = vpop.f32.mrf.mxu1 }
 0x582   :  { %v3962_v41 = vpop.f32.mrf.mxu1 }
 0x583   :  { %v3968_v46 = vadd.f32 %v3962_v41, %v3899_v32 }
 0x584   :  { %v5770_v60 = vpop.f32.mrf.mxu1 }
 0x585   :  { %v5116_v60 = vld [vmem:[%s8313_s12] ss:$0 sm:$0xff] }
 0x586   :  { %v3965_v45 = vpop.f32.mrf.mxu1 }
 0x588   :  { %v5771_v10 = vpop.f32.mrf.mxu1 }
 0x58e   :  { %v4031_v47 = vpop.f32.mrf.mxu1 }
 0x58f   :  { %v4037_v28 = vadd.f32 %v4031_v47, %v3968_v46 }
 0x590   :  { %v5780_v50 = vpop.f32.mrf.mxu1 }
 0x592   :  { %v4034_v52 = vpop.f32.mrf.mxu1 }
 0x594   :  { %v5781_v26 = vpop.f32.mrf.mxu1 }
 0x59a   :  { %v4100_v33 = vpop.f32.mrf.mxu1 }
 0x59b   :  { %v4106_v27 = vadd.f32 %v4100_v33, %v4037_v28 }
 0x59c   :  { %v5790_v20 = vpop.f32.mrf.mxu1 }
 0x59e   :  { %v4103_v51 = vpop.f32.mrf.mxu1 }
 0x5a0   :  { %v5791_v7 = vpop.f32.mrf.mxu1 }
 0x5a6   :  { %v4169_v16 = vpop.f32.mrf.mxu1 }
 0x5a7   :  { %v4175_v5 = vadd.f32 %v4169_v16, %v4106_v27 }
 0x5a8   :  { %v5800_v23 = vpop.f32.mrf.mxu1 }
 0x5aa   :  { %v4172_v62 = vpop.f32.mrf.mxu1 }
 0x5ac   :  { %v5801_v36 = vpop.f32.mrf.mxu1 }
 0x5b2   :  { %v4238_v8 = vpop.f32.mrf.mxu1 }
 0x5b3   :  { %v4244_v15 = vadd.f32 %v4238_v8, %v4175_v5 }
 0x5b4   :  { %v5810_v3 = vpop.f32.mrf.mxu1 }
 0x5b6   :  { %v4241_v21 = vpop.f32.mrf.mxu1 }
 0x5b8   :  { %v5811_v11 = vpop.f32.mrf.mxu1 }
 0x5be   :  { %v4307_v12 = vpop.f32.mrf.mxu1 }
 0x5bf   :  { %v4313_v34 = vadd.f32 %v4307_v12, %v4244_v15 }
 0x5c0   :  { %v5820_v19 = vpop.f32.mrf.mxu1 }
 0x5c2   :  { %v4310_v17 = vpop.f32.mrf.mxu1 }
 0x5c4   :  { %v5821_v2 = vpop.f32.mrf.mxu1 }
 0x5d1   :  { %v4376_v38 = vpop.f32.mrf.mxu1 }
 0x5d2   :  { %v4382_v18 = vadd.f32 %v4376_v38, %v4313_v34 }
 0x5d3   :  { %v5830_v14 = vpop.f32.mrf.mxu1 }
 0x5d5   :  { %v4379_v44 = vpop.f32.mrf.mxu1 }
 0x5d7   :  { %v5831_v22 = vpop.f32.mrf.mxu1 }
 0x5dd   :  { %v4445_v0 = vpop.f32.mrf.mxu1 }
 0x5de   :  { %v4451_v61 = vadd.f32 %v4445_v0, %v4382_v18 }
 0x5df   :  { %v5840_v37 = vpop.f32.mrf.mxu1 }
 0x5e1   :  { %v4448_v13 = vpop.f32.mrf.mxu1 }
 0x5e3   :  { %v5841_v25 = vpop.f32.mrf.mxu1 }
 0x611   :  { %v4514_v31 = vpop.f32.mrf.mxu1 }
 0x612   :  { %v4520_v49 = vadd.f32 %v4514_v31, %v4451_v61 }
 0x613   :  { %v5850_v30 = vpop.f32.mrf.mxu1 }
 0x615   :  { %v4517_v40 = vpop.f32.mrf.mxu1 }
 0x617   :  { %v5851_v29 = vpop.f32.mrf.mxu1 }
 0x61d   :  { %v4583_v42 = vpop.f32.mrf.mxu1 }
 0x61e   :  { %v4589_v6 = vadd.f32 %v4583_v42, %v4520_v49 }
 0x61f   :  { %v5860_v59 = vpop.f32.mrf.mxu1 }
 0x620   :  { %v4590_v54 = vmax.f32 %v4589_v6, 0.0 }
 0x621   :  { %v4586_v57 = vpop.f32.mrf.mxu1 }
 0x622   :  { %v4591_v58 = vpack.c.bf16 %v4590_v54, %v4590_v54 }
 0x623   :  { %v5861_v1 = vpop.f32.mrf.mxu1 }
 0x624   :  { %5879 = vmatmul.mubr.msk.bf16.vlgmr.msra.gmra.mxu1 %vm4659_vm12, %v4591_v58 }
 0x6e4   :  { %v4700_v9 = vpop.f32.mrf.mxu1 }
 0x6e5   :  { %v4701_v32 = vadd.f32 %v5106_v53, %v4700_v9 }
 0x6e6   :  { %v5880_v39 = vpop.f32.mrf.mxu1 }
 0x6e7   :  { %v4706_v48 = vmax.f32 %v4701_v32, 0.0 }
 0x6e8   :  { %v4703_v35 = vpop.f32.mrf.mxu1 }
 0x6e9   :  { %v4707_v41 = vpack.c.bf16 %v4706_v48, %v4706_v48 }
 0x6ea   :  { %v5881_v46 = vpop.f32.mrf.mxu1 }
 0x6eb   :  { %5895 = vmatmul.mubr.msk.bf16.vlgmr.msra.gmra.mxu0 %vm4759_vm13, %v4707_v41 }
 0x7ab   :  { %v4800_v45 = vpop.f32.mrf.mxu0 }
 0x7ac   :  { %v4801_v10 = vadd.f32 %v5116_v60, %v4800_v45 }
 0x7ad   :  { %v5896_v47 = vpop.f32.mrf.mxu0 }
 0x7ae   :  { %4806 = vst [vmem:[%s8314_s13] sm:$0xff] %v4801_v10 }
 0x7af   :  { %v4803_v28 = vpop.f32.mrf.mxu0 }
 0x7b1   :  { %v5897_v50 = vpop.f32.mrf.mxu0 }

</bundles_post_ra>
